<compile_context>
chip_gen: v5e
topology: v5e:2x2
jax: 0.10.0
libtpu: 0.0.40
codegen_flags: <defaults>
</compile_context>

<pallas_src>
import math

import jax
import jax.numpy as jnp
from jax import lax
from jax.experimental import pallas as pl
from jax.experimental.pallas import tpu as pltpu


def _make_spatial_attention_kernel(*, C, H, W, K):
    P = K // 2  # 'same' padding

    def kernel(x_ref, w_ref, out_ref):
        # x_ref  : (1, C, H, W) VMEM   -- one batch element
        # w_ref  : (2, K*K)     SMEM   -- conv weight rows: [avg plane, max plane]
        # out_ref: (1, 1, H, W) VMEM
        x = x_ref[0]                                   # (C, H, W)

        # --- channel pooling: the two conv input planes --------------------
        avg = jnp.sum(x, axis=0) * (1.0 / C)           # (H, W)
        mx = jnp.max(x, axis=0)                        # (H, W)

        # --- pad once per plane (hoisted out of the tap loops) --------------
        zrow = jnp.zeros((P, W + 2 * P), jnp.float32)
        zcol = jnp.zeros((H, P), jnp.float32)

        def pad2d(a):
            a = jnp.concatenate([zcol, a, zcol], axis=1)       # (H, W+2P)
            return jnp.concatenate([zrow, a, zrow], axis=0)    # (H+2P, W+2P)

        planes = (pad2d(avg), pad2d(mx))

        # --- KxK conv, 2 -> 1 channels, no bias ------------------------------
        # Taps are static windows of the padded planes; weights are SMEM scalars.
        acc = planes[0][0:H, 0:W] * w_ref[0, 0]        # init with first tap
        for ci in range(2):
            for i in range(K):
                for j in range(K):
                    if ci == 0 and i == 0 and j == 0:
                        continue
                    acc = acc + planes[ci][i:i + H, j:j + W] * w_ref[ci, i * K + j]

        # --- sigmoid ---------------------------------------------------------
        out_ref[0, 0] = 1.0 / (1.0 + jnp.exp(-acc))

    return kernel


def spatial_attention_forward(x, weight, *, kernel_size=7):
    """x: (B, C, H, W); weight: (1, 2, K, K) (torch Conv2d layout). Returns (B, 1, H, W)."""
    B, C, H, W = x.shape
    K = kernel_size
    assert K in (3, 7), "kernel size must be 3 or 7"
    assert weight.shape == (1, 2, K, K), weight.shape
    w2 = weight.reshape(2, K * K).astype(jnp.float32)          # SMEM-friendly layout
    kernel = _make_spatial_attention_kernel(C=C, H=H, W=W, K=K)
    return pl.pallas_call(
        kernel,
        out_shape=jax.ShapeDtypeStruct((B, 1, H, W), jnp.float32),
        grid=(B,),
        in_specs=[
            pl.BlockSpec((1, C, H, W), lambda b: (b, 0, 0, 0)),
            pl.BlockSpec(memory_space=pltpu.MemorySpace.SMEM),   # whole weight table
        ],
        out_specs=pl.BlockSpec((1, 1, H, W), lambda b: (b, 0, 0, 0)),
        compiler_params=pltpu.CompilerParams(
            dimension_semantics=("parallel",)),                  # v7x: 2 TCs split batch
    )(x.astype(jnp.float32), w2)


# ------------------------------ pure-JAX ref ------------------------------

def spatial_attention_ref(x, weight, *, kernel_size=7):
    x = x.astype(jnp.float32)
    avg = jnp.mean(x, axis=1, keepdims=True)
    mx = jnp.max(x, axis=1, keepdims=True)
    xc = jnp.concatenate([avg, mx], axis=1)                      # (B, 2, H, W)
    p = kernel_size // 2
    y = lax.conv_general_dilated(
        xc, weight, window_strides=(1, 1), padding=((p, p), (p, p)),
        dimension_numbers=('NCHW', 'OIHW', 'NCHW'))
    return jax.nn.sigmoid(y)


# ----------------------------------- main -----------------------------------

if __name__ == "__main__":
    B, C, H, W = 2, 4, 16, 16
    K = 7

    key = jax.random.PRNGKey(0)
    kx, kw = jax.random.split(key)
    x = jax.random.normal(kx, (B, C, H, W), jnp.float32)
    # nn.Conv2d default init: U(-1/sqrt(fan_in), 1/sqrt(fan_in)), fan_in = 2*K*K
    bound = 1.0 / math.sqrt(2 * K * K)
    weight = jax.random.uniform(kw, (1, 2, K, K), jnp.float32, -bound, bound)

    out = spatial_attention_forward(x, weight, kernel_size=K)
    out = jax.block_until_ready(out)

    ref = spatial_attention_ref(x, weight, kernel_size=K)
    assert out.shape == (B, 1, H, W), out.shape
    max_err = float(jnp.max(jnp.abs(out - ref)))
    assert jnp.allclose(out, ref, rtol=2e-3, atol=2e-3), max_err
    print("KERNEL_OK")
</pallas_src>

<mosaic_0001>
module attributes {stable_mosaic.version = 11 : i64} {
  func.func @kernel(%arg0: i32, %arg1: memref<1x4x16x16xf32, #tpu.memory_space<vmem>>, %arg2: memref<2x49xf32, #tpu.memory_space<smem>>, %arg3: memref<1x1x16x16xf32, #tpu.memory_space<vmem>>) attributes {dimension_semantics = [#tpu.dimension_semantics<parallel>], iteration_bounds = array<i64: 2>, scalar_prefetch = 0 : i64, scratch_operands = 0 : i64, tpu.core_type = #tpu.core_type<tc>, window_params = [{transform_indices = @transform_0, window_bounds = array<i64: 1, 4, 16, 16>}, {transform_indices = @transform_1, window_bounds = array<i64: 2, 49>}, {transform_indices = @transform_2, window_bounds = array<i64: 1, 1, 16, 16>}]} {
    %c0 = arith.constant 0 : index
    %c0_0 = arith.constant 0 : index
    %c0_1 = arith.constant 0 : index
    %c0_2 = arith.constant 0 : index
    %0 = vector.load %arg1[%c0, %c0_0, %c0_1, %c0_2] : memref<1x4x16x16xf32, #tpu.memory_space<vmem>>, vector<1x4x16x16xf32>
    %1 = vector.shape_cast %0 : vector<1x4x16x16xf32> to vector<4x16x16xf32>
    %cst = arith.constant dense<0.000000e+00> : vector<16x16xf32>
    %2 = vector.multi_reduction <add>, %1, %cst [0] : vector<4x16x16xf32> to vector<16x16xf32>
    %cst_3 = arith.constant 2.500000e-01 : f32
    %3 = vector.broadcast %cst_3 : f32 to vector<16x16xf32>
    %4 = arith.mulf %2, %3 : vector<16x16xf32>
    %cst_4 = arith.constant dense<0xFF800000> : vector<16x16xf32>
    %5 = vector.multi_reduction <maximumf>, %1, %cst_4 [0] : vector<4x16x16xf32> to vector<16x16xf32>
    %cst_5 = arith.constant 0.000000e+00 : f32
    %6 = vector.broadcast %cst_5 : f32 to vector<3x22xf32>
    %cst_6 = arith.constant 0.000000e+00 : f32
    %7 = vector.broadcast %cst_6 : f32 to vector<16x3xf32>
    %8 = tpu.concatenate %7, %4, %7 in 1 : vector<16x3xf32>, vector<16x16xf32>, vector<16x3xf32> -> vector<16x22xf32>
    %9 = tpu.concatenate %6, %8, %6 in 0 : vector<3x22xf32>, vector<16x22xf32>, vector<3x22xf32> -> vector<22x22xf32>
    %10 = tpu.concatenate %7, %5, %7 in 1 : vector<16x3xf32>, vector<16x16xf32>, vector<16x3xf32> -> vector<16x22xf32>
    %11 = tpu.concatenate %6, %10, %6 in 0 : vector<3x22xf32>, vector<16x22xf32>, vector<3x22xf32> -> vector<22x22xf32>
    %12 = vector.extract_strided_slice %9 {offsets = [0, 0], sizes = [16, 16], strides = [1, 1]} : vector<22x22xf32> to vector<16x16xf32>
    %c0_7 = arith.constant 0 : index
    %c0_8 = arith.constant 0 : index
    %13 = memref.load %arg2[%c0_7, %c0_8] : memref<2x49xf32, #tpu.memory_space<smem>>
    %14 = vector.broadcast %13 : f32 to vector<16x16xf32>
    %15 = arith.mulf %12, %14 : vector<16x16xf32>
    %16 = vector.extract_strided_slice %9 {offsets = [0, 1], sizes = [16, 16], strides = [1, 1]} : vector<22x22xf32> to vector<16x16xf32>
    %c0_9 = arith.constant 0 : index
    %c1 = arith.constant 1 : index
    %17 = memref.load %arg2[%c0_9, %c1] : memref<2x49xf32, #tpu.memory_space<smem>>
    %18 = vector.broadcast %17 : f32 to vector<16x16xf32>
    %19 = arith.mulf %16, %18 : vector<16x16xf32>
    %20 = arith.addf %15, %19 : vector<16x16xf32>
    %21 = vector.extract_strided_slice %9 {offsets = [0, 2], sizes = [16, 16], strides = [1, 1]} : vector<22x22xf32> to vector<16x16xf32>
    %c0_10 = arith.constant 0 : index
    %c2 = arith.constant 2 : index
    %22 = memref.load %arg2[%c0_10, %c2] : memref<2x49xf32, #tpu.memory_space<smem>>
    %23 = vector.broadcast %22 : f32 to vector<16x16xf32>
    %24 = arith.mulf %21, %23 : vector<16x16xf32>
    %25 = arith.addf %20, %24 : vector<16x16xf32>
    %26 = vector.extract_strided_slice %9 {offsets = [0, 3], sizes = [16, 16], strides = [1, 1]} : vector<22x22xf32> to vector<16x16xf32>
    %c0_11 = arith.constant 0 : index
    %c3 = arith.constant 3 : index
    %27 = memref.load %arg2[%c0_11, %c3] : memref<2x49xf32, #tpu.memory_space<smem>>
    %28 = vector.broadcast %27 : f32 to vector<16x16xf32>
    %29 = arith.mulf %26, %28 : vector<16x16xf32>
    %30 = arith.addf %25, %29 : vector<16x16xf32>
    %31 = vector.extract_strided_slice %9 {offsets = [0, 4], sizes = [16, 16], strides = [1, 1]} : vector<22x22xf32> to vector<16x16xf32>
    %c0_12 = arith.constant 0 : index
    %c4 = arith.constant 4 : index
    %32 = memref.load %arg2[%c0_12, %c4] : memref<2x49xf32, #tpu.memory_space<smem>>
    %33 = vector.broadcast %32 : f32 to vector<16x16xf32>
    %34 = arith.mulf %31, %33 : vector<16x16xf32>
    %35 = arith.addf %30, %34 : vector<16x16xf32>
    %36 = vector.extract_strided_slice %9 {offsets = [0, 5], sizes = [16, 16], strides = [1, 1]} : vector<22x22xf32> to vector<16x16xf32>
    %c0_13 = arith.constant 0 : index
    %c5 = arith.constant 5 : index
    %37 = memref.load %arg2[%c0_13, %c5] : memref<2x49xf32, #tpu.memory_space<smem>>
    %38 = vector.broadcast %37 : f32 to vector<16x16xf32>
    %39 = arith.mulf %36, %38 : vector<16x16xf32>
    %40 = arith.addf %35, %39 : vector<16x16xf32>
    %41 = vector.extract_strided_slice %9 {offsets = [0, 6], sizes = [16, 16], strides = [1, 1]} : vector<22x22xf32> to vector<16x16xf32>
    %c0_14 = arith.constant 0 : index
    %c6 = arith.constant 6 : index
    %42 = memref.load %arg2[%c0_14, %c6] : memref<2x49xf32, #tpu.memory_space<smem>>
    %43 = vector.broadcast %42 : f32 to vector<16x16xf32>
    %44 = arith.mulf %41, %43 : vector<16x16xf32>
    %45 = arith.addf %40, %44 : vector<16x16xf32>
    %46 = vector.extract_strided_slice %9 {offsets = [1, 0], sizes = [16, 16], strides = [1, 1]} : vector<22x22xf32> to vector<16x16xf32>
    %c0_15 = arith.constant 0 : index
    %c7 = arith.constant 7 : index
    %47 = memref.load %arg2[%c0_15, %c7] : memref<2x49xf32, #tpu.memory_space<smem>>
    %48 = vector.broadcast %47 : f32 to vector<16x16xf32>
    %49 = arith.mulf %46, %48 : vector<16x16xf32>
    %50 = arith.addf %45, %49 : vector<16x16xf32>
    %51 = vector.extract_strided_slice %9 {offsets = [1, 1], sizes = [16, 16], strides = [1, 1]} : vector<22x22xf32> to vector<16x16xf32>
    %c0_16 = arith.constant 0 : index
    %c8 = arith.constant 8 : index
    %52 = memref.load %arg2[%c0_16, %c8] : memref<2x49xf32, #tpu.memory_space<smem>>
    %53 = vector.broadcast %52 : f32 to vector<16x16xf32>
    %54 = arith.mulf %51, %53 : vector<16x16xf32>
    %55 = arith.addf %50, %54 : vector<16x16xf32>
    %56 = vector.extract_strided_slice %9 {offsets = [1, 2], sizes = [16, 16], strides = [1, 1]} : vector<22x22xf32> to vector<16x16xf32>
    %c0_17 = arith.constant 0 : index
    %c9 = arith.constant 9 : index
    %57 = memref.load %arg2[%c0_17, %c9] : memref<2x49xf32, #tpu.memory_space<smem>>
    %58 = vector.broadcast %57 : f32 to vector<16x16xf32>
    %59 = arith.mulf %56, %58 : vector<16x16xf32>
    %60 = arith.addf %55, %59 : vector<16x16xf32>
    %61 = vector.extract_strided_slice %9 {offsets = [1, 3], sizes = [16, 16], strides = [1, 1]} : vector<22x22xf32> to vector<16x16xf32>
    %c0_18 = arith.constant 0 : index
    %c10 = arith.constant 10 : index
    %62 = memref.load %arg2[%c0_18, %c10] : memref<2x49xf32, #tpu.memory_space<smem>>
    %63 = vector.broadcast %62 : f32 to vector<16x16xf32>
    %64 = arith.mulf %61, %63 : vector<16x16xf32>
    %65 = arith.addf %60, %64 : vector<16x16xf32>
    %66 = vector.extract_strided_slice %9 {offsets = [1, 4], sizes = [16, 16], strides = [1, 1]} : vector<22x22xf32> to vector<16x16xf32>
    %c0_19 = arith.constant 0 : index
    %c11 = arith.constant 11 : index
    %67 = memref.load %arg2[%c0_19, %c11] : memref<2x49xf32, #tpu.memory_space<smem>>
    %68 = vector.broadcast %67 : f32 to vector<16x16xf32>
    %69 = arith.mulf %66, %68 : vector<16x16xf32>
    %70 = arith.addf %65, %69 : vector<16x16xf32>
    %71 = vector.extract_strided_slice %9 {offsets = [1, 5], sizes = [16, 16], strides = [1, 1]} : vector<22x22xf32> to vector<16x16xf32>
    %c0_20 = arith.constant 0 : index
    %c12 = arith.constant 12 : index
    %72 = memref.load %arg2[%c0_20, %c12] : memref<2x49xf32, #tpu.memory_space<smem>>
    %73 = vector.broadcast %72 : f32 to vector<16x16xf32>
    %74 = arith.mulf %71, %73 : vector<16x16xf32>
    %75 = arith.addf %70, %74 : vector<16x16xf32>
    %76 = vector.extract_strided_slice %9 {offsets = [1, 6], sizes = [16, 16], strides = [1, 1]} : vector<22x22xf32> to vector<16x16xf32>
    %c0_21 = arith.constant 0 : index
    %c13 = arith.constant 13 : index
    %77 = memref.load %arg2[%c0_21, %c13] : memref<2x49xf32, #tpu.memory_space<smem>>
    %78 = vector.broadcast %77 : f32 to vector<16x16xf32>
    %79 = arith.mulf %76, %78 : vector<16x16xf32>
    %80 = arith.addf %75, %79 : vector<16x16xf32>
    %81 = vector.extract_strided_slice %9 {offsets = [2, 0], sizes = [16, 16], strides = [1, 1]} : vector<22x22xf32> to vector<16x16xf32>
    %c0_22 = arith.constant 0 : index
    %c14 = arith.constant 14 : index
    %82 = memref.load %arg2[%c0_22, %c14] : memref<2x49xf32, #tpu.memory_space<smem>>
    %83 = vector.broadcast %82 : f32 to vector<16x16xf32>
    %84 = arith.mulf %81, %83 : vector<16x16xf32>
    %85 = arith.addf %80, %84 : vector<16x16xf32>
    %86 = vector.extract_strided_slice %9 {offsets = [2, 1], sizes = [16, 16], strides = [1, 1]} : vector<22x22xf32> to vector<16x16xf32>
    %c0_23 = arith.constant 0 : index
    %c15 = arith.constant 15 : index
    %87 = memref.load %arg2[%c0_23, %c15] : memref<2x49xf32, #tpu.memory_space<smem>>
    %88 = vector.broadcast %87 : f32 to vector<16x16xf32>
    %89 = arith.mulf %86, %88 : vector<16x16xf32>
    %90 = arith.addf %85, %89 : vector<16x16xf32>
    %91 = vector.extract_strided_slice %9 {offsets = [2, 2], sizes = [16, 16], strides = [1, 1]} : vector<22x22xf32> to vector<16x16xf32>
    %c0_24 = arith.constant 0 : index
    %c16 = arith.constant 16 : index
    %92 = memref.load %arg2[%c0_24, %c16] : memref<2x49xf32, #tpu.memory_space<smem>>
    %93 = vector.broadcast %92 : f32 to vector<16x16xf32>
    %94 = arith.mulf %91, %93 : vector<16x16xf32>
    %95 = arith.addf %90, %94 : vector<16x16xf32>
    %96 = vector.extract_strided_slice %9 {offsets = [2, 3], sizes = [16, 16], strides = [1, 1]} : vector<22x22xf32> to vector<16x16xf32>
    %c0_25 = arith.constant 0 : index
    %c17 = arith.constant 17 : index
    %97 = memref.load %arg2[%c0_25, %c17] : memref<2x49xf32, #tpu.memory_space<smem>>
    %98 = vector.broadcast %97 : f32 to vector<16x16xf32>
    %99 = arith.mulf %96, %98 : vector<16x16xf32>
    %100 = arith.addf %95, %99 : vector<16x16xf32>
    %101 = vector.extract_strided_slice %9 {offsets = [2, 4], sizes = [16, 16], strides = [1, 1]} : vector<22x22xf32> to vector<16x16xf32>
    %c0_26 = arith.constant 0 : index
    %c18 = arith.constant 18 : index
    %102 = memref.load %arg2[%c0_26, %c18] : memref<2x49xf32, #tpu.memory_space<smem>>
    %103 = vector.broadcast %102 : f32 to vector<16x16xf32>
    %104 = arith.mulf %101, %103 : vector<16x16xf32>
    %105 = arith.addf %100, %104 : vector<16x16xf32>
    %106 = vector.extract_strided_slice %9 {offsets = [2, 5], sizes = [16, 16], strides = [1, 1]} : vector<22x22xf32> to vector<16x16xf32>
    %c0_27 = arith.constant 0 : index
    %c19 = arith.constant 19 : index
    %107 = memref.load %arg2[%c0_27, %c19] : memref<2x49xf32, #tpu.memory_space<smem>>
    %108 = vector.broadcast %107 : f32 to vector<16x16xf32>
    %109 = arith.mulf %106, %108 : vector<16x16xf32>
    %110 = arith.addf %105, %109 : vector<16x16xf32>
    %111 = vector.extract_strided_slice %9 {offsets = [2, 6], sizes = [16, 16], strides = [1, 1]} : vector<22x22xf32> to vector<16x16xf32>
    %c0_28 = arith.constant 0 : index
    %c20 = arith.constant 20 : index
    %112 = memref.load %arg2[%c0_28, %c20] : memref<2x49xf32, #tpu.memory_space<smem>>
    %113 = vector.broadcast %112 : f32 to vector<16x16xf32>
    %114 = arith.mulf %111, %113 : vector<16x16xf32>
    %115 = arith.addf %110, %114 : vector<16x16xf32>
    %116 = vector.extract_strided_slice %9 {offsets = [3, 0], sizes = [16, 16], strides = [1, 1]} : vector<22x22xf32> to vector<16x16xf32>
    %c0_29 = arith.constant 0 : index
    %c21 = arith.constant 21 : index
    %117 = memref.load %arg2[%c0_29, %c21] : memref<2x49xf32, #tpu.memory_space<smem>>
    %118 = vector.broadcast %117 : f32 to vector<16x16xf32>
    %119 = arith.mulf %116, %118 : vector<16x16xf32>
    %120 = arith.addf %115, %119 : vector<16x16xf32>
    %121 = vector.extract_strided_slice %9 {offsets = [3, 1], sizes = [16, 16], strides = [1, 1]} : vector<22x22xf32> to vector<16x16xf32>
    %c0_30 = arith.constant 0 : index
    %c22 = arith.constant 22 : index
    %122 = memref.load %arg2[%c0_30, %c22] : memref<2x49xf32, #tpu.memory_space<smem>>
    %123 = vector.broadcast %122 : f32 to vector<16x16xf32>
    %124 = arith.mulf %121, %123 : vector<16x16xf32>
    %125 = arith.addf %120, %124 : vector<16x16xf32>
    %126 = vector.extract_strided_slice %9 {offsets = [3, 2], sizes = [16, 16], strides = [1, 1]} : vector<22x22xf32> to vector<16x16xf32>
    %c0_31 = arith.constant 0 : index
    %c23 = arith.constant 23 : index
    %127 = memref.load %arg2[%c0_31, %c23] : memref<2x49xf32, #tpu.memory_space<smem>>
    %128 = vector.broadcast %127 : f32 to vector<16x16xf32>
    %129 = arith.mulf %126, %128 : vector<16x16xf32>
    %130 = arith.addf %125, %129 : vector<16x16xf32>
    %131 = vector.extract_strided_slice %9 {offsets = [3, 3], sizes = [16, 16], strides = [1, 1]} : vector<22x22xf32> to vector<16x16xf32>
    %c0_32 = arith.constant 0 : index
    %c24 = arith.constant 24 : index
    %132 = memref.load %arg2[%c0_32, %c24] : memref<2x49xf32, #tpu.memory_space<smem>>
    %133 = vector.broadcast %132 : f32 to vector<16x16xf32>
    %134 = arith.mulf %131, %133 : vector<16x16xf32>
    %135 = arith.addf %130, %134 : vector<16x16xf32>
    %136 = vector.extract_strided_slice %9 {offsets = [3, 4], sizes = [16, 16], strides = [1, 1]} : vector<22x22xf32> to vector<16x16xf32>
    %c0_33 = arith.constant 0 : index
    %c25 = arith.constant 25 : index
    %137 = memref.load %arg2[%c0_33, %c25] : memref<2x49xf32, #tpu.memory_space<smem>>
    %138 = vector.broadcast %137 : f32 to vector<16x16xf32>
    %139 = arith.mulf %136, %138 : vector<16x16xf32>
    %140 = arith.addf %135, %139 : vector<16x16xf32>
    %141 = vector.extract_strided_slice %9 {offsets = [3, 5], sizes = [16, 16], strides = [1, 1]} : vector<22x22xf32> to vector<16x16xf32>
    %c0_34 = arith.constant 0 : index
    %c26 = arith.constant 26 : index
    %142 = memref.load %arg2[%c0_34, %c26] : memref<2x49xf32, #tpu.memory_space<smem>>
    %143 = vector.broadcast %142 : f32 to vector<16x16xf32>
    %144 = arith.mulf %141, %143 : vector<16x16xf32>
    %145 = arith.addf %140, %144 : vector<16x16xf32>
    %146 = vector.extract_strided_slice %9 {offsets = [3, 6], sizes = [16, 16], strides = [1, 1]} : vector<22x22xf32> to vector<16x16xf32>
    %c0_35 = arith.constant 0 : index
    %c27 = arith.constant 27 : index
    %147 = memref.load %arg2[%c0_35, %c27] : memref<2x49xf32, #tpu.memory_space<smem>>
    %148 = vector.broadcast %147 : f32 to vector<16x16xf32>
    %149 = arith.mulf %146, %148 : vector<16x16xf32>
    %150 = arith.addf %145, %149 : vector<16x16xf32>
    %151 = vector.extract_strided_slice %9 {offsets = [4, 0], sizes = [16, 16], strides = [1, 1]} : vector<22x22xf32> to vector<16x16xf32>
    %c0_36 = arith.constant 0 : index
    %c28 = arith.constant 28 : index
    %152 = memref.load %arg2[%c0_36, %c28] : memref<2x49xf32, #tpu.memory_space<smem>>
    %153 = vector.broadcast %152 : f32 to vector<16x16xf32>
    %154 = arith.mulf %151, %153 : vector<16x16xf32>
    %155 = arith.addf %150, %154 : vector<16x16xf32>
    %156 = vector.extract_strided_slice %9 {offsets = [4, 1], sizes = [16, 16], strides = [1, 1]} : vector<22x22xf32> to vector<16x16xf32>
    %c0_37 = arith.constant 0 : index
    %c29 = arith.constant 29 : index
    %157 = memref.load %arg2[%c0_37, %c29] : memref<2x49xf32, #tpu.memory_space<smem>>
    %158 = vector.broadcast %157 : f32 to vector<16x16xf32>
    %159 = arith.mulf %156, %158 : vector<16x16xf32>
    %160 = arith.addf %155, %159 : vector<16x16xf32>
    %161 = vector.extract_strided_slice %9 {offsets = [4, 2], sizes = [16, 16], strides = [1, 1]} : vector<22x22xf32> to vector<16x16xf32>
    %c0_38 = arith.constant 0 : index
    %c30 = arith.constant 30 : index
    %162 = memref.load %arg2[%c0_38, %c30] : memref<2x49xf32, #tpu.memory_space<smem>>
    %163 = vector.broadcast %162 : f32 to vector<16x16xf32>
    %164 = arith.mulf %161, %163 : vector<16x16xf32>
    %165 = arith.addf %160, %164 : vector<16x16xf32>
    %166 = vector.extract_strided_slice %9 {offsets = [4, 3], sizes = [16, 16], strides = [1, 1]} : vector<22x22xf32> to vector<16x16xf32>
    %c0_39 = arith.constant 0 : index
    %c31 = arith.constant 31 : index
    %167 = memref.load %arg2[%c0_39, %c31] : memref<2x49xf32, #tpu.memory_space<smem>>
    %168 = vector.broadcast %167 : f32 to vector<16x16xf32>
    %169 = arith.mulf %166, %168 : vector<16x16xf32>
    %170 = arith.addf %165, %169 : vector<16x16xf32>
    %171 = vector.extract_strided_slice %9 {offsets = [4, 4], sizes = [16, 16], strides = [1, 1]} : vector<22x22xf32> to vector<16x16xf32>
    %c0_40 = arith.constant 0 : index
    %c32 = arith.constant 32 : index
    %172 = memref.load %arg2[%c0_40, %c32] : memref<2x49xf32, #tpu.memory_space<smem>>
    %173 = vector.broadcast %172 : f32 to vector<16x16xf32>
    %174 = arith.mulf %171, %173 : vector<16x16xf32>
    %175 = arith.addf %170, %174 : vector<16x16xf32>
    %176 = vector.extract_strided_slice %9 {offsets = [4, 5], sizes = [16, 16], strides = [1, 1]} : vector<22x22xf32> to vector<16x16xf32>
    %c0_41 = arith.constant 0 : index
    %c33 = arith.constant 33 : index
    %177 = memref.load %arg2[%c0_41, %c33] : memref<2x49xf32, #tpu.memory_space<smem>>
    %178 = vector.broadcast %177 : f32 to vector<16x16xf32>
    %179 = arith.mulf %176, %178 : vector<16x16xf32>
    %180 = arith.addf %175, %179 : vector<16x16xf32>
    %181 = vector.extract_strided_slice %9 {offsets = [4, 6], sizes = [16, 16], strides = [1, 1]} : vector<22x22xf32> to vector<16x16xf32>
    %c0_42 = arith.constant 0 : index
    %c34 = arith.constant 34 : index
    %182 = memref.load %arg2[%c0_42, %c34] : memref<2x49xf32, #tpu.memory_space<smem>>
    %183 = vector.broadcast %182 : f32 to vector<16x16xf32>
    %184 = arith.mulf %181, %183 : vector<16x16xf32>
    %185 = arith.addf %180, %184 : vector<16x16xf32>
    %186 = vector.extract_strided_slice %9 {offsets = [5, 0], sizes = [16, 16], strides = [1, 1]} : vector<22x22xf32> to vector<16x16xf32>
    %c0_43 = arith.constant 0 : index
    %c35 = arith.constant 35 : index
    %187 = memref.load %arg2[%c0_43, %c35] : memref<2x49xf32, #tpu.memory_space<smem>>
    %188 = vector.broadcast %187 : f32 to vector<16x16xf32>
    %189 = arith.mulf %186, %188 : vector<16x16xf32>
    %190 = arith.addf %185, %189 : vector<16x16xf32>
    %191 = vector.extract_strided_slice %9 {offsets = [5, 1], sizes = [16, 16], strides = [1, 1]} : vector<22x22xf32> to vector<16x16xf32>
    %c0_44 = arith.constant 0 : index
    %c36 = arith.constant 36 : index
    %192 = memref.load %arg2[%c0_44, %c36] : memref<2x49xf32, #tpu.memory_space<smem>>
    %193 = vector.broadcast %192 : f32 to vector<16x16xf32>
    %194 = arith.mulf %191, %193 : vector<16x16xf32>
    %195 = arith.addf %190, %194 : vector<16x16xf32>
    %196 = vector.extract_strided_slice %9 {offsets = [5, 2], sizes = [16, 16], strides = [1, 1]} : vector<22x22xf32> to vector<16x16xf32>
    %c0_45 = arith.constant 0 : index
    %c37 = arith.constant 37 : index
    %197 = memref.load %arg2[%c0_45, %c37] : memref<2x49xf32, #tpu.memory_space<smem>>
    %198 = vector.broadcast %197 : f32 to vector<16x16xf32>
    %199 = arith.mulf %196, %198 : vector<16x16xf32>
    %200 = arith.addf %195, %199 : vector<16x16xf32>
    %201 = vector.extract_strided_slice %9 {offsets = [5, 3], sizes = [16, 16], strides = [1, 1]} : vector<22x22xf32> to vector<16x16xf32>
    %c0_46 = arith.constant 0 : index
    %c38 = arith.constant 38 : index
    %202 = memref.load %arg2[%c0_46, %c38] : memref<2x49xf32, #tpu.memory_space<smem>>
    %203 = vector.broadcast %202 : f32 to vector<16x16xf32>
    %204 = arith.mulf %201, %203 : vector<16x16xf32>
    %205 = arith.addf %200, %204 : vector<16x16xf32>
    %206 = vector.extract_strided_slice %9 {offsets = [5, 4], sizes = [16, 16], strides = [1, 1]} : vector<22x22xf32> to vector<16x16xf32>
    %c0_47 = arith.constant 0 : index
    %c39 = arith.constant 39 : index
    %207 = memref.load %arg2[%c0_47, %c39] : memref<2x49xf32, #tpu.memory_space<smem>>
    %208 = vector.broadcast %207 : f32 to vector<16x16xf32>
    %209 = arith.mulf %206, %208 : vector<16x16xf32>
    %210 = arith.addf %205, %209 : vector<16x16xf32>
    %211 = vector.extract_strided_slice %9 {offsets = [5, 5], sizes = [16, 16], strides = [1, 1]} : vector<22x22xf32> to vector<16x16xf32>
    %c0_48 = arith.constant 0 : index
    %c40 = arith.constant 40 : index
    %212 = memref.load %arg2[%c0_48, %c40] : memref<2x49xf32, #tpu.memory_space<smem>>
    %213 = vector.broadcast %212 : f32 to vector<16x16xf32>
    %214 = arith.mulf %211, %213 : vector<16x16xf32>
    %215 = arith.addf %210, %214 : vector<16x16xf32>
    %216 = vector.extract_strided_slice %9 {offsets = [5, 6], sizes = [16, 16], strides = [1, 1]} : vector<22x22xf32> to vector<16x16xf32>
    %c0_49 = arith.constant 0 : index
    %c41 = arith.constant 41 : index
    %217 = memref.load %arg2[%c0_49, %c41] : memref<2x49xf32, #tpu.memory_space<smem>>
    %218 = vector.broadcast %217 : f32 to vector<16x16xf32>
    %219 = arith.mulf %216, %218 : vector<16x16xf32>
    %220 = arith.addf %215, %219 : vector<16x16xf32>
    %221 = vector.extract_strided_slice %9 {offsets = [6, 0], sizes = [16, 16], strides = [1, 1]} : vector<22x22xf32> to vector<16x16xf32>
    %c0_50 = arith.constant 0 : index
    %c42 = arith.constant 42 : index
    %222 = memref.load %arg2[%c0_50, %c42] : memref<2x49xf32, #tpu.memory_space<smem>>
    %223 = vector.broadcast %222 : f32 to vector<16x16xf32>
    %224 = arith.mulf %221, %223 : vector<16x16xf32>
    %225 = arith.addf %220, %224 : vector<16x16xf32>
    %226 = vector.extract_strided_slice %9 {offsets = [6, 1], sizes = [16, 16], strides = [1, 1]} : vector<22x22xf32> to vector<16x16xf32>
    %c0_51 = arith.constant 0 : index
    %c43 = arith.constant 43 : index
    %227 = memref.load %arg2[%c0_51, %c43] : memref<2x49xf32, #tpu.memory_space<smem>>
    %228 = vector.broadcast %227 : f32 to vector<16x16xf32>
    %229 = arith.mulf %226, %228 : vector<16x16xf32>
    %230 = arith.addf %225, %229 : vector<16x16xf32>
    %231 = vector.extract_strided_slice %9 {offsets = [6, 2], sizes = [16, 16], strides = [1, 1]} : vector<22x22xf32> to vector<16x16xf32>
    %c0_52 = arith.constant 0 : index
    %c44 = arith.constant 44 : index
    %232 = memref.load %arg2[%c0_52, %c44] : memref<2x49xf32, #tpu.memory_space<smem>>
    %233 = vector.broadcast %232 : f32 to vector<16x16xf32>
    %234 = arith.mulf %231, %233 : vector<16x16xf32>
    %235 = arith.addf %230, %234 : vector<16x16xf32>
    %236 = vector.extract_strided_slice %9 {offsets = [6, 3], sizes = [16, 16], strides = [1, 1]} : vector<22x22xf32> to vector<16x16xf32>
    %c0_53 = arith.constant 0 : index
    %c45 = arith.constant 45 : index
    %237 = memref.load %arg2[%c0_53, %c45] : memref<2x49xf32, #tpu.memory_space<smem>>
    %238 = vector.broadcast %237 : f32 to vector<16x16xf32>
    %239 = arith.mulf %236, %238 : vector<16x16xf32>
    %240 = arith.addf %235, %239 : vector<16x16xf32>
    %241 = vector.extract_strided_slice %9 {offsets = [6, 4], sizes = [16, 16], strides = [1, 1]} : vector<22x22xf32> to vector<16x16xf32>
    %c0_54 = arith.constant 0 : index
    %c46 = arith.constant 46 : index
    %242 = memref.load %arg2[%c0_54, %c46] : memref<2x49xf32, #tpu.memory_space<smem>>
    %243 = vector.broadcast %242 : f32 to vector<16x16xf32>
    %244 = arith.mulf %241, %243 : vector<16x16xf32>
    %245 = arith.addf %240, %244 : vector<16x16xf32>
    %246 = vector.extract_strided_slice %9 {offsets = [6, 5], sizes = [16, 16], strides = [1, 1]} : vector<22x22xf32> to vector<16x16xf32>
    %c0_55 = arith.constant 0 : index
    %c47 = arith.constant 47 : index
    %247 = memref.load %arg2[%c0_55, %c47] : memref<2x49xf32, #tpu.memory_space<smem>>
    %248 = vector.broadcast %247 : f32 to vector<16x16xf32>
    %249 = arith.mulf %246, %248 : vector<16x16xf32>
    %250 = arith.addf %245, %249 : vector<16x16xf32>
    %251 = vector.extract_strided_slice %9 {offsets = [6, 6], sizes = [16, 16], strides = [1, 1]} : vector<22x22xf32> to vector<16x16xf32>
    %c0_56 = arith.constant 0 : index
    %c48 = arith.constant 48 : index
    %252 = memref.load %arg2[%c0_56, %c48] : memref<2x49xf32, #tpu.memory_space<smem>>
    %253 = vector.broadcast %252 : f32 to vector<16x16xf32>
    %254 = arith.mulf %251, %253 : vector<16x16xf32>
    %255 = arith.addf %250, %254 : vector<16x16xf32>
    %256 = vector.extract_strided_slice %11 {offsets = [0, 0], sizes = [16, 16], strides = [1, 1]} : vector<22x22xf32> to vector<16x16xf32>
    %c1_57 = arith.constant 1 : index
    %c0_58 = arith.constant 0 : index
    %257 = memref.load %arg2[%c1_57, %c0_58] : memref<2x49xf32, #tpu.memory_space<smem>>
    %258 = vector.broadcast %257 : f32 to vector<16x16xf32>
    %259 = arith.mulf %256, %258 : vector<16x16xf32>
    %260 = arith.addf %255, %259 : vector<16x16xf32>
    %261 = vector.extract_strided_slice %11 {offsets = [0, 1], sizes = [16, 16], strides = [1, 1]} : vector<22x22xf32> to vector<16x16xf32>
    %c1_59 = arith.constant 1 : index
    %c1_60 = arith.constant 1 : index
    %262 = memref.load %arg2[%c1_59, %c1_60] : memref<2x49xf32, #tpu.memory_space<smem>>
    %263 = vector.broadcast %262 : f32 to vector<16x16xf32>
    %264 = arith.mulf %261, %263 : vector<16x16xf32>
    %265 = arith.addf %260, %264 : vector<16x16xf32>
    %266 = vector.extract_strided_slice %11 {offsets = [0, 2], sizes = [16, 16], strides = [1, 1]} : vector<22x22xf32> to vector<16x16xf32>
    %c1_61 = arith.constant 1 : index
    %c2_62 = arith.constant 2 : index
    %267 = memref.load %arg2[%c1_61, %c2_62] : memref<2x49xf32, #tpu.memory_space<smem>>
    %268 = vector.broadcast %267 : f32 to vector<16x16xf32>
    %269 = arith.mulf %266, %268 : vector<16x16xf32>
    %270 = arith.addf %265, %269 : vector<16x16xf32>
    %271 = vector.extract_strided_slice %11 {offsets = [0, 3], sizes = [16, 16], strides = [1, 1]} : vector<22x22xf32> to vector<16x16xf32>
    %c1_63 = arith.constant 1 : index
    %c3_64 = arith.constant 3 : index
    %272 = memref.load %arg2[%c1_63, %c3_64] : memref<2x49xf32, #tpu.memory_space<smem>>
    %273 = vector.broadcast %272 : f32 to vector<16x16xf32>
    %274 = arith.mulf %271, %273 : vector<16x16xf32>
    %275 = arith.addf %270, %274 : vector<16x16xf32>
    %276 = vector.extract_strided_slice %11 {offsets = [0, 4], sizes = [16, 16], strides = [1, 1]} : vector<22x22xf32> to vector<16x16xf32>
    %c1_65 = arith.constant 1 : index
    %c4_66 = arith.constant 4 : index
    %277 = memref.load %arg2[%c1_65, %c4_66] : memref<2x49xf32, #tpu.memory_space<smem>>
    %278 = vector.broadcast %277 : f32 to vector<16x16xf32>
    %279 = arith.mulf %276, %278 : vector<16x16xf32>
    %280 = arith.addf %275, %279 : vector<16x16xf32>
    %281 = vector.extract_strided_slice %11 {offsets = [0, 5], sizes = [16, 16], strides = [1, 1]} : vector<22x22xf32> to vector<16x16xf32>
    %c1_67 = arith.constant 1 : index
    %c5_68 = arith.constant 5 : index
    %282 = memref.load %arg2[%c1_67, %c5_68] : memref<2x49xf32, #tpu.memory_space<smem>>
    %283 = vector.broadcast %282 : f32 to vector<16x16xf32>
    %284 = arith.mulf %281, %283 : vector<16x16xf32>
    %285 = arith.addf %280, %284 : vector<16x16xf32>
    %286 = vector.extract_strided_slice %11 {offsets = [0, 6], sizes = [16, 16], strides = [1, 1]} : vector<22x22xf32> to vector<16x16xf32>
    %c1_69 = arith.constant 1 : index
    %c6_70 = arith.constant 6 : index
    %287 = memref.load %arg2[%c1_69, %c6_70] : memref<2x49xf32, #tpu.memory_space<smem>>
    %288 = vector.broadcast %287 : f32 to vector<16x16xf32>
    %289 = arith.mulf %286, %288 : vector<16x16xf32>
    %290 = arith.addf %285, %289 : vector<16x16xf32>
    %291 = vector.extract_strided_slice %11 {offsets = [1, 0], sizes = [16, 16], strides = [1, 1]} : vector<22x22xf32> to vector<16x16xf32>
    %c1_71 = arith.constant 1 : index
    %c7_72 = arith.constant 7 : index
    %292 = memref.load %arg2[%c1_71, %c7_72] : memref<2x49xf32, #tpu.memory_space<smem>>
    %293 = vector.broadcast %292 : f32 to vector<16x16xf32>
    %294 = arith.mulf %291, %293 : vector<16x16xf32>
    %295 = arith.addf %290, %294 : vector<16x16xf32>
    %296 = vector.extract_strided_slice %11 {offsets = [1, 1], sizes = [16, 16], strides = [1, 1]} : vector<22x22xf32> to vector<16x16xf32>
    %c1_73 = arith.constant 1 : index
    %c8_74 = arith.constant 8 : index
    %297 = memref.load %arg2[%c1_73, %c8_74] : memref<2x49xf32, #tpu.memory_space<smem>>
    %298 = vector.broadcast %297 : f32 to vector<16x16xf32>
    %299 = arith.mulf %296, %298 : vector<16x16xf32>
    %300 = arith.addf %295, %299 : vector<16x16xf32>
    %301 = vector.extract_strided_slice %11 {offsets = [1, 2], sizes = [16, 16], strides = [1, 1]} : vector<22x22xf32> to vector<16x16xf32>
    %c1_75 = arith.constant 1 : index
    %c9_76 = arith.constant 9 : index
    %302 = memref.load %arg2[%c1_75, %c9_76] : memref<2x49xf32, #tpu.memory_space<smem>>
    %303 = vector.broadcast %302 : f32 to vector<16x16xf32>
    %304 = arith.mulf %301, %303 : vector<16x16xf32>
    %305 = arith.addf %300, %304 : vector<16x16xf32>
    %306 = vector.extract_strided_slice %11 {offsets = [1, 3], sizes = [16, 16], strides = [1, 1]} : vector<22x22xf32> to vector<16x16xf32>
    %c1_77 = arith.constant 1 : index
    %c10_78 = arith.constant 10 : index
    %307 = memref.load %arg2[%c1_77, %c10_78] : memref<2x49xf32, #tpu.memory_space<smem>>
    %308 = vector.broadcast %307 : f32 to vector<16x16xf32>
    %309 = arith.mulf %306, %308 : vector<16x16xf32>
    %310 = arith.addf %305, %309 : vector<16x16xf32>
    %311 = vector.extract_strided_slice %11 {offsets = [1, 4], sizes = [16, 16], strides = [1, 1]} : vector<22x22xf32> to vector<16x16xf32>
    %c1_79 = arith.constant 1 : index
    %c11_80 = arith.constant 11 : index
    %312 = memref.load %arg2[%c1_79, %c11_80] : memref<2x49xf32, #tpu.memory_space<smem>>
    %313 = vector.broadcast %312 : f32 to vector<16x16xf32>
    %314 = arith.mulf %311, %313 : vector<16x16xf32>
    %315 = arith.addf %310, %314 : vector<16x16xf32>
    %316 = vector.extract_strided_slice %11 {offsets = [1, 5], sizes = [16, 16], strides = [1, 1]} : vector<22x22xf32> to vector<16x16xf32>
    %c1_81 = arith.constant 1 : index
    %c12_82 = arith.constant 12 : index
    %317 = memref.load %arg2[%c1_81, %c12_82] : memref<2x49xf32, #tpu.memory_space<smem>>
    %318 = vector.broadcast %317 : f32 to vector<16x16xf32>
    %319 = arith.mulf %316, %318 : vector<16x16xf32>
    %320 = arith.addf %315, %319 : vector<16x16xf32>
    %321 = vector.extract_strided_slice %11 {offsets = [1, 6], sizes = [16, 16], strides = [1, 1]} : vector<22x22xf32> to vector<16x16xf32>
    %c1_83 = arith.constant 1 : index
    %c13_84 = arith.constant 13 : index
    %322 = memref.load %arg2[%c1_83, %c13_84] : memref<2x49xf32, #tpu.memory_space<smem>>
    %323 = vector.broadcast %322 : f32 to vector<16x16xf32>
    %324 = arith.mulf %321, %323 : vector<16x16xf32>
    %325 = arith.addf %320, %324 : vector<16x16xf32>
    %326 = vector.extract_strided_slice %11 {offsets = [2, 0], sizes = [16, 16], strides = [1, 1]} : vector<22x22xf32> to vector<16x16xf32>
    %c1_85 = arith.constant 1 : index
    %c14_86 = arith.constant 14 : index
    %327 = memref.load %arg2[%c1_85, %c14_86] : memref<2x49xf32, #tpu.memory_space<smem>>
    %328 = vector.broadcast %327 : f32 to vector<16x16xf32>
    %329 = arith.mulf %326, %328 : vector<16x16xf32>
    %330 = arith.addf %325, %329 : vector<16x16xf32>
    %331 = vector.extract_strided_slice %11 {offsets = [2, 1], sizes = [16, 16], strides = [1, 1]} : vector<22x22xf32> to vector<16x16xf32>
    %c1_87 = arith.constant 1 : index
    %c15_88 = arith.constant 15 : index
    %332 = memref.load %arg2[%c1_87, %c15_88] : memref<2x49xf32, #tpu.memory_space<smem>>
    %333 = vector.broadcast %332 : f32 to vector<16x16xf32>
    %334 = arith.mulf %331, %333 : vector<16x16xf32>
    %335 = arith.addf %330, %334 : vector<16x16xf32>
    %336 = vector.extract_strided_slice %11 {offsets = [2, 2], sizes = [16, 16], strides = [1, 1]} : vector<22x22xf32> to vector<16x16xf32>
    %c1_89 = arith.constant 1 : index
    %c16_90 = arith.constant 16 : index
    %337 = memref.load %arg2[%c1_89, %c16_90] : memref<2x49xf32, #tpu.memory_space<smem>>
    %338 = vector.broadcast %337 : f32 to vector<16x16xf32>
    %339 = arith.mulf %336, %338 : vector<16x16xf32>
    %340 = arith.addf %335, %339 : vector<16x16xf32>
    %341 = vector.extract_strided_slice %11 {offsets = [2, 3], sizes = [16, 16], strides = [1, 1]} : vector<22x22xf32> to vector<16x16xf32>
    %c1_91 = arith.constant 1 : index
    %c17_92 = arith.constant 17 : index
    %342 = memref.load %arg2[%c1_91, %c17_92] : memref<2x49xf32, #tpu.memory_space<smem>>
    %343 = vector.broadcast %342 : f32 to vector<16x16xf32>
    %344 = arith.mulf %341, %343 : vector<16x16xf32>
    %345 = arith.addf %340, %344 : vector<16x16xf32>
    %346 = vector.extract_strided_slice %11 {offsets = [2, 4], sizes = [16, 16], strides = [1, 1]} : vector<22x22xf32> to vector<16x16xf32>
    %c1_93 = arith.constant 1 : index
    %c18_94 = arith.constant 18 : index
    %347 = memref.load %arg2[%c1_93, %c18_94] : memref<2x49xf32, #tpu.memory_space<smem>>
    %348 = vector.broadcast %347 : f32 to vector<16x16xf32>
    %349 = arith.mulf %346, %348 : vector<16x16xf32>
    %350 = arith.addf %345, %349 : vector<16x16xf32>
    %351 = vector.extract_strided_slice %11 {offsets = [2, 5], sizes = [16, 16], strides = [1, 1]} : vector<22x22xf32> to vector<16x16xf32>
    %c1_95 = arith.constant 1 : index
    %c19_96 = arith.constant 19 : index
    %352 = memref.load %arg2[%c1_95, %c19_96] : memref<2x49xf32, #tpu.memory_space<smem>>
    %353 = vector.broadcast %352 : f32 to vector<16x16xf32>
    %354 = arith.mulf %351, %353 : vector<16x16xf32>
    %355 = arith.addf %350, %354 : vector<16x16xf32>
    %356 = vector.extract_strided_slice %11 {offsets = [2, 6], sizes = [16, 16], strides = [1, 1]} : vector<22x22xf32> to vector<16x16xf32>
    %c1_97 = arith.constant 1 : index
    %c20_98 = arith.constant 20 : index
    %357 = memref.load %arg2[%c1_97, %c20_98] : memref<2x49xf32, #tpu.memory_space<smem>>
    %358 = vector.broadcast %357 : f32 to vector<16x16xf32>
    %359 = arith.mulf %356, %358 : vector<16x16xf32>
    %360 = arith.addf %355, %359 : vector<16x16xf32>
    %361 = vector.extract_strided_slice %11 {offsets = [3, 0], sizes = [16, 16], strides = [1, 1]} : vector<22x22xf32> to vector<16x16xf32>
    %c1_99 = arith.constant 1 : index
    %c21_100 = arith.constant 21 : index
    %362 = memref.load %arg2[%c1_99, %c21_100] : memref<2x49xf32, #tpu.memory_space<smem>>
    %363 = vector.broadcast %362 : f32 to vector<16x16xf32>
    %364 = arith.mulf %361, %363 : vector<16x16xf32>
    %365 = arith.addf %360, %364 : vector<16x16xf32>
    %366 = vector.extract_strided_slice %11 {offsets = [3, 1], sizes = [16, 16], strides = [1, 1]} : vector<22x22xf32> to vector<16x16xf32>
    %c1_101 = arith.constant 1 : index
    %c22_102 = arith.constant 22 : index
    %367 = memref.load %arg2[%c1_101, %c22_102] : memref<2x49xf32, #tpu.memory_space<smem>>
    %368 = vector.broadcast %367 : f32 to vector<16x16xf32>
    %369 = arith.mulf %366, %368 : vector<16x16xf32>
    %370 = arith.addf %365, %369 : vector<16x16xf32>
    %371 = vector.extract_strided_slice %11 {offsets = [3, 2], sizes = [16, 16], strides = [1, 1]} : vector<22x22xf32> to vector<16x16xf32>
    %c1_103 = arith.constant 1 : index
    %c23_104 = arith.constant 23 : index
    %372 = memref.load %arg2[%c1_103, %c23_104] : memref<2x49xf32, #tpu.memory_space<smem>>
    %373 = vector.broadcast %372 : f32 to vector<16x16xf32>
    %374 = arith.mulf %371, %373 : vector<16x16xf32>
    %375 = arith.addf %370, %374 : vector<16x16xf32>
    %376 = vector.extract_strided_slice %11 {offsets = [3, 3], sizes = [16, 16], strides = [1, 1]} : vector<22x22xf32> to vector<16x16xf32>
    %c1_105 = arith.constant 1 : index
    %c24_106 = arith.constant 24 : index
    %377 = memref.load %arg2[%c1_105, %c24_106] : memref<2x49xf32, #tpu.memory_space<smem>>
    %378 = vector.broadcast %377 : f32 to vector<16x16xf32>
    %379 = arith.mulf %376, %378 : vector<16x16xf32>
    %380 = arith.addf %375, %379 : vector<16x16xf32>
    %381 = vector.extract_strided_slice %11 {offsets = [3, 4], sizes = [16, 16], strides = [1, 1]} : vector<22x22xf32> to vector<16x16xf32>
    %c1_107 = arith.constant 1 : index
    %c25_108 = arith.constant 25 : index
    %382 = memref.load %arg2[%c1_107, %c25_108] : memref<2x49xf32, #tpu.memory_space<smem>>
    %383 = vector.broadcast %382 : f32 to vector<16x16xf32>
    %384 = arith.mulf %381, %383 : vector<16x16xf32>
    %385 = arith.addf %380, %384 : vector<16x16xf32>
    %386 = vector.extract_strided_slice %11 {offsets = [3, 5], sizes = [16, 16], strides = [1, 1]} : vector<22x22xf32> to vector<16x16xf32>
    %c1_109 = arith.constant 1 : index
    %c26_110 = arith.constant 26 : index
    %387 = memref.load %arg2[%c1_109, %c26_110] : memref<2x49xf32, #tpu.memory_space<smem>>
    %388 = vector.broadcast %387 : f32 to vector<16x16xf32>
    %389 = arith.mulf %386, %388 : vector<16x16xf32>
    %390 = arith.addf %385, %389 : vector<16x16xf32>
    %391 = vector.extract_strided_slice %11 {offsets = [3, 6], sizes = [16, 16], strides = [1, 1]} : vector<22x22xf32> to vector<16x16xf32>
    %c1_111 = arith.constant 1 : index
    %c27_112 = arith.constant 27 : index
    %392 = memref.load %arg2[%c1_111, %c27_112] : memref<2x49xf32, #tpu.memory_space<smem>>
    %393 = vector.broadcast %392 : f32 to vector<16x16xf32>
    %394 = arith.mulf %391, %393 : vector<16x16xf32>
    %395 = arith.addf %390, %394 : vector<16x16xf32>
    %396 = vector.extract_strided_slice %11 {offsets = [4, 0], sizes = [16, 16], strides = [1, 1]} : vector<22x22xf32> to vector<16x16xf32>
    %c1_113 = arith.constant 1 : index
    %c28_114 = arith.constant 28 : index
    %397 = memref.load %arg2[%c1_113, %c28_114] : memref<2x49xf32, #tpu.memory_space<smem>>
    %398 = vector.broadcast %397 : f32 to vector<16x16xf32>
    %399 = arith.mulf %396, %398 : vector<16x16xf32>
    %400 = arith.addf %395, %399 : vector<16x16xf32>
    %401 = vector.extract_strided_slice %11 {offsets = [4, 1], sizes = [16, 16], strides = [1, 1]} : vector<22x22xf32> to vector<16x16xf32>
    %c1_115 = arith.constant 1 : index
    %c29_116 = arith.constant 29 : index
    %402 = memref.load %arg2[%c1_115, %c29_116] : memref<2x49xf32, #tpu.memory_space<smem>>
    %403 = vector.broadcast %402 : f32 to vector<16x16xf32>
    %404 = arith.mulf %401, %403 : vector<16x16xf32>
    %405 = arith.addf %400, %404 : vector<16x16xf32>
    %406 = vector.extract_strided_slice %11 {offsets = [4, 2], sizes = [16, 16], strides = [1, 1]} : vector<22x22xf32> to vector<16x16xf32>
    %c1_117 = arith.constant 1 : index
    %c30_118 = arith.constant 30 : index
    %407 = memref.load %arg2[%c1_117, %c30_118] : memref<2x49xf32, #tpu.memory_space<smem>>
    %408 = vector.broadcast %407 : f32 to vector<16x16xf32>
    %409 = arith.mulf %406, %408 : vector<16x16xf32>
    %410 = arith.addf %405, %409 : vector<16x16xf32>
    %411 = vector.extract_strided_slice %11 {offsets = [4, 3], sizes = [16, 16], strides = [1, 1]} : vector<22x22xf32> to vector<16x16xf32>
    %c1_119 = arith.constant 1 : index
    %c31_120 = arith.constant 31 : index
    %412 = memref.load %arg2[%c1_119, %c31_120] : memref<2x49xf32, #tpu.memory_space<smem>>
    %413 = vector.broadcast %412 : f32 to vector<16x16xf32>
    %414 = arith.mulf %411, %413 : vector<16x16xf32>
    %415 = arith.addf %410, %414 : vector<16x16xf32>
    %416 = vector.extract_strided_slice %11 {offsets = [4, 4], sizes = [16, 16], strides = [1, 1]} : vector<22x22xf32> to vector<16x16xf32>
    %c1_121 = arith.constant 1 : index
    %c32_122 = arith.constant 32 : index
    %417 = memref.load %arg2[%c1_121, %c32_122] : memref<2x49xf32, #tpu.memory_space<smem>>
    %418 = vector.broadcast %417 : f32 to vector<16x16xf32>
    %419 = arith.mulf %416, %418 : vector<16x16xf32>
    %420 = arith.addf %415, %419 : vector<16x16xf32>
    %421 = vector.extract_strided_slice %11 {offsets = [4, 5], sizes = [16, 16], strides = [1, 1]} : vector<22x22xf32> to vector<16x16xf32>
    %c1_123 = arith.constant 1 : index
    %c33_124 = arith.constant 33 : index
    %422 = memref.load %arg2[%c1_123, %c33_124] : memref<2x49xf32, #tpu.memory_space<smem>>
    %423 = vector.broadcast %422 : f32 to vector<16x16xf32>
    %424 = arith.mulf %421, %423 : vector<16x16xf32>
    %425 = arith.addf %420, %424 : vector<16x16xf32>
    %426 = vector.extract_strided_slice %11 {offsets = [4, 6], sizes = [16, 16], strides = [1, 1]} : vector<22x22xf32> to vector<16x16xf32>
    %c1_125 = arith.constant 1 : index
    %c34_126 = arith.constant 34 : index
    %427 = memref.load %arg2[%c1_125, %c34_126] : memref<2x49xf32, #tpu.memory_space<smem>>
    %428 = vector.broadcast %427 : f32 to vector<16x16xf32>
    %429 = arith.mulf %426, %428 : vector<16x16xf32>
    %430 = arith.addf %425, %429 : vector<16x16xf32>
    %431 = vector.extract_strided_slice %11 {offsets = [5, 0], sizes = [16, 16], strides = [1, 1]} : vector<22x22xf32> to vector<16x16xf32>
    %c1_127 = arith.constant 1 : index
    %c35_128 = arith.constant 35 : index
    %432 = memref.load %arg2[%c1_127, %c35_128] : memref<2x49xf32, #tpu.memory_space<smem>>
    %433 = vector.broadcast %432 : f32 to vector<16x16xf32>
    %434 = arith.mulf %431, %433 : vector<16x16xf32>
    %435 = arith.addf %430, %434 : vector<16x16xf32>
    %436 = vector.extract_strided_slice %11 {offsets = [5, 1], sizes = [16, 16], strides = [1, 1]} : vector<22x22xf32> to vector<16x16xf32>
    %c1_129 = arith.constant 1 : index
    %c36_130 = arith.constant 36 : index
    %437 = memref.load %arg2[%c1_129, %c36_130] : memref<2x49xf32, #tpu.memory_space<smem>>
    %438 = vector.broadcast %437 : f32 to vector<16x16xf32>
    %439 = arith.mulf %436, %438 : vector<16x16xf32>
    %440 = arith.addf %435, %439 : vector<16x16xf32>
    %441 = vector.extract_strided_slice %11 {offsets = [5, 2], sizes = [16, 16], strides = [1, 1]} : vector<22x22xf32> to vector<16x16xf32>
    %c1_131 = arith.constant 1 : index
    %c37_132 = arith.constant 37 : index
    %442 = memref.load %arg2[%c1_131, %c37_132] : memref<2x49xf32, #tpu.memory_space<smem>>
    %443 = vector.broadcast %442 : f32 to vector<16x16xf32>
    %444 = arith.mulf %441, %443 : vector<16x16xf32>
    %445 = arith.addf %440, %444 : vector<16x16xf32>
    %446 = vector.extract_strided_slice %11 {offsets = [5, 3], sizes = [16, 16], strides = [1, 1]} : vector<22x22xf32> to vector<16x16xf32>
    %c1_133 = arith.constant 1 : index
    %c38_134 = arith.constant 38 : index
    %447 = memref.load %arg2[%c1_133, %c38_134] : memref<2x49xf32, #tpu.memory_space<smem>>
    %448 = vector.broadcast %447 : f32 to vector<16x16xf32>
    %449 = arith.mulf %446, %448 : vector<16x16xf32>
    %450 = arith.addf %445, %449 : vector<16x16xf32>
    %451 = vector.extract_strided_slice %11 {offsets = [5, 4], sizes = [16, 16], strides = [1, 1]} : vector<22x22xf32> to vector<16x16xf32>
    %c1_135 = arith.constant 1 : index
    %c39_136 = arith.constant 39 : index
    %452 = memref.load %arg2[%c1_135, %c39_136] : memref<2x49xf32, #tpu.memory_space<smem>>
    %453 = vector.broadcast %452 : f32 to vector<16x16xf32>
    %454 = arith.mulf %451, %453 : vector<16x16xf32>
    %455 = arith.addf %450, %454 : vector<16x16xf32>
    %456 = vector.extract_strided_slice %11 {offsets = [5, 5], sizes = [16, 16], strides = [1, 1]} : vector<22x22xf32> to vector<16x16xf32>
    %c1_137 = arith.constant 1 : index
    %c40_138 = arith.constant 40 : index
    %457 = memref.load %arg2[%c1_137, %c40_138] : memref<2x49xf32, #tpu.memory_space<smem>>
    %458 = vector.broadcast %457 : f32 to vector<16x16xf32>
    %459 = arith.mulf %456, %458 : vector<16x16xf32>
    %460 = arith.addf %455, %459 : vector<16x16xf32>
    %461 = vector.extract_strided_slice %11 {offsets = [5, 6], sizes = [16, 16], strides = [1, 1]} : vector<22x22xf32> to vector<16x16xf32>
    %c1_139 = arith.constant 1 : index
    %c41_140 = arith.constant 41 : index
    %462 = memref.load %arg2[%c1_139, %c41_140] : memref<2x49xf32, #tpu.memory_space<smem>>
    %463 = vector.broadcast %462 : f32 to vector<16x16xf32>
    %464 = arith.mulf %461, %463 : vector<16x16xf32>
    %465 = arith.addf %460, %464 : vector<16x16xf32>
    %466 = vector.extract_strided_slice %11 {offsets = [6, 0], sizes = [16, 16], strides = [1, 1]} : vector<22x22xf32> to vector<16x16xf32>
    %c1_141 = arith.constant 1 : index
    %c42_142 = arith.constant 42 : index
    %467 = memref.load %arg2[%c1_141, %c42_142] : memref<2x49xf32, #tpu.memory_space<smem>>
    %468 = vector.broadcast %467 : f32 to vector<16x16xf32>
    %469 = arith.mulf %466, %468 : vector<16x16xf32>
    %470 = arith.addf %465, %469 : vector<16x16xf32>
    %471 = vector.extract_strided_slice %11 {offsets = [6, 1], sizes = [16, 16], strides = [1, 1]} : vector<22x22xf32> to vector<16x16xf32>
    %c1_143 = arith.constant 1 : index
    %c43_144 = arith.constant 43 : index
    %472 = memref.load %arg2[%c1_143, %c43_144] : memref<2x49xf32, #tpu.memory_space<smem>>
    %473 = vector.broadcast %472 : f32 to vector<16x16xf32>
    %474 = arith.mulf %471, %473 : vector<16x16xf32>
    %475 = arith.addf %470, %474 : vector<16x16xf32>
    %476 = vector.extract_strided_slice %11 {offsets = [6, 2], sizes = [16, 16], strides = [1, 1]} : vector<22x22xf32> to vector<16x16xf32>
    %c1_145 = arith.constant 1 : index
    %c44_146 = arith.constant 44 : index
    %477 = memref.load %arg2[%c1_145, %c44_146] : memref<2x49xf32, #tpu.memory_space<smem>>
    %478 = vector.broadcast %477 : f32 to vector<16x16xf32>
    %479 = arith.mulf %476, %478 : vector<16x16xf32>
    %480 = arith.addf %475, %479 : vector<16x16xf32>
    %481 = vector.extract_strided_slice %11 {offsets = [6, 3], sizes = [16, 16], strides = [1, 1]} : vector<22x22xf32> to vector<16x16xf32>
    %c1_147 = arith.constant 1 : index
    %c45_148 = arith.constant 45 : index
    %482 = memref.load %arg2[%c1_147, %c45_148] : memref<2x49xf32, #tpu.memory_space<smem>>
    %483 = vector.broadcast %482 : f32 to vector<16x16xf32>
    %484 = arith.mulf %481, %483 : vector<16x16xf32>
    %485 = arith.addf %480, %484 : vector<16x16xf32>
    %486 = vector.extract_strided_slice %11 {offsets = [6, 4], sizes = [16, 16], strides = [1, 1]} : vector<22x22xf32> to vector<16x16xf32>
    %c1_149 = arith.constant 1 : index
    %c46_150 = arith.constant 46 : index
    %487 = memref.load %arg2[%c1_149, %c46_150] : memref<2x49xf32, #tpu.memory_space<smem>>
    %488 = vector.broadcast %487 : f32 to vector<16x16xf32>
    %489 = arith.mulf %486, %488 : vector<16x16xf32>
    %490 = arith.addf %485, %489 : vector<16x16xf32>
    %491 = vector.extract_strided_slice %11 {offsets = [6, 5], sizes = [16, 16], strides = [1, 1]} : vector<22x22xf32> to vector<16x16xf32>
    %c1_151 = arith.constant 1 : index
    %c47_152 = arith.constant 47 : index
    %492 = memref.load %arg2[%c1_151, %c47_152] : memref<2x49xf32, #tpu.memory_space<smem>>
    %493 = vector.broadcast %492 : f32 to vector<16x16xf32>
    %494 = arith.mulf %491, %493 : vector<16x16xf32>
    %495 = arith.addf %490, %494 : vector<16x16xf32>
    %496 = vector.extract_strided_slice %11 {offsets = [6, 6], sizes = [16, 16], strides = [1, 1]} : vector<22x22xf32> to vector<16x16xf32>
    %c1_153 = arith.constant 1 : index
    %c48_154 = arith.constant 48 : index
    %497 = memref.load %arg2[%c1_153, %c48_154] : memref<2x49xf32, #tpu.memory_space<smem>>
    %498 = vector.broadcast %497 : f32 to vector<16x16xf32>
    %499 = arith.mulf %496, %498 : vector<16x16xf32>
    %500 = arith.addf %495, %499 : vector<16x16xf32>
    %cst_155 = arith.constant 0.000000e+00 : f32
    %501 = vector.broadcast %cst_155 : f32 to vector<16x16xf32>
    %502 = arith.subf %501, %500 : vector<16x16xf32>
    %503 = math.exp %502 : vector<16x16xf32>
    %cst_156 = arith.constant 1.000000e+00 : f32
    %504 = vector.broadcast %cst_156 : f32 to vector<16x16xf32>
    %505 = arith.addf %504, %503 : vector<16x16xf32>
    %cst_157 = arith.constant 1.000000e+00 : f32
    %506 = vector.broadcast %cst_157 : f32 to vector<16x16xf32>
    %507 = arith.divf %506, %505 : vector<16x16xf32>
    %c0_158 = arith.constant 0 : index
    %c0_159 = arith.constant 0 : index
    %c0_160 = arith.constant 0 : index
    %c0_161 = arith.constant 0 : index
    %508 = vector.load %arg3[%c0_158, %c0_159, %c0_160, %c0_161] : memref<1x1x16x16xf32, #tpu.memory_space<vmem>>, vector<1x1x16x16xf32>
    %509 = vector.shape_cast %508 : vector<1x1x16x16xf32> to vector<16x16xf32>
    %510 = vector.shape_cast %507 : vector<16x16xf32> to vector<1x1x16x16xf32>
    tpu.vector_store %arg3[%c0_158, %c0_159, %c0_160, %c0_161], %510 {strides = array<i32>} : memref<1x1x16x16xf32, #tpu.memory_space<vmem>>, vector<1x1x16x16xf32>,
    return
  }
  func.func @transform_0(%arg0: i32) -> (i32, i32, i32, i32) {
    %c0_i32 = arith.constant 0 : i32
    %c0_i32_0 = arith.constant 0 : i32
    %c0_i32_1 = arith.constant 0 : i32
    %c0_i32_2 = arith.constant 0 : i32
    return %arg0, %c0_i32, %c0_i32_0, %c0_i32_1 : i32, i32, i32, i32
  }
  func.func @transform_1(%arg0: i32) -> (i32, i32) {
    %c0_i32 = arith.constant 0 : i32
    %c0_i32_0 = arith.constant 0 : i32
    %c0_i32_1 = arith.constant 0 : i32
    return %c0_i32, %c0_i32_0 : i32, i32
  }
  func.func @transform_2(%arg0: i32) -> (i32, i32, i32, i32) {
    %c0_i32 = arith.constant 0 : i32
    %c0_i32_0 = arith.constant 0 : i32
    %c0_i32_1 = arith.constant 0 : i32
    %c0_i32_2 = arith.constant 0 : i32
    return %arg0, %c0_i32, %c0_i32_0, %c0_i32_1 : i32, i32, i32, i32
  }
}

</mosaic_0001>

<bundles_post_ra>
// kernel: tpu_custom_call.1
= control target key start
LH: loop header
LB: loop body
LE: loop exit
PB: predicated region body
PF: predicated region fallthrough
CT: control target
= control target key end

     0   :  { %7 = vsyncpa [#allocation3], 0  ;;  %s3545_s0 = inlined_call_operand.hbm [shape: f32[2,4,16,16], index: 0, kind: input, shape index: {}]   ;;  %s3546_s1 = inlined_call_operand.hbm [shape: f32[2,49], index: 1, kind: input, shape index: {}]   ;;  %s3547_s2 = inlined_call_operand.hbm [shape: f32[2,1,16,16], index: 2, kind: output, shape index: {}]  }
   0x1   :  { %9 = vsyncpa [#allocation3 + $0x1], 0 }
   0x2   :  { %10 = vsyncpa [#allocation5], 0 }
   0x3   :  { %11 = vsyncpa [#allocation4], 0 }
   0x4   :  { %13 = vsyncpa [#allocation4 + $0x1], 0  ;;  %s2639_s9 = smov 0   ;;  %s2641_s10 = smov 0  }
   0x5   :  { %s2643_s11 = smov 0   ;;  %s2645_s12 = smov 0  }
   0x6 LB: > { %s2660_s13 = sadd.s32 4294967295, %s2610_s12   ;;  %s2304_s14 = sadd.s32 4294967294, %s2610_s12   ;;  %s2610_s12 = sphi %s2645_s12, %s3558_s12   ;;  %s2606_s11 = sphi %s2643_s11, %s3557_s11   ;;  %s2602_s10 = sphi %s2641_s10, %s3556_s10   ;;  %s2598_s9 = sphi %s2639_s9, %s3555_s9  }
   0x7   : > { %s2664_s15 = sadd.s32 1, %s2610_s12   ;;  %s26_s16 = sadd.s32 1, %s2606_s11 }
   0x8   : > { %s23_s17 = ssub.s32 %s2610_s12, %s2664_s15  ;;  %p33_p0 = scmp.ne.s32.totalorder %s2606_s11, %s2602_s10 }
   0x9   : > { %p24_p1 = scmp.eq.s32.totalorder %s23_s17, 0  ;;  %p34_p2 = scmp.eq.s32.totalorder %s2610_s12, 0 }
   0xa   : > { %p39_p3 = scmp.ne.s32.totalorder %s2602_s10, %s2598_s9  ;;  %p40_p4 = scmp.eq.s32.totalorder %s2660_s13, 0 }
   0xb   : > { %s2676_s18 = scalar_select %p24_p1, %s2606_s11, %s26_s16  }
   0xc   : > { %p2678_p5 = por %p34_p2, %p33_p0  ;;  %p2684_p6 = por %p40_p4, %p39_p3 }
   0xd   : > { %p84_p7 = scmp.eq.s32.totalorder %s2660_s13, 1  ;;  %p90_p8 = scmp.eq.s32.totalorder %s2304_s14, 1 }
   0xe   : > { %p2305_p9 = scmp.ge.s32.totalorder %s2610_s12, 1  ;;  %p97_p10 = scmp.lt.s32.totalorder %s2610_s12, 3 }
   0xf   : > { %p2691_p11 = por %p84_p7, %p33_p0  ;;  %p2695_p12 = por %p90_p8, %p39_p3 }
  0x10   : > { %p2699_p13 = pnand %p2305_p9, %p97_p10  ;;  %s109_s26 = sshll.u32 %s3546_s1, 4  ;;  %s110_s26 = int_to_ptr.hbm [resolvable:$true] %s109_s26 }
  0x11   : > { %p2440_p2 = scmp.lt.s32.totalorder %s2610_s12, 2  ;;  %s120_s27 = sand.u32 1, %s2606_s11  }
  0x12   : > { %p2427_p1 = pneg %p2699_p13  ;;  %s2308_s29 = sshll.u32 %s120_s27, 6 }
  0x13   : > { %p2715_p3 = pnand %p2440_p2, %p2678_p5  ;;  %s2612_s30 = smov [#allocation6]  }
  0x14   : > { %p2428_p7 = pnand %p2427_p1, %p40_p4  ;;  %s2417_s3 = sshll.u32 %s2610_s12, 6 }
  0x15   : > { %s124_s4 = scalar_lea.vmem [#allocation2], %s2308_s29  ;;  %s129_s8 = scalar_lea.hbm %s3545_s0, %s2417_s3 }
  0x16   : > { %2430 = dma.hbm_to_smem (!%p2428_p7), %s110_s26, 32, %s2612_s30, [#allocation5]  }
  0x17   : > { %s132_s5 = sshll.u32 %s124_s4, 4  ;;  %s130_s14 = sshll.u32 %s129_s8, 4  ;;  %s133_s5 = int_to_ptr.vmem [resolvable:$true] %s132_s5  ;;  %s131_s14 = int_to_ptr.hbm [resolvable:$true] %s130_s14 }
  0x18   : > { %s121_s16 = scalar_lea.sflag [#allocation3], %s120_s27  ;;  %s2510_s17 = sshra.s32 %s131_s14, 4  ;;  %s2511_s17 = int_to_ptr.hbm [resolvable:$true] %s2510_s17 }
  0x19   : > { %s2512_s19 = scalar_lea.hbm %s2511_s17, 64  ;;  %p2514_p8 = pneg %p2715_p3 }
  0x1a   : > { %p2513_p5 = scmp.ne.s32.totalorder %s2511_s17, %s2512_s19  ;;  %s2517_s26 = scalar_lea.hbm %s3545_s0, 128 }
  0x1b   : > { %p2518_p1 = scmp.lt.s32.totalorder %s2511_s17, %s3545_s0  ;;  %p2519_p2 = scmp.lt.s32.totalorder %s2517_s26, %s2512_s19 }
  0x1c   : > { %p2515_p9 = pnand %p2514_p8, %p2513_p5 }
  0x1d   : > { %p2520_p7 = por %p2519_p2, %p2518_p1 }
  0x1e   : > { %p2516_p10 = pneg %p2515_p9 }
  0x20   : > { %p2521_p0 = pnand %p2520_p7, %p2516_p10 }
  0x22   : > { %2524 = shalt.err (!%p2521_p0)
}
  0x23   : > { %s2613_s27 = smov 128   ;;  %s2614_s3 = smov 8  }
  0x24   : > { %2434 = dma.hbm_to_vmem [thread:$0]  (!%p2715_p3), %s131_s14, 1024, %s133_s5, %s121_s16, %s2613_s27, %s2613_s27, %s2614_s3  }
  0x25   : > { %144 = sbr.rel (%p2699_p13) target bundleno = 772 (0x304), region = 28  ;;  %s2736_s4 = sand.u32 (!%p2699_p13), 1, %s2602_s10  }
  0x26   : > { %s2312_s6 = sshll.u32 (!%p2699_p13), %s2736_s4, 6  ;;  %s147_s7 = scalar_lea.sflag (!%p2699_p13), [#allocation3], %s2736_s4 }
  0x27   : > { %s150_s8 = scalar_lea.vmem (!%p2699_p13), [#allocation2], %s2312_s6 }
  0x2a   : > { %2585 = dma.done.wait (%p2684_p6), %s147_s7, 1024  }
  0x2b   : > { %2587 = vsyncadd (%p2684_p6), %s147_s7, 4294966272 }
  0x2c   : > { %2589 = dma.done.wait (%p40_p4), [#allocation5], 32  }
  0x2d   : > { %2591 = vsyncadd (%p40_p4), [#allocation5], 4294967264 }
  0x2e   : > { %161 = sfence }
  0x2f   : > { %v178_v0 = vld [vmem:[%s150_s8] sm:$0xff]  ;;  %v180_v1 = vld [vmem:[%s150_s8 + $0x10] sm:$0xff]  ;;  %vm186_vm0 = vcmask 130048   ;;  %v179_v7 = vld [vmem:[%s150_s8 + $0x8] sm:$0xff]  ;;  %s2615_s20 = smov 3   ;;  %s2316_s23 = sld [smem:[#allocation6 + $0x2]] }
  0x30   : > { %v182_v2 = vld [vmem:[%s150_s8 + $0x20] sm:$0xff]  ;;  %v184_v3 = vld [vmem:[%s150_s8 + $0x30] sm:$0xff]  ;;  %v187_v4 = vsel %vm186_vm0, %v178_v0, 0.0  ;;  %v188_v5 = vsel %vm186_vm0, %v180_v1, 0.0  ;;  %v181_v8 = vld [vmem:[%s150_s8 + $0x18] sm:$0xff]  ;;  %v194_v11 = vsel %vm186_vm0, %v179_v7, 0.0 }
  0x31   : > { %v190_v6 = vsel %vm186_vm0, %v182_v2, 0.0  ;;  %v189_v9 = vadd.f32 %v188_v5, %v187_v4  ;;  %v183_v10 = vld [vmem:[%s150_s8 + $0x28] sm:$0xff]  ;;  %v195_v12 = vsel %vm186_vm0, %v181_v8, 0.0  ;;  %v192_v13 = vsel %vm186_vm0, %v184_v3, 0.0  ;;  %v185_v18 = vld [vmem:[%s150_s8 + $0x38] sm:$0xff]  ;;  %s2315_s28 = sld [smem:[#allocation6 + $0x1]] }
  0x32   : > { %v196_v14 = vadd.f32 %v195_v12, %v194_v11  ;;  %v197_v15 = vsel %vm186_vm0, %v183_v10, 0.0  ;;  %v203_v16 = vsel %vm186_vm0, %v178_v0, -inf  ;;  %v204_v19 = vsel %vm186_vm0, %v180_v1, -inf  ;;  %s2317_s5 = sld [smem:[#allocation6 + $0x3]]  ;;  %s2616_s14 = smov 126  }
  0x33   : > { %v191_v17 = vadd.f32 %v190_v6, %v189_v9  ;;  %v205_v20 = vsel %vm186_vm0, %v182_v2, -inf  ;;  %v207_v21 = vsel %vm186_vm0, %v184_v3, -inf  ;;  %v210_v25 = vsel %vm186_vm0, %v179_v7, -inf  ;;  %s2617_s16 = smov 127   ;;  %s2319_s17 = sld [smem:[#allocation6 + $0x5]] }
  0x34   : > { %v198_v22 = vadd.f32 %v197_v15, %v196_v14  ;;  %v206_v23 = vmax.f32 %v203_v16, %v205_v20  ;;  %v208_v24 = vmax.f32 %v204_v19, %v207_v21  ;;  %v211_v27 = vsel %vm186_vm0, %v181_v8, -inf  ;;  %s2318_s19 = sld [smem:[#allocation6 + $0x4]]  ;;  %s2618_s24 = smov 125  }
  0x35   : > { %v193_v26 = vadd.f32 %v192_v13, %v191_v17  ;;  %v212_v28 = vsel %vm186_vm0, %v183_v10, -inf  ;;  %v214_v29 = vsel %vm186_vm0, %v185_v18, -inf  ;;  %v199_v30 = vsel %vm186_vm0, %v185_v18, 0.0  ;;  %s2784_s25 = sld [smem:[#allocation6 + $0x6]]  ;;  %s2619_s30 = smov 123  }
  0x36   : > { %v209_v31 = vmax.f32 %v206_v23, %v208_v24  ;;  %v213_v33 = vmax.f32 %v210_v25, %v212_v28  ;;  %v215_v34 = vmax.f32 %v211_v27, %v214_v29  ;;  %v200_v35 = vadd.f32 %v199_v30, %v198_v22  ;;  %s2323_s26 = sld [smem:[#allocation6 + $0x9]]  ;;  %s2620_s27 = smov 124  }
  0x37   : > { %v201_v32 = vmul.f32 0.25, %v193_v26  ;;  %vm225_vm1 = vcmask 23552   ;;  %vm228_vm2 = vcmask 154624   ;;  %vm233_vm3 = vcmask 1042432   ;;  %s2322_s29 = sld [smem:[#allocation6 + $0x8]]  ;;  %s2621_s6 = smov 122  }
  0x38   : > { %244 = vrot.lane.b32.xlu1 %v209_v31, %s2615_s20  ;;  %v216_v36 = vmax.f32 %v213_v33, %v215_v34  ;;  %v202_v37 = vmul.f32 0.25, %v200_v35  ;;  %v283_v42 = vstv %s2316_s23  ;;  %v269_v43 = vstv %s2315_s28  ;;  %s2324_s3 = sld [smem:[#allocation6 + $0xa]] }
  0x39   : > { %219 = vrot.lane.b32.xlu0 %v201_v32, %s2615_s20  ;;  %v297_v52 = vstv %s2317_s5  ;;  %v325_v56 = vstv %s2319_s17  ;;  %vm360_vm4 = vcmask 1046528   ;;  %s2326_s7 = sld [smem:[#allocation6 + $0xc]]  ;;  %vm504_vm5 = vcmask 1045504  }
  0x3a   : > { %v311_v57 = vstv %s2318_s19  ;;  %s2325_s8 = sld [smem:[#allocation6 + $0xb]]  ;;  %vm648_vm6 = vcmask 1044480   ;;  %vm792_vm7 = vcmask 1043456   ;;  %vm1079_vm8 = vcmask 1041408  }
  0x3b   : > { %v339_v61 = vstv %s2784_s25  ;;  %s2330_s23 = sld [smem:[#allocation6 + $0x10]] }
  0x3c   : > { %v392_v0 = vstv %s2323_s26  ;;  %s2329_s28 = sld [smem:[#allocation6 + $0xf]] }
  0x3d   : > { %v371_v1 = vstv %s2322_s29  ;;  %s2331_s5 = sld [smem:[#allocation6 + $0x11]] }
  0x3e   : > { %v413_v12 = vstv %s2324_s3  ;;  %s2333_s17 = sld [smem:[#allocation6 + $0x13]] }
  0x3f   : > { %v455_v24 = vstv %s2326_s7  ;;  %s2332_s19 = sld [smem:[#allocation6 + $0x12]] }
  0x40   : > { %246 = vrot.lane.b32.xlu1 %v216_v36, %s2615_s20  ;;  %v434_v26 = vstv %s2325_s8  ;;  %s2334_s25 = sld [smem:[#allocation6 + $0x14]] }
  0x41   : > { %221 = vrot.lane.b32.xlu0 %v202_v37, %s2615_s20  ;;  %s2327_s20 = sld [smem:[#allocation6 + $0xd]] }
  0x42   : > { %s2337_s26 = sld [smem:[#allocation6 + $0x17]] }
  0x43   : > { %s2336_s29 = sld [smem:[#allocation6 + $0x16]] }
  0x44   : > { %s2338_s3 = sld [smem:[#allocation6 + $0x18]] }
  0x45   : > { %s2340_s7 = sld [smem:[#allocation6 + $0x1a]] }
  0x46   : > { %s2339_s8 = sld [smem:[#allocation6 + $0x19]] }
  0xab   : > { %v220_v38 = vpop.permute.xlu0 %219 }
  0xac   : > { %v226_v39 = vsel %vm225_vm1, 0.0, %v220_v38 }
  0xad   : > { %v229_v40 = vsel %vm228_vm2, %v226_v39, 0.0 }
  0xae   : > { %v234_v41 = vrot.slane %v229_v40, 5  ;;  %v476_v40 = vstv %s2327_s20  ;;  %s2341_s20 = sld [smem:[#allocation6 + $0x1b]] }
  0xb0   : > { %v2767_v44 = vsel %vm233_vm3, 0.0, %v234_v41 }
  0xb1   : > { %v284_v45 = vmul.f32 %v283_v42, %v2767_v44  ;;  %v270_v46 = vmul.f32 %v269_v43, %v2767_v44  ;;  %v326_v58 = vmul.f32 %v325_v56, %v2767_v44  ;;  %v312_v59 = vmul.f32 %v311_v57, %v2767_v44 }
  0xb2   : > { %v298_v60 = vmul.f32 %v297_v52, %v2767_v44  ;;  %v393_v5 = vmul.f32 %v392_v0, %v2767_v44  ;;  %v372_v6 = vmul.f32 %v371_v1, %v2767_v44  ;;  %v340_v13 = vmul.f32 %v339_v61, %v2767_v44 }
  0xb3   : > { %288 = vrot.lane.b32.xlu0 %v284_v45, %s2616_s14  ;;  %274 = vrot.lane.b32.xlu2 %v270_v46, %s2617_s16  ;;  %v222_v47 = vpop.permute.xlu0 %221  ;;  %v456_v31 = vmul.f32 %v455_v24, %v2767_v44  ;;  %v435_v32 = vmul.f32 %v434_v26, %v2767_v44  ;;  %v414_v34 = vmul.f32 %v413_v12, %v2767_v44 }
  0xb4   : > { %v227_v48 = vsel %vm225_vm1, 0.0, %v222_v47  ;;  %v399_v10 = vrot.slane %v393_v5, 1  ;;  %v378_v11 = vrot.slane %v372_v6, 1 }
  0xb5   : > { %v230_v49 = vsel %vm228_vm2, %v227_v48, 0.0  ;;  %v462_v36 = vrot.slane %v456_v31, 1  ;;  %v441_v37 = vrot.slane %v435_v32, 1  ;;  %v420_v39 = vrot.slane %v414_v34, 1 }
  0xb6   : > { %v235_v50 = vrot.slane %v230_v49, 5  ;;  %v620_v31 = vstv %s2334_s25  ;;  %s2346_s25 = sld [smem:[#allocation6 + $0x20]] }
  0xb8   : > { %v2776_v51 = vsel %vm233_vm3, %v234_v41, %v235_v50  ;;  %v2804_v9 = vsel %vm233_vm3, %v235_v50, 0.0 }
  0xb9   : > { %v271_v53 = vmul.f32 %v269_v43, %v2776_v51  ;;  %v299_v54 = vmul.f32 %v297_v52, %v2776_v51  ;;  %v285_v55 = vmul.f32 %v283_v42, %v2776_v51  ;;  %v341_v62 = vmul.f32 %v339_v61, %v2776_v51 }
  0xba   : > { %v327_v63 = vmul.f32 %v325_v56, %v2776_v51  ;;  %v313_v2 = vmul.f32 %v311_v57, %v2776_v51  ;;  %v394_v3 = vmul.f32 %v392_v0, %v2776_v51  ;;  %v373_v4 = vmul.f32 %v371_v1, %v2776_v51 }
  0xbb   : > { %304 = vrot.lane.b32.xlu0 %v299_v54, %s2618_s24  ;;  %290 = vrot.lane.b32.xlu1 %v285_v55, %s2616_s14  ;;  %v415_v14 = vmul.f32 %v413_v12, %v2776_v51  ;;  %v416_v17 = vmul.f32 %v413_v12, %v2804_v9  ;;  %v395_v18 = vmul.f32 %v392_v0, %v2804_v9  ;;  %v515_v54 = vstv %s2329_s28  ;;  %s2343_s28 = sld [smem:[#allocation6 + $0x1d]] }
  0xbc   : > { %276 = vrot.lane.b32.xlu2 %v271_v53, %s2617_s16  ;;  %v400_v7 = vrot.slane %v394_v3, 1  ;;  %v379_v8 = vrot.slane %v373_v4, 1  ;;  %v374_v19 = vmul.f32 %v371_v1, %v2804_v9  ;;  %v457_v25 = vmul.f32 %v455_v24, %v2776_v51 }
  0xbd   : > { %v421_v20 = vrot.slane %v415_v14, 1  ;;  %v423_v21 = vrot.slane %v416_v17, 1  ;;  %v402_v22 = vrot.slane %v395_v18, 1  ;;  %v436_v29 = vmul.f32 %v434_v26, %v2776_v51 }
  0xbe   : > { %v401_v15 = vsel %vm360_vm4, %v399_v10, %v400_v7  ;;  %v380_v16 = vsel %vm360_vm4, %v378_v11, %v379_v8  ;;  %v381_v23 = vrot.slane %v374_v19, 1  ;;  %v463_v33 = vrot.slane %v457_v25, 1 }
  0xbf   : > { %v424_v27 = vsel %vm360_vm4, %v421_v20, %v423_v21  ;;  %v403_v28 = vsel %vm360_vm4, %v400_v7, %v402_v22  ;;  %v442_v35 = vrot.slane %v436_v29, 1  ;;  %v478_v42 = vmul.f32 %v476_v40, %v2776_v51 }
  0xc0   : > { %v382_v30 = vsel %vm360_vm4, %v379_v8, %v381_v23  ;;  %v464_v38 = vsel %vm360_vm4, %v462_v36, %v463_v33  ;;  %v479_v43 = vmul.f32 %v476_v40, %v2804_v9  ;;  %v458_v45 = vmul.f32 %v455_v24, %v2804_v9 }
  0xc1   : > { %v443_v41 = vsel %vm360_vm4, %v441_v37, %v442_v35  ;;  %v422_v46 = vsel %vm360_vm4, %v420_v39, %v421_v20  ;;  %v437_v47 = vmul.f32 %v434_v26, %v2804_v9  ;;  %v484_v48 = vrot.slane %v478_v42, 1 }
  0xc2   : > { %v486_v49 = vrot.slane %v479_v43, 1  ;;  %v465_v50 = vrot.slane %v458_v45, 1  ;;  %v536_v53 = vstv %s2330_s23  ;;  %v516_v61 = vmul.f32 %v515_v54, %v2767_v44  ;;  %s2344_s23 = sld [smem:[#allocation6 + $0x1e]] }
  0xc3   : > { %330 = vrot.lane.b32.xlu0 %v326_v58, %s2619_s30  ;;  %316 = vrot.lane.b32.xlu1 %v312_v59, %s2620_s27  ;;  %v444_v52 = vrot.slane %v437_v47, 1  ;;  %v538_v57 = vmul.f32 %v536_v53, %v2776_v51  ;;  %v517_v58 = vmul.f32 %v515_v54, %v2776_v51  ;;  %v557_v3 = vstv %s2331_s5  ;;  %s2345_s5 = sld [smem:[#allocation6 + $0x1f]] }
  0xc4   : > { %302 = vrot.lane.b32.xlu2 %v298_v60, %s2618_s24  ;;  %v487_v55 = vsel %vm360_vm4, %v484_v48, %v486_v49  ;;  %v466_v56 = vsel %vm360_vm4, %v463_v33, %v465_v50  ;;  %v537_v60 = vmul.f32 %v536_v53, %v2767_v44  ;;  %v559_v5 = vmul.f32 %v557_v3, %v2776_v51 }
  0xc5   : > { %v445_v59 = vsel %vm360_vm4, %v442_v35, %v444_v52  ;;  %v523_v0 = vrot.slane %v517_v58, 2  ;;  %v560_v8 = vmul.f32 %v557_v3, %v2804_v9  ;;  %v539_v10 = vmul.f32 %v536_v53, %v2804_v9 }
  0xc6   : > { %v543_v1 = vrot.slane %v537_v60, 2  ;;  %v518_v12 = vmul.f32 %v515_v54, %v2804_v9  ;;  %v599_v17 = vstv %s2333_s17  ;;  %v578_v18 = vstv %s2332_s19  ;;  %s2937_s17 = sld [smem:[#allocation6]] }
  0xc7   : > { %v567_v14 = vrot.slane %v560_v8, 2  ;;  %v601_v21 = vmul.f32 %v599_v17, %v2776_v51  ;;  %v580_v22 = vmul.f32 %v578_v18, %v2776_v51  ;;  %v600_v24 = vmul.f32 %v599_v17, %v2767_v44  ;;  %s2347_s19 = sld [smem:[#allocation6 + $0x21]] }
  0xc8   : > { %v579_v25 = vmul.f32 %v578_v18, %v2767_v44  ;;  %v558_v26 = vmul.f32 %v557_v3, %v2767_v44  ;;  %v622_v33 = vmul.f32 %v620_v31, %v2776_v51  ;;  %v623_v36 = vmul.f32 %v620_v31, %v2804_v9 }
  0xc9   : > { %v606_v29 = vrot.slane %v600_v24, 2  ;;  %v602_v37 = vmul.f32 %v599_v17, %v2804_v9  ;;  %v581_v39 = vmul.f32 %v578_v18, %v2804_v9  ;;  %v680_v45 = vstv %s2337_s26  ;;  %v2908_v18 = vpop.permute.xlu1 %244  ;;  %s2348_s26 = sld [smem:[#allocation6 + $0x22]] }
  0xca   : > { %v564_v32 = vrot.slane %v558_v26, 2  ;;  %v682_v49 = vmul.f32 %v680_v45, %v2776_v51  ;;  %v681_v53 = vmul.f32 %v680_v45, %v2767_v44  ;;  %v683_v3 = vmul.f32 %v680_v45, %v2804_v9 }
  0xcb   : > { %346 = vrot.lane.b32.xlu0 %v341_v62, %s2621_s6  ;;  %332 = vrot.lane.b32.xlu1 %v327_v63, %s2619_s30  ;;  %v477_v62 = vmul.f32 %v476_v40, %v2767_v44  ;;  %v544_v63 = vrot.slane %v538_v57, 2  ;;  %v628_v40 = vrot.slane %v622_v33, 2  ;;  %v609_v42 = vrot.slane %v602_v37, 2 }
  0xcc   : > { %318 = vrot.lane.b32.xlu2 %v313_v2, %s2620_s27  ;;  %v522_v2 = vrot.slane %v516_v61, 2  ;;  %v588_v43 = vrot.slane %v581_v39, 2  ;;  %v688_v57 = vrot.slane %v682_v49, 3  ;;  %v701_v61 = vstv %s2338_s3  ;;  %s2351_s3 = sld [smem:[#allocation6 + $0x25]] }
  0xcd   : > { %v483_v4 = vrot.slane %v477_v62, 1  ;;  %v545_v6 = vsel %vm504_vm5, %v543_v1, %v544_v63  ;;  %v824_v45 = vstv %s2344_s23  ;;  %s2354_s23 = sld [smem:[#allocation6 + $0x28]] }
  0xce   : > { %v524_v7 = vsel %vm504_vm5, %v522_v2, %v523_v0  ;;  %v704_v2 = vmul.f32 %v701_v61, %v2804_v9  ;;  %v826_v49 = vmul.f32 %v824_v45, %v2776_v51 }
  0xcf   : > { %v485_v11 = vsel %vm360_vm4, %v483_v4, %v484_v48 }
  0xd0   : > { %v711_v8 = vrot.slane %v704_v2, 3 }
  0xd1   : > { %v2929_v37 = vpop.permute.xlu1 %246 }
  0xd3   : > { %404 = vrot.lane.b32.xlu0 %v401_v15, %s2616_s14  ;;  %383 = vrot.lane.b32.xlu1 %v380_v16, %s2617_s16  ;;  %v546_v15 = vrot.slane %v539_v10, 2  ;;  %v525_v16 = vrot.slane %v518_v12, 2  ;;  %v690_v10 = vrot.slane %v683_v3, 3  ;;  %v743_v12 = vstv %s2340_s7  ;;  %s2350_s7 = sld [smem:[#allocation6 + $0x24]] }
  0xd4   : > { %344 = vrot.lane.b32.xlu2 %v340_v13, %s2621_s6  ;;  %v565_v13 = vrot.slane %v559_v5, 2 }
  0xd5   : > { %v547_v20 = vsel %vm504_vm5, %v544_v63, %v546_v15  ;;  %v526_v23 = vsel %vm504_vm5, %v523_v0, %v525_v16  ;;  %v703_v63 = vmul.f32 %v701_v61, %v2776_v51  ;;  %v691_v15 = vsel %vm648_vm6, %v688_v57, %v690_v10 }
  0xd6   : > { %v568_v19 = vsel %vm504_vm5, %v565_v13, %v567_v14  ;;  %v745_v16 = vmul.f32 %v743_v12, %v2776_v51 }
  0xd8   : > { %v751_v24 = vrot.slane %v745_v16, 3 }
  0xdb   : > { %427 = vrot.lane.b32.xlu0 %v424_v27, %s2618_s24  ;;  %406 = vrot.lane.b32.xlu1 %v403_v28, %s2616_s14  ;;  %v607_v27 = vrot.slane %v601_v21, 2  ;;  %v586_v28 = vrot.slane %v580_v22, 2  ;;  %v702_v22 = vmul.f32 %v701_v61, %v2767_v44 }
  0xdc   : > { %385 = vrot.lane.b32.xlu2 %v382_v30, %s2617_s16  ;;  %v585_v30 = vrot.slane %v579_v25, 2 }
  0xdd   : > { %v608_v34 = vsel %vm504_vm5, %v606_v29, %v607_v27  ;;  %v610_v48 = vsel %vm504_vm5, %v607_v27, %v609_v42  ;;  %v589_v52 = vsel %vm504_vm5, %v586_v28, %v588_v43  ;;  %v708_v29 = vrot.slane %v702_v22, 3 }
  0xde   : > { %v587_v35 = vsel %vm504_vm5, %v585_v30, %v586_v28  ;;  %v764_v28 = vstv %s2341_s20  ;;  %s2328_s20 = sld [smem:[#allocation6 + $0xe]] }
  0xdf   : > { %v766_v30 = vmul.f32 %v764_v28, %v2776_v51  ;;  %v767_v33 = vmul.f32 %v764_v28, %v2804_v9 }
  0xe3   : > { %467 = vrot.lane.b32.xlu0 %v464_v38, %s2619_s30  ;;  %446 = vrot.lane.b32.xlu1 %v443_v41, %s2620_s27  ;;  %v566_v38 = vsel %vm504_vm5, %v564_v32, %v565_v13  ;;  %v630_v41 = vrot.slane %v623_v36, 2  ;;  %v722_v13 = vstv %s2339_s8  ;;  %s2352_s8 = sld [smem:[#allocation6 + $0x26]] }
  0xe4   : > { %425 = vrot.lane.b32.xlu2 %v422_v46, %s2618_s24  ;;  %v659_v46 = vstv %s2336_s29  ;;  %v724_v17 = vmul.f32 %v722_v13, %v2776_v51  ;;  %v723_v21 = vmul.f32 %v722_v13, %v2767_v44  ;;  %v725_v36 = vmul.f32 %v722_v13, %v2804_v9  ;;  %s2321_s29 = sld [smem:[#allocation6 + $0x7]] }
  0xe5   : > { %v631_v47 = vsel %vm504_vm5, %v628_v40, %v630_v41  ;;  %v661_v50 = vmul.f32 %v659_v46, %v2776_v51  ;;  %v660_v54 = vmul.f32 %v659_v46, %v2767_v44  ;;  %v662_v5 = vmul.f32 %v659_v46, %v2804_v9 }
  0xe6   : > { %v730_v25 = vrot.slane %v724_v17, 3  ;;  %v729_v27 = vrot.slane %v723_v21, 3  ;;  %v774_v41 = vrot.slane %v767_v33, 3  ;;  %v732_v43 = vrot.slane %v725_v36, 3 }
  0xe7   : > { %v667_v58 = vrot.slane %v661_v50, 3  ;;  %v666_v60 = vrot.slane %v660_v54, 3  ;;  %v803_v46 = vstv %s2343_s28  ;;  %s2353_s28 = sld [smem:[#allocation6 + $0x27]] }
  0xe8   : > { %v731_v32 = vsel %vm648_vm6, %v729_v27, %v730_v25  ;;  %v805_v50 = vmul.f32 %v803_v46, %v2776_v51  ;;  %v804_v54 = vmul.f32 %v803_v46, %v2767_v44  ;;  %v866_v27 = vstv %s2346_s25  ;;  %s2359_s25 = sld [smem:[#allocation6 + $0x2d]] }
  0xe9   : > { %v668_v1 = vsel %vm648_vm6, %v666_v60, %v667_v58  ;;  %v832_v60 = vrot.slane %v826_v49, 4 }
  0xea   : > { %v811_v61 = vrot.slane %v805_v50, 4  ;;  %v353_v49 = vstv %s2321_s29  ;;  %s2361_s29 = sld [smem:[#allocation6 + $0x2f]] }
  0xeb   : > { %490 = vrot.lane.b32.xlu0 %v487_v55, %s2621_s6  ;;  %469 = vrot.lane.b32.xlu1 %v466_v56, %s2619_s30  ;;  %v621_v56 = vmul.f32 %v620_v31, %v2767_v44 }
  0xec   : > { %448 = vrot.lane.b32.xlu2 %v445_v59, %s2620_s27  ;;  %v687_v59 = vrot.slane %v681_v53, 3  ;;  %v825_v53 = vmul.f32 %v824_v45, %v2767_v44 }
  0xed   : > { %v627_v62 = vrot.slane %v621_v56, 2 }
  0xee   : > { %v689_v0 = vsel %vm648_vm6, %v687_v59, %v688_v57 }
  0xef   : > { %v629_v4 = vsel %vm504_vm5, %v627_v62, %v628_v40  ;;  %v772_v40 = vrot.slane %v766_v30, 3  ;;  %v831_v62 = vrot.slane %v825_v53, 4 }
  0xf3   : > { %548 = vrot.lane.b32.xlu0 %v545_v6, %s2616_s14  ;;  %527 = vrot.lane.b32.xlu1 %v524_v7, %s2617_s16  ;;  %v709_v7 = vrot.slane %v703_v63, 3  ;;  %v810_v63 = vrot.slane %v804_v54, 4 }
  0xf4   : > { %488 = vrot.lane.b32.xlu2 %v485_v11, %s2621_s6  ;;  %v669_v11 = vrot.slane %v662_v5, 3  ;;  %v833_v5 = vsel %vm792_vm7, %v831_v62, %v832_v60 }
  0xf5   : > { %v712_v14 = vsel %vm648_vm6, %v709_v7, %v711_v8  ;;  %v265_v8 = vstv %s2937_s17  ;;  %s2358_s17 = sld [smem:[#allocation6 + $0x2c]] }
  0xf6   : > { %v266_v17 = vmul.f32 %v265_v8, %v2767_v44  ;;  %v267_v22 = vmul.f32 %v265_v8, %v2776_v51 }
  0xfb   : > { %571 = vrot.lane.b32.xlu0 %v568_v19, %s2618_s24  ;;  %550 = vrot.lane.b32.xlu1 %v547_v20, %s2616_s14  ;;  %v670_v19 = vsel %vm648_vm6, %v667_v58, %v669_v11  ;;  %v744_v20 = vmul.f32 %v743_v12, %v2767_v44  ;;  %v765_v58 = vmul.f32 %v764_v28, %v2767_v44 }
  0xfc   : > { %529 = vrot.lane.b32.xlu2 %v526_v23, %s2617_s16  ;;  %v806_v11 = vmul.f32 %v803_v46, %v2804_v9 }
  0xfd   : > { %v750_v26 = vrot.slane %v744_v20, 3 }
  0xfe   : > { %v813_v20 = vrot.slane %v806_v11, 4 }
  0xff   : > { %v752_v31 = vsel %vm648_vm6, %v750_v26, %v751_v24  ;;  %v887_v26 = vstv %s2347_s19  ;;  %s2357_s19 = sld [smem:[#allocation6 + $0x2b]] }
 0x100   : > { %v889_v30 = vmul.f32 %v887_v26, %v2776_v51  ;;  %v888_v33 = vmul.f32 %v887_v26, %v2767_v44 }
 0x103   : > { %611 = vrot.lane.b32.xlu0 %v608_v34, %s2619_s30  ;;  %590 = vrot.lane.b32.xlu1 %v587_v35, %s2620_s27  ;;  %v746_v34 = vmul.f32 %v743_v12, %v2804_v9  ;;  %v710_v35 = vsel %vm648_vm6, %v708_v29, %v709_v7  ;;  %v812_v7 = vsel %vm792_vm7, %v810_v63, %v811_v61 }
 0x104   : > { %569 = vrot.lane.b32.xlu2 %v566_v38, %s2618_s24  ;;  %v354_v63 = vmul.f32 %v353_v49, %v2767_v44 }
 0x105   : > { %v753_v42 = vrot.slane %v746_v34, 3  ;;  %v867_v34 = vmul.f32 %v866_v27, %v2767_v44 }
 0x10b   : > { %634 = vrot.lane.b32.xlu0 %v631_v47, %s2621_s6  ;;  %613 = vrot.lane.b32.xlu1 %v610_v48, %s2619_s30  ;;  %v775_v47 = vsel %vm648_vm6, %v772_v40, %v774_v41  ;;  %v754_v48 = vsel %vm648_vm6, %v751_v24, %v753_v42  ;;  %v895_v41 = vrot.slane %v889_v30, 4 }
 0x10c   : > { %592 = vrot.lane.b32.xlu2 %v589_v52, %s2620_s27  ;;  %v733_v52 = vsel %vm648_vm6, %v730_v25, %v732_v43  ;;  %v908_v43 = vstv %s2348_s26  ;;  %s2335_s26 = sld [smem:[#allocation6 + $0x15]] }
 0x10d   : > { %v2889_v55 = vpop.permute.xlu2 %274  ;;  %v911_v54 = vmul.f32 %v908_v43, %v2804_v9 }
 0x10e   : > { %v280_v21 = vadd.f32 %v2889_v55, %v266_v17  ;;  %v814_v55 = vsel %vm792_vm7, %v811_v61, %v813_v20 }
 0x113   : > { %692 = vrot.lane.b32.xlu0 %v689_v0, %s2616_s14  ;;  %671 = vrot.lane.b32.xlu1 %v668_v1, %s2617_s16  ;;  %v845_v0 = vstv %s2345_s5  ;;  %v771_v1 = vrot.slane %v765_v58, 3  ;;  %s3036_s5 = sld [smem:[#allocation6 + $0x29]] }
 0x114   : > { %632 = vrot.lane.b32.xlu2 %v629_v4, %s2621_s6  ;;  %v2949_v2 = vmul.f32 %v845_v0, %v2776_v51  ;;  %v848_v3 = vmul.f32 %v845_v0, %v2804_v9  ;;  %v827_v4 = vmul.f32 %v824_v45, %v2804_v9  ;;  %v846_v36 = vmul.f32 %v845_v0, %v2767_v44 }
 0x115   : > { %v773_v10 = vsel %vm648_vm6, %v771_v1, %v772_v40  ;;  %v356_v0 = vmul.f32 %v353_v49, %v2804_v9 }
 0x116   : > { %v2902_v6 = vpop.permute.xlu2 %276  ;;  %v834_v16 = vrot.slane %v827_v4, 4  ;;  %v852_v50 = vrot.slane %v846_v36, 4 }
 0x117   : > { %v281_v28 = vadd.f32 %v2902_v6, %v267_v22 }
 0x118   : > { %v835_v25 = vsel %vm792_vm7, %v832_v60, %v834_v16  ;;  %v869_v60 = vmul.f32 %v866_v27, %v2804_v9  ;;  %v946_v16 = vstv %s2350_s7  ;;  %s2362_s7 = sld [smem:[#allocation6 + $0x30]] }
 0x119   : > { %v3009_v22 = vmul.f32 %v946_v16, %v2776_v51 }
 0x11a   : > { %v876_v11 = vrot.slane %v869_v60, 4 }
 0x11b   : > { %715 = vrot.lane.b32.xlu0 %v712_v14, %s2618_s24  ;;  %694 = vrot.lane.b32.xlu1 %v691_v15, %s2616_s14  ;;  %v853_v14 = vrot.slane %v2949_v2, 4  ;;  %v855_v15 = vrot.slane %v848_v3, 4 }
 0x11c   : > { %673 = vrot.lane.b32.xlu2 %v670_v19, %s2617_s16 }
 0x11d   : > { %v856_v24 = vsel %vm792_vm7, %v853_v14, %v855_v15  ;;  %v854_v58 = vsel %vm792_vm7, %v852_v50, %v853_v14  ;;  %v364_v14 = vrot.slane %v356_v0, 1  ;;  %v497_v0 = vstv %s2328_s20  ;;  %s3126_s20 = sld [smem:[#allocation6 + $0x81]] }
 0x11e   : > { %v2917_v23 = vpop.permute.xlu2 %302 }
 0x123   : > { %755 = vrot.lane.b32.xlu0 %v752_v31, %s2619_s30  ;;  %734 = vrot.lane.b32.xlu1 %v731_v32, %s2620_s27  ;;  %v2972_v31 = vmul.f32 %v866_v27, %v2776_v51  ;;  %v947_v27 = vmul.f32 %v946_v16, %v2767_v44 }
 0x124   : > { %713 = vrot.lane.b32.xlu2 %v710_v35, %s2618_s24 }
 0x125   : > { %v289_v38 = vpop.permute.xlu0 %288  ;;  %v874_v42 = vrot.slane %v2972_v31, 4  ;;  %v953_v36 = vrot.slane %v947_v27, 5 }
 0x126   : > { %v2931_v39 = vpop.permute.xlu2 %318  ;;  %v294_v29 = vadd.f32 %v289_v38, %v280_v21 }
 0x128   : > { %v308_v38 = vadd.f32 %v2917_v23, %v294_v29 }
 0x12b   : > { %778 = vrot.lane.b32.xlu0 %v775_v47, %s2621_s6  ;;  %757 = vrot.lane.b32.xlu1 %v754_v48, %s2619_s30  ;;  %v894_v47 = vrot.slane %v888_v33, 4  ;;  %v873_v48 = vrot.slane %v867_v34, 4 }
 0x12c   : > { %736 = vrot.lane.b32.xlu2 %v733_v52, %s2620_s27  ;;  %v2986_v52 = vmul.f32 %v908_v43, %v2776_v51 }
 0x12d   : > { %v291_v56 = vpop.permute.xlu1 %290  ;;  %v305_v57 = vpop.permute.xlu0 %304  ;;  %v896_v53 = vsel %vm792_vm7, %v894_v47, %v895_v41  ;;  %v875_v23 = vsel %vm792_vm7, %v873_v48, %v874_v42 }
 0x12e   : > { %v2946_v59 = vpop.permute.xlu2 %344  ;;  %v295_v32 = vadd.f32 %v291_v56, %v281_v28  ;;  %v890_v56 = vmul.f32 %v887_v26, %v2804_v9 }
 0x130   : > { %v309_v45 = vadd.f32 %v305_v57, %v295_v32  ;;  %v355_v57 = vmul.f32 %v353_v49, %v2776_v51  ;;  %v897_v8 = vrot.slane %v890_v56, 4 }
 0x132   : > { %v323_v61 = vadd.f32 %v2931_v39, %v309_v45  ;;  %v898_v21 = vsel %vm792_vm7, %v895_v41, %v897_v8 }
 0x133   : > { %836 = vrot.lane.b32.xlu0 %v833_v5, %s2616_s14  ;;  %815 = vrot.lane.b32.xlu1 %v812_v7, %s2617_s16  ;;  %v916_v5 = vrot.slane %v2986_v52, 4  ;;  %v918_v7 = vrot.slane %v911_v54, 4  ;;  %v949_v52 = vmul.f32 %v946_v16, %v2804_v9 }
 0x134   : > { %776 = vrot.lane.b32.xlu2 %v773_v10, %s2621_s6  ;;  %v362_v10 = vrot.slane %v355_v57, 1 }
 0x135   : > { %v317_v12 = vpop.permute.xlu1 %316  ;;  %v331_v13 = vpop.permute.xlu0 %330  ;;  %v919_v20 = vsel %vm792_vm7, %v916_v5, %v918_v7 }
 0x136   : > { %v2963_v19 = vpop.permute.xlu2 %385  ;;  %v322_v46 = vadd.f32 %v317_v12, %v308_v38  ;;  %v967_v12 = vstv %s2351_s3  ;;  %v365_v28 = vsel %vm360_vm4, %v362_v10, %v364_v14  ;;  %v988_v38 = vstv %s2352_s8  ;;  %s2360_s3 = sld [smem:[#allocation6 + $0x2e]] }
 0x137   : > { %v969_v15 = vmul.f32 %v967_v12, %v2776_v51  ;;  %v3023_v45 = vmul.f32 %v988_v38, %v2776_v51  ;;  %v970_v49 = vmul.f32 %v967_v12, %v2804_v9  ;;  %s3124_s8 = sld [smem:[#allocation6 + $0x82]] }
 0x138   : > { %v336_v62 = vadd.f32 %v331_v13, %v322_v46  ;;  %v361_v13 = vrot.slane %v354_v63, 1  ;;  %v991_v46 = vmul.f32 %v988_v38, %v2804_v9 }
 0x139   : > { %v975_v31 = vrot.slane %v969_v15, 5  ;;  %v996_v57 = vrot.slane %v3023_v45, 5  ;;  %v977_v60 = vrot.slane %v970_v49, 5 }
 0x13a   : > { %v350_v39 = vadd.f32 %v2946_v59, %v336_v62  ;;  %v877_v59 = vsel %vm792_vm7, %v874_v42, %v876_v11  ;;  %v498_v11 = vmul.f32 %v497_v0, %v2767_v44 }
 0x13b   : > { %859 = vrot.lane.b32.xlu0 %v856_v24, %s2618_s24  ;;  %838 = vrot.lane.b32.xlu1 %v835_v25, %s2616_s14  ;;  %v363_v24 = vsel %vm360_vm4, %v361_v13, %v362_v10  ;;  %v968_v25 = vmul.f32 %v967_v12, %v2767_v44 }
 0x13c   : > { %817 = vrot.lane.b32.xlu2 %v814_v55, %s2617_s16  ;;  %v368_v26 = vadd.f32 %v363_v24, %v350_v39  ;;  %v909_v55 = vmul.f32 %v908_v43, %v2767_v44  ;;  %v505_v27 = vrot.slane %v498_v11, 2 }
 0x13d   : > { %v333_v6 = vpop.permute.xlu1 %332  ;;  %v347_v35 = vpop.permute.xlu0 %346 }
 0x13e   : > { %v2982_v40 = vpop.permute.xlu2 %425  ;;  %v337_v3 = vadd.f32 %v333_v6, %v323_v61  ;;  %v954_v6 = vrot.slane %v3009_v22, 5  ;;  %v915_v42 = vrot.slane %v909_v55, 4  ;;  %v956_v61 = vrot.slane %v949_v52, 5 }
 0x13f   : > { %v989_v22 = vmul.f32 %v988_v38, %v2767_v44 }
 0x140   : > { %v351_v17 = vadd.f32 %v347_v35, %v337_v3  ;;  %v974_v35 = vrot.slane %v968_v25, 5  ;;  %v955_v48 = vsel %vm233_vm3, %v953_v36, %v954_v6  ;;  %v917_v50 = vsel %vm792_vm7, %v915_v42, %v916_v5 }
 0x141   : > { %v500_v3 = vmul.f32 %v497_v0, %v2804_v9  ;;  %v1009_v5 = vstv %s2353_s28  ;;  %v957_v39 = vsel %vm233_vm3, %v954_v6, %v956_v61  ;;  %s2342_s28 = sld [smem:[#allocation6 + $0x1c]] }
 0x142   : > { %v369_v32 = vadd.f32 %v365_v28, %v351_v17  ;;  %v976_v41 = vsel %vm233_vm3, %v974_v35, %v975_v31  ;;  %v3044_v10 = vmul.f32 %v1009_v5, %v2776_v51  ;;  %v1010_v15 = vmul.f32 %v1009_v5, %v2767_v44 }
 0x143   : > { %899 = vrot.lane.b32.xlu0 %v896_v53, %s2619_s30  ;;  %878 = vrot.lane.b32.xlu1 %v875_v23, %s2620_s27  ;;  %v1012_v45 = vmul.f32 %v1009_v5, %v2804_v9 }
 0x144   : > { %857 = vrot.lane.b32.xlu2 %v854_v58, %s2618_s24  ;;  %v390_v43 = vadd.f32 %v2963_v19, %v369_v32  ;;  %v998_v58 = vrot.slane %v991_v46, 5  ;;  %v995_v32 = vrot.slane %v989_v22, 5 }
 0x145   : > { %v384_v1 = vpop.permute.xlu1 %383  ;;  %v405_v2 = vpop.permute.xlu0 %404 }
 0x146   : > { %v3001_v4 = vpop.permute.xlu2 %448  ;;  %v389_v33 = vadd.f32 %v384_v1, %v368_v26  ;;  %v1030_v1 = vstv %s2354_s23  ;;  %v999_v7 = vsel %vm233_vm3, %v996_v57, %v998_v58  ;;  %v1017_v26 = vrot.slane %v3044_v10, 5  ;;  %s3143_s23 = sld [smem:[#allocation6 + $0x83]] }
 0x147   : > { %v1032_v8 = vmul.f32 %v1030_v1, %v2776_v51  ;;  %v1031_v12 = vmul.f32 %v1030_v1, %v2767_v44  ;;  %v997_v42 = vsel %vm233_vm3, %v995_v32, %v996_v57  ;;  %v1111_v57 = vstv %s2358_s17  ;;  %s3163_s17 = sld [smem:[#allocation6 + $0x84]] }
 0x148   : > { %v410_v47 = vadd.f32 %v405_v2, %v389_v33  ;;  %v499_v2 = vmul.f32 %v497_v0, %v2776_v51 }
 0x149   : > { %v1038_v25 = vrot.slane %v1032_v8, 5  ;;  %v1037_v28 = vrot.slane %v1031_v12, 5 }
 0x14a   : > { %v431_v19 = vadd.f32 %v2982_v40, %v410_v47  ;;  %v978_v40 = vsel %vm233_vm3, %v975_v31, %v977_v60  ;;  %v506_v16 = vrot.slane %v499_v2, 2  ;;  %v1051_v31 = vstv %s3036_s5  ;;  %s3155_s5 = sld [smem:[#allocation6 + $0x85]] }
 0x14b   : > { %922 = vrot.lane.b32.xlu0 %v919_v20, %s2621_s6  ;;  %901 = vrot.lane.b32.xlu1 %v898_v21, %s2619_s30  ;;  %v508_v20 = vrot.slane %v500_v3, 2  ;;  %v3059_v33 = vmul.f32 %v1051_v31, %v2776_v51  ;;  %v1054_v6 = vmul.f32 %v1051_v31, %v2804_v9  ;;  %v1039_v36 = vsel %vm233_vm3, %v1037_v28, %v1038_v25 }
 0x14c   : > { %880 = vrot.lane.b32.xlu2 %v877_v59, %s2620_s27  ;;  %v1090_v60 = vstv %s2357_s19  ;;  %s3174_s19 = sld [smem:[#allocation6 + $0x86]] }
 0x14d   : > { %v407_v29 = vpop.permute.xlu1 %406  ;;  %v428_v30 = vpop.permute.xlu0 %427  ;;  %v509_v55 = vsel %vm504_vm5, %v506_v16, %v508_v20  ;;  %v1059_v49 = vrot.slane %v3059_v33, 5  ;;  %v1091_v2 = vmul.f32 %v1090_v60, %v2767_v44 }
 0x14e   : > { %v489_v34 = vpop.permute.xlu2 %488  ;;  %v411_v53 = vadd.f32 %v407_v29, %v390_v43 }
 0x150   : > { %v432_v62 = vadd.f32 %v428_v30, %v411_v53  ;;  %v1016_v30 = vrot.slane %v1010_v15, 5 }
 0x152   : > { %v453_v13 = vadd.f32 %v3001_v4, %v432_v62  ;;  %v1018_v38 = vsel %vm233_vm3, %v1016_v30, %v1017_v26  ;;  %v1113_v62 = vmul.f32 %v1111_v57, %v2776_v51 }
 0x153   : > { %979 = vrot.lane.b32.xlu0 %v976_v41, %s2616_s14  ;;  %958 = vrot.lane.b32.xlu1 %v955_v48, %s2617_s16  ;;  %v507_v41 = vsel %vm504_vm5, %v505_v27, %v506_v16 }
 0x154   : > { %920 = vrot.lane.b32.xlu2 %v917_v50, %s2621_s6  ;;  %v1061_v50 = vrot.slane %v1054_v6, 5  ;;  %v1119_v10 = vrot.slane %v1113_v62, 6 }
 0x155   : > { %v447_v23 = vpop.permute.xlu1 %446  ;;  %v468_v54 = vpop.permute.xlu0 %467 }
 0x156   : > { %v530_v56 = vpop.permute.xlu2 %529  ;;  %v452_v63 = vadd.f32 %v447_v23, %v431_v19  ;;  %v1062_v58 = vsel %vm233_vm3, %v1059_v49, %v1061_v50 }
 0x158   : > { %v473_v14 = vadd.f32 %v468_v54, %v452_v63  ;;  %v1019_v54 = vrot.slane %v1012_v45, 5  ;;  %v1092_v63 = vmul.f32 %v1090_v60, %v2776_v51 }
 0x15a   : > { %v494_v4 = vadd.f32 %v489_v34, %v473_v14  ;;  %v1033_v34 = vmul.f32 %v1030_v1, %v2804_v9  ;;  %v1020_v0 = vsel %vm233_vm3, %v1017_v26, %v1019_v54  ;;  %v1112_v1 = vmul.f32 %v1111_v57, %v2767_v44 }
 0x15b   : > { %1002 = vrot.lane.b32.xlu0 %v999_v7, %s2618_s24  ;;  %981 = vrot.lane.b32.xlu1 %v978_v40, %s2616_s14  ;;  %v1052_v7 = vmul.f32 %v1051_v31, %v2767_v44  ;;  %v1098_v11 = vrot.slane %v1092_v63, 6  ;;  %v1132_v14 = vstv %s2359_s25  ;;  %s2372_s25 = sld [smem:[#allocation6 + $0x89]] }
 0x15c   : > { %960 = vrot.lane.b32.xlu2 %v957_v39, %s2617_s16  ;;  %v512_v46 = vadd.f32 %v507_v41, %v494_v4  ;;  %v1040_v23 = vrot.slane %v1033_v34, 5  ;;  %v1118_v12 = vrot.slane %v1112_v1, 6  ;;  %v3084_v16 = vmul.f32 %v1132_v14, %v2776_v51 }
 0x15d   : > { %v470_v17 = vpop.permute.xlu1 %469  ;;  %v491_v21 = vpop.permute.xlu0 %490  ;;  %v1058_v15 = vrot.slane %v1052_v7, 5  ;;  %v1153_v34 = vstv %s2360_s3  ;;  %v1133_v54 = vmul.f32 %v1132_v14, %v2767_v44  ;;  %s2349_s3 = sld [smem:[#allocation6 + $0x23]] }
 0x15e   : > { %v474_v24 = vadd.f32 %v470_v17, %v453_v13  ;;  %v570_v59 = vpop.permute.xlu2 %569  ;;  %v1097_v13 = vrot.slane %v1091_v2, 6  ;;  %v1135_v17 = vmul.f32 %v1132_v14, %v2804_v9  ;;  %v1140_v28 = vrot.slane %v3084_v16, 6 }
 0x15f   : > { %v1139_v2 = vrot.slane %v1133_v54, 6  ;;  %v1250_v54 = vstv %s3143_s23  ;;  %s2379_s23 = sld [smem:[#allocation6 + $0x90]] }
 0x160   : > { %v495_v29 = vadd.f32 %v491_v21, %v474_v24  ;;  %v1120_v21 = vsel %vm1079_vm8, %v1118_v12, %v1119_v10  ;;  %v1099_v22 = vsel %vm1079_vm8, %v1097_v13, %v1098_v11  ;;  %v1114_v24 = vmul.f32 %v1111_v57, %v2804_v9 }
 0x161   : > { %v1142_v4 = vrot.slane %v1135_v17, 6  ;;  %v1156_v12 = vmul.f32 %v1153_v34, %v2804_v9  ;;  %v250_v13 = vsel %vm225_vm1, 0.0, %v2908_v18 }
 0x162   : > { %v513_v35 = vadd.f32 %v509_v55, %v495_v29  ;;  %v1121_v31 = vrot.slane %v1114_v24, 6  ;;  %v641_v55 = vstv %s2335_s26  ;;  %s2371_s26 = sld [smem:[#allocation6 + $0x88]] }
 0x163   : > { %1042 = vrot.lane.b32.xlu0 %v1039_v36, %s2619_s30  ;;  %1021 = vrot.lane.b32.xlu1 %v1018_v38, %s2620_s27  ;;  %v643_v33 = vmul.f32 %v641_v55, %v2776_v51  ;;  %v644_v36 = vmul.f32 %v641_v55, %v2804_v9  ;;  %v1174_v38 = vstv %s2361_s29  ;;  %s2373_s29 = sld [smem:[#allocation6 + $0x8a]] }
 0x164   : > { %v534_v43 = vadd.f32 %v530_v56, %v513_v35  ;;  %1000 = vrot.lane.b32.xlu2 %v997_v42, %s2618_s24  ;;  %v1041_v56 = vsel %vm233_vm3, %v1038_v25, %v1040_v23  ;;  %v1093_v25 = vmul.f32 %v1090_v60, %v2804_v9  ;;  %v1143_v35 = vsel %vm1079_vm8, %v1140_v28, %v1142_v4 }
 0x165   : > { %v528_v47 = vpop.permute.xlu1 %527  ;;  %v549_v48 = vpop.permute.xlu0 %548  ;;  %v1122_v42 = vsel %vm1079_vm8, %v1119_v10, %v1121_v31  ;;  %v1176_v45 = vmul.f32 %v1174_v38, %v2776_v51  ;;  %v650_v50 = vrot.slane %v643_v33, 3  ;;  %v1177_v10 = vmul.f32 %v1174_v38, %v2804_v9 }
 0x166   : > { %v533_v52 = vadd.f32 %v528_v47, %v512_v46  ;;  %v593_v53 = vpop.permute.xlu2 %592  ;;  %v1100_v32 = vrot.slane %v1093_v25, 6  ;;  %v1155_v46 = vmul.f32 %v1153_v34, %v2776_v51  ;;  %v252_v25 = vsel %vm228_vm2, %v250_v13, 0.0 }
 0x167   : > { %v1182_v57 = vrot.slane %v1176_v45, 6  ;;  %v256_v18 = vrot.slane %v252_v25, 5  ;;  %v251_v31 = vsel %vm225_vm1, 0.0, %v2929_v37 }
 0x168   : > { %v554_v19 = vadd.f32 %v549_v48, %v533_v52  ;;  %v1101_v47 = vsel %vm1079_vm8, %v1098_v11, %v1100_v32  ;;  %v1175_v48 = vmul.f32 %v1174_v38, %v2767_v44  ;;  %v1161_v60 = vrot.slane %v1155_v46, 6 }
 0x169   : > { %v1236_v38 = vstv %s3124_s8  ;;  %s2374_s8 = sld [smem:[#allocation6 + $0x8b]] }
 0x16a   : > { %v575_v61 = vadd.f32 %v570_v59, %v554_v19  ;;  %v1060_v59 = vsel %vm233_vm3, %v1058_v15, %v1059_v49  ;;  %v1154_v49 = vmul.f32 %v1153_v34, %v2767_v44  ;;  %v1181_v62 = vrot.slane %v1175_v48, 6 }
 0x16b   : > { %1065 = vrot.lane.b32.xlu0 %v1062_v58, %s2621_s6  ;;  %1044 = vrot.lane.b32.xlu1 %v1041_v56, %s2619_s30  ;;  %v1222_v34 = vstv %s3126_s20  ;;  %s2376_s20 = sld [smem:[#allocation6 + $0x8d]] }
 0x16c   : > { %1023 = vrot.lane.b32.xlu2 %v1020_v0, %s2620_s27  ;;  %v1160_v63 = vrot.slane %v1154_v49, 6  ;;  %v1195_v0 = vstv %s2362_s7  ;;  %s2375_s7 = sld [smem:[#allocation6 + $0x8c]] }
 0x16d   : > { %v551_v3 = vpop.permute.xlu1 %550  ;;  %v572_v5 = vpop.permute.xlu0 %571  ;;  %v1196_v33 = vmul.f32 %v1195_v0, %v2767_v44 }
 0x16e   : > { %v555_v40 = vadd.f32 %v551_v3, %v534_v43  ;;  %v633_v8 = vpop.permute.xlu2 %632  ;;  %v642_v43 = vmul.f32 %v641_v55, %v2767_v44  ;;  %v1197_v3 = vmul.f32 %v1195_v0, %v2776_v51 }
 0x16f   : > { %v1202_v46 = vrot.slane %v1196_v33, 6 }
 0x170   : > { %v576_v39 = vadd.f32 %v572_v5, %v555_v40  ;;  %v1198_v5 = vmul.f32 %v1195_v0, %v2804_v9  ;;  %v1183_v40 = vsel %vm1079_vm8, %v1181_v62, %v1182_v57 }
 0x172   : > { %v597_v20 = vadd.f32 %v593_v53, %v576_v39  ;;  %v652_v53 = vrot.slane %v644_v36, 3  ;;  %v1141_v39 = vsel %vm1079_vm8, %v1139_v2, %v1140_v28  ;;  %v1205_v24 = vrot.slane %v1198_v5, 6 }
 0x173   : > { %1123 = vrot.lane.b32.xlu0 %v1120_v21, %s2616_s14  ;;  %1102 = vrot.lane.b32.xlu1 %v1099_v22, %s2617_s16  ;;  %v1203_v22 = vrot.slane %v1197_v3, 6 }
 0x174   : > { %1063 = vrot.lane.b32.xlu2 %v1060_v59, %s2621_s6  ;;  %v653_v1 = vsel %vm648_vm6, %v650_v50, %v652_v53  ;;  %v1184_v59 = vrot.slane %v1177_v10, 6  ;;  %v1264_v10 = vstv %s3163_s17  ;;  %s2356_s17 = sld [smem:[#allocation6 + $0x2a]] }
 0x175   : > { %v591_v26 = vpop.permute.xlu1 %590  ;;  %v612_v27 = vpop.permute.xlu0 %611  ;;  %v1206_v4 = vsel %vm1079_vm8, %v1203_v22, %v1205_v24  ;;  %v1204_v48 = vsel %vm1079_vm8, %v1202_v46, %v1203_v22 }
 0x176   : > { %v596_v29 = vadd.f32 %v591_v26, %v575_v61  ;;  %v674_v30 = vpop.permute.xlu2 %673  ;;  %v649_v61 = vrot.slane %v642_v43, 3  ;;  %v1163_v26 = vrot.slane %v1156_v12, 6 }
 0x178   : > { %v617_v6 = vadd.f32 %v612_v27, %v596_v29  ;;  %v651_v11 = vsel %vm648_vm6, %v649_v61, %v650_v50  ;;  %v1185_v29 = vsel %vm1079_vm8, %v1182_v57, %v1184_v59 }
 0x17a   : > { %v638_v41 = vadd.f32 %v633_v8, %v617_v6  ;;  %v1162_v8 = vsel %vm1079_vm8, %v1160_v63, %v1161_v60  ;;  %v3139_v6 = vsel %vm233_vm3, 0.0, %v256_v18 }
 0x17b   : > { %1146 = vrot.lane.b32.xlu0 %v1143_v35, %s2618_s24  ;;  %1125 = vrot.lane.b32.xlu1 %v1122_v42, %s2616_s14  ;;  %v1237_v37 = vmul.f32 %v1236_v38, %v3139_v6  ;;  %v1223_v45 = vmul.f32 %v1222_v34, %v3139_v6 }
 0x17c   : > { %1104 = vrot.lane.b32.xlu2 %v1101_v47, %s2617_s16  ;;  %v656_v14 = vadd.f32 %v651_v11, %v638_v41  ;;  %v3146_v41 = vsel %vm228_vm2, %v251_v31, 0.0 }
 0x17d   : > { %v614_v52 = vpop.permute.xlu1 %613  ;;  %v635_v23 = vpop.permute.xlu0 %634  ;;  %v257_v43 = vrot.slane %v3146_v41, 5 }
 0x17e   : > { %v618_v19 = vadd.f32 %v614_v52, %v597_v20  ;;  %v714_v58 = vpop.permute.xlu2 %713 }
 0x17f   : > { %v3160_v52 = vsel %vm233_vm3, %v256_v18, %v257_v43  ;;  %v1323_v18 = vstv %s2371_s26  ;;  %s2383_s26 = sld [smem:[#allocation6 + $0x94]] }
 0x180   : > { %v639_v56 = vadd.f32 %v635_v23, %v618_v19  ;;  %v785_v19 = vstv %s2342_s28  ;;  %v1238_v61 = vmul.f32 %v1236_v38, %v3160_v52  ;;  %v1224_v63 = vmul.f32 %v1222_v34, %v3160_v52  ;;  %s2378_s28 = sld [smem:[#allocation6 + $0x8f]] }
 0x181   : > { %v787_v57 = vmul.f32 %v785_v19, %v2776_v51  ;;  %v786_v0 = vmul.f32 %v785_v19, %v2767_v44  ;;  %v1324_v33 = vmul.f32 %v1323_v18, %v3139_v6 }
 0x182   : > { %v657_v7 = vadd.f32 %v653_v1, %v639_v56  ;;  %v788_v56 = vmul.f32 %v785_v19, %v2804_v9 }
 0x183   : > { %1186 = vrot.lane.b32.xlu0 %v1183_v40, %s2619_s30  ;;  %1165 = vrot.lane.b32.xlu1 %v1162_v8, %s2620_s27  ;;  %v794_v1 = vrot.slane %v787_v57, 4  ;;  %v1278_v8 = vstv %s3155_s5  ;;  %s2380_s5 = sld [smem:[#allocation6 + $0x91]] }
 0x184   : > { %v678_v15 = vadd.f32 %v674_v30, %v657_v7  ;;  %1144 = vrot.lane.b32.xlu2 %v1141_v39, %s2618_s24  ;;  %v1164_v30 = vsel %vm1079_vm8, %v1161_v60, %v1163_v26  ;;  %v1252_v60 = vmul.f32 %v1250_v54, %v3160_v52  ;;  %v796_v3 = vrot.slane %v788_v56, 4 }
 0x185   : > { %v672_v16 = vpop.permute.xlu1 %671  ;;  %v693_v17 = vpop.permute.xlu0 %692  ;;  %v793_v39 = vrot.slane %v786_v0, 4  ;;  %v1279_v13 = vmul.f32 %v1278_v8, %v3139_v6  ;;  %v1292_v26 = vstv %s3174_s19  ;;  %s2382_s19 = sld [smem:[#allocation6 + $0x93]] }
 0x186   : > { %v677_v20 = vadd.f32 %v672_v16, %v656_v14  ;;  %v737_v21 = vpop.permute.xlu2 %736  ;;  %v797_v12 = vsel %vm792_vm7, %v794_v1, %v796_v3  ;;  %v1265_v14 = vmul.f32 %v1264_v10, %v3139_v6  ;;  %v1251_v16 = vmul.f32 %v1250_v54, %v3139_v6 }
 0x187   : > { %v929_v3 = vstv %s2349_s3  ;;  %s2385_s3 = sld [smem:[#allocation6 + $0x96]] }
 0x188   : > { %v698_v27 = vadd.f32 %v693_v17, %v677_v20  ;;  %v795_v17 = vsel %vm792_vm7, %v793_v39, %v794_v1 }
 0x18a   : > { %v719_v28 = vadd.f32 %v714_v58, %v698_v27  ;;  %v1344_v27 = vstv %s2372_s25  ;;  %s2381_s25 = sld [smem:[#allocation6 + $0x92]] }
 0x18b   : > { %1209 = vrot.lane.b32.xlu0 %v1206_v4, %s2621_s6  ;;  %1188 = vrot.lane.b32.xlu1 %v1185_v29, %s2619_s30  ;;  %v1294_v4 = vmul.f32 %v1292_v26, %v3160_v52  ;;  %v1280_v29 = vmul.f32 %v1278_v8, %v3160_v52  ;;  %v1345_v31 = vmul.f32 %v1344_v27, %v3139_v6 }
 0x18c   : > { %1167 = vrot.lane.b32.xlu2 %v1164_v30, %s2620_s27  ;;  %v1266_v30 = vmul.f32 %v1264_v10, %v3160_v52 }
 0x18d   : > { %v695_v55 = vpop.permute.xlu1 %694  ;;  %v716_v32 = vpop.permute.xlu0 %715 }
 0x18e   : > { %v699_v35 = vadd.f32 %v695_v55, %v678_v15  ;;  %v777_v36 = vpop.permute.xlu2 %776 }
 0x190   : > { %v720_v42 = vadd.f32 %v716_v32, %v699_v35  ;;  %v1346_v32 = vmul.f32 %v1344_v27, %v3160_v52  ;;  %v1325_v35 = vmul.f32 %v1323_v18, %v3160_v52 }
 0x192   : > { %v741_v47 = vadd.f32 %v737_v21, %v720_v42  ;;  %v1351_v42 = vrot.slane %v1345_v31, 1 }
 0x193   : > { %1241 = vrot.lane.b32.xlu0 %v1237_v37, %s2616_s14  ;;  %1227 = vrot.lane.b32.xlu1 %v1223_v45, %s2617_s16  ;;  %v1365_v37 = vstv %s2373_s29  ;;  %s2386_s29 = sld [smem:[#allocation6 + $0x97]] }
 0x194   : > { %1207 = vrot.lane.b32.xlu2 %v1204_v48, %s2621_s6  ;;  %v1330_v48 = vrot.slane %v1324_v33, 1  ;;  %v3204_v41 = vmul.f32 %v1365_v37, %v3160_v52 }
 0x195   : > { %v735_v49 = vpop.permute.xlu1 %734  ;;  %v756_v50 = vpop.permute.xlu0 %755 }
 0x196   : > { %v740_v53 = vadd.f32 %v735_v49, %v719_v28  ;;  %v818_v23 = vpop.permute.xlu2 %817  ;;  %v1331_v49 = vrot.slane %v1325_v35, 1  ;;  %v1373_v56 = vrot.slane %v3204_v41, 1 }
 0x198   : > { %v761_v58 = vadd.f32 %v756_v50, %v740_v53  ;;  %v1293_v53 = vmul.f32 %v1292_v26, %v3139_v6  ;;  %v1332_v19 = vsel %vm360_vm4, %v1330_v48, %v1331_v49 }
 0x19a   : > { %v782_v62 = vadd.f32 %v777_v36, %v761_v58  ;;  %v3200_v36 = vsel %vm233_vm3, %v257_v43, 0.0 }
 0x19b   : > { %1257 = vrot.lane.b32.xlu0 %v1252_v60, %s2618_s24  ;;  %1243 = vrot.lane.b32.xlu1 %v1238_v61, %s2616_s14  ;;  %v1368_v43 = vmul.f32 %v1365_v37, %v3200_v36  ;;  %v1347_v58 = vmul.f32 %v1344_v27, %v3200_v36  ;;  %v1326_v57 = vmul.f32 %v1323_v18, %v3200_v36 }
 0x19c   : > { %1229 = vrot.lane.b32.xlu2 %v1224_v63, %s2617_s16  ;;  %v800_v20 = vadd.f32 %v795_v17, %v782_v62 }
 0x19d   : > { %v758_v2 = vpop.permute.xlu1 %757  ;;  %v779_v5 = vpop.permute.xlu0 %778  ;;  %v1375_v62 = vrot.slane %v1368_v43, 1  ;;  %v1354_v1 = vrot.slane %v1347_v58, 1 }
 0x19e   : > { %v762_v7 = vadd.f32 %v758_v2, %v741_v47  ;;  %v858_v40 = vpop.permute.xlu2 %857  ;;  %v1352_v47 = vrot.slane %v1346_v32, 1  ;;  %v1407_v2 = vstv %s2375_s7  ;;  %s2387_s7 = sld [smem:[#allocation6 + $0x98]] }
 0x19f   : > { %v1376_v10 = vsel %vm360_vm4, %v1373_v56, %v1375_v62  ;;  %v1408_v39 = vmul.f32 %v1407_v2, %v3139_v6 }
 0x1a0   : > { %v783_v11 = vadd.f32 %v779_v5, %v762_v7  ;;  %v1353_v54 = vsel %vm360_vm4, %v1351_v42, %v1352_v47  ;;  %v1333_v5 = vrot.slane %v1326_v57, 1  ;;  %v1386_v7 = vstv %s2374_s8  ;;  %s2389_s8 = sld [smem:[#allocation6 + $0x9a]] }
 0x1a1   : > { %v1414_v26 = vrot.slane %v1408_v39, 1  ;;  %v1389_v48 = vmul.f32 %v1386_v7, %v3200_v36  ;;  %v1487_v57 = vstv %s2379_s23  ;;  %s3312_s23 = sld [smem:[#allocation6 + $0x80]] }
 0x1a2   : > { %v801_v15 = vadd.f32 %v797_v12, %v783_v11  ;;  %v932_v11 = vmul.f32 %v929_v3, %v2804_v9  ;;  %v1409_v12 = vmul.f32 %v1407_v2, %v3160_v52  ;;  %v1334_v17 = vsel %vm360_vm4, %v1331_v49, %v1333_v5 }
 0x1a3   : > { %1283 = vrot.lane.b32.xlu0 %v1279_v13, %s2619_s30  ;;  %1269 = vrot.lane.b32.xlu1 %v1265_v14, %s2620_s27  ;;  %v1355_v14 = vsel %vm360_vm4, %v1352_v47, %v1354_v1 }
 0x1a4   : > { %v822_v21 = vadd.f32 %v818_v23, %v801_v15  ;;  %1255 = vrot.lane.b32.xlu2 %v1251_v16, %s2618_s24  ;;  %v1387_v15 = vmul.f32 %v1386_v7, %v3139_v6  ;;  %v1388_v16 = vmul.f32 %v1386_v7, %v3160_v52  ;;  %v1415_v27 = vrot.slane %v1409_v12, 1 }
 0x1a5   : > { %v816_v22 = vpop.permute.xlu1 %815  ;;  %v837_v24 = vpop.permute.xlu0 %836 }
 0x1a6   : > { %v821_v59 = vadd.f32 %v816_v22, %v800_v20  ;;  %v881_v25 = vpop.permute.xlu2 %880  ;;  %v1366_v20 = vmul.f32 %v1365_v37, %v3139_v6  ;;  %v1416_v42 = vsel %vm360_vm4, %v1414_v26, %v1415_v27 }
 0x1a8   : > { %v842_v28 = vadd.f32 %v837_v24, %v821_v59  ;;  %v939_v59 = vrot.slane %v932_v11, 5  ;;  %v1372_v31 = vrot.slane %v1366_v20, 1 }
 0x1aa   : > { %v863_v55 = vadd.f32 %v858_v40, %v842_v28  ;;  %v931_v40 = vmul.f32 %v929_v3, %v2776_v51  ;;  %v1374_v47 = vsel %vm360_vm4, %v1372_v31, %v1373_v56 }
 0x1ab   : > { %1299 = vrot.lane.b32.xlu0 %v1294_v4, %s2621_s6  ;;  %1285 = vrot.lane.b32.xlu1 %v1280_v29, %s2619_s30  ;;  %v1393_v4 = vrot.slane %v1387_v15, 1  ;;  %v1394_v29 = vrot.slane %v1388_v16, 1 }
 0x1ac   : > { %1271 = vrot.lane.b32.xlu2 %v1266_v30, %s2620_s27  ;;  %v937_v22 = vrot.slane %v931_v40, 5  ;;  %v1428_v30 = vstv %s2376_s20  ;;  %s2388_s20 = sld [smem:[#allocation6 + $0x99]] }
 0x1ad   : > { %v839_v38 = vpop.permute.xlu1 %838  ;;  %v860_v34 = vpop.permute.xlu0 %859  ;;  %v1430_v35 = vmul.f32 %v1428_v30, %v3160_v52  ;;  %v1395_v37 = vsel %vm360_vm4, %v1393_v4, %v1394_v29  ;;  %v1429_v40 = vmul.f32 %v1428_v30, %v3139_v6 }
 0x1ae   : > { %v843_v45 = vadd.f32 %v839_v38, %v822_v21  ;;  %v921_v46 = vpop.permute.xlu2 %920  ;;  %v930_v21 = vmul.f32 %v929_v3, %v2767_v44  ;;  %v940_v33 = vsel %vm233_vm3, %v937_v22, %v939_v59  ;;  %v1431_v38 = vmul.f32 %v1428_v30, %v3200_v36 }
 0x1af   : > { %v1436_v43 = vrot.slane %v1430_v35, 1  ;;  %v1435_v16 = vrot.slane %v1429_v40, 1  ;;  %v1072_v35 = vstv %s2356_s17  ;;  %s2392_s17 = sld [smem:[#allocation6 + $0x9d]] }
 0x1b0   : > { %v864_v50 = vadd.f32 %v860_v34, %v843_v45  ;;  %v936_v32 = vrot.slane %v930_v21, 5  ;;  %v1410_v45 = vmul.f32 %v1407_v2, %v3200_v36 }
 0x1b2   : > { %v885_v23 = vadd.f32 %v881_v25, %v864_v50  ;;  %v1417_v58 = vrot.slane %v1410_v45, 1 }
 0x1b3   : > { %1356 = vrot.lane.b32.xlu0 %v1353_v54, %s2616_s14  ;;  %1335 = vrot.lane.b32.xlu1 %v1332_v19, %s2617_s16 }
 0x1b4   : > { %1297 = vrot.lane.b32.xlu2 %v1293_v53, %s2621_s6  ;;  %v1418_v2 = vsel %vm360_vm4, %v1415_v27, %v1417_v58  ;;  %v1437_v27 = vsel %vm360_vm4, %v1435_v16, %v1436_v43 }
 0x1b5   : > { %v879_v60 = vpop.permute.xlu1 %878  ;;  %v900_v61 = vpop.permute.xlu0 %899 }
 0x1b6   : > { %v884_v63 = vadd.f32 %v879_v60, %v863_v55  ;;  %v961_v0 = vpop.permute.xlu2 %960  ;;  %v1396_v60 = vrot.slane %v1389_v48, 1 }
 0x1b8   : > { %v905_v8 = vadd.f32 %v900_v61, %v884_v63  ;;  %v1466_v61 = vstv %s2378_s28  ;;  %v1488_v63 = vmul.f32 %v1487_v57, %v3139_v6  ;;  %v1397_v7 = vsel %vm360_vm4, %v1394_v29, %v1396_v60  ;;  %s2390_s28 = sld [smem:[#allocation6 + $0x9b]] }
 0x1b9   : > { %v1467_v3 = vmul.f32 %v1466_v61, %v3139_v6  ;;  %v1468_v5 = vmul.f32 %v1466_v61, %v3160_v52 }
 0x1ba   : > { %v926_v13 = vadd.f32 %v921_v46, %v905_v8  ;;  %v938_v46 = vsel %vm233_vm3, %v936_v32, %v937_v22  ;;  %v1494_v11 = vrot.slane %v1488_v63, 2  ;;  %v1490_v22 = vmul.f32 %v1487_v57, %v3200_v36 }
 0x1bb   : > { %1379 = vrot.lane.b32.xlu0 %v1376_v10, %s2618_s24  ;;  %1358 = vrot.lane.b32.xlu1 %v1355_v14, %s2616_s14  ;;  %v1473_v14 = vrot.slane %v1467_v3, 2  ;;  %v1474_v15 = vrot.slane %v1468_v5, 2 }
 0x1bc   : > { %1337 = vrot.lane.b32.xlu2 %v1334_v17, %s2617_s16  ;;  %v943_v49 = vadd.f32 %v938_v46, %v926_v13  ;;  %v1508_v17 = vstv %s2380_s5  ;;  %v1497_v29 = vrot.slane %v1490_v22, 2  ;;  %v1075_v46 = vmul.f32 %v1072_v35, %v2804_v9  ;;  %s2393_s5 = sld [smem:[#allocation6 + $0x9e]] }
 0x1bd   : > { %v902_v24 = vpop.permute.xlu1 %901  ;;  %v923_v25 = vpop.permute.xlu0 %922  ;;  %v1475_v59 = vsel %vm504_vm5, %v1473_v14, %v1474_v15  ;;  %v1511_v26 = vmul.f32 %v1508_v17, %v3200_v36  ;;  %v1073_v9 = vmul.f32 %v1072_v35, %v2767_v44 }
 0x1be   : > { %v906_v18 = vadd.f32 %v902_v24, %v885_v23  ;;  %v1001_v28 = vpop.permute.xlu2 %1000  ;;  %v1438_v23 = vrot.slane %v1431_v38, 1 }
 0x1bf   : > { %v1518_v32 = vrot.slane %v1511_v26, 2  ;;  %v1080_v3 = vrot.slane %v1073_v9, 6 }
 0x1c0   : > { %v927_v55 = vadd.f32 %v923_v25, %v906_v18  ;;  %v1439_v56 = vsel %vm360_vm4, %v1436_v43, %v1438_v23  ;;  %v3256_v25 = vmul.f32 %v1508_v17, %v3160_v52  ;;  %v1469_v18 = vmul.f32 %v1466_v61, %v3200_v36 }
 0x1c1   : > { %v1509_v43 = vmul.f32 %v1508_v17, %v3139_v6 }
 0x1c2   : > { %v944_v34 = vadd.f32 %v940_v33, %v927_v55  ;;  %v1516_v55 = vrot.slane %v3256_v25, 2  ;;  %v1550_v33 = vstv %s2382_s19  ;;  %v1476_v38 = vrot.slane %v1469_v18, 2  ;;  %s2394_s19 = sld [smem:[#allocation6 + $0x9f]] }
 0x1c3   : > { %1419 = vrot.lane.b32.xlu0 %v1416_v42, %s2619_s30  ;;  %1398 = vrot.lane.b32.xlu1 %v1395_v37, %s2620_s27  ;;  %v1074_v42 = vmul.f32 %v1072_v35, %v2776_v51  ;;  %v1552_v48 = vmul.f32 %v1550_v33, %v3160_v52  ;;  %v1630_v25 = vstv %s2386_s29  ;;  %s2395_s29 = sld [smem:[#allocation6 + $0xa0]] }
 0x1c4   : > { %v965_v50 = vadd.f32 %v961_v0, %v944_v34  ;;  %1377 = vrot.lane.b32.xlu2 %v1374_v47, %s2618_s24  ;;  %v1489_v0 = vmul.f32 %v1487_v57, %v3160_v52  ;;  %v1529_v34 = vstv %s2381_s25  ;;  %v1551_v47 = vmul.f32 %v1550_v33, %v3139_v6  ;;  %s2370_s25 = sld [smem:[#allocation6 + $0x87]] }
 0x1c5   : > { %v959_v53 = vpop.permute.xlu1 %958  ;;  %v980_v41 = vpop.permute.xlu0 %979  ;;  %v1477_v51 = vsel %vm504_vm5, %v1474_v15, %v1476_v38  ;;  %v1081_v23 = vrot.slane %v1074_v42, 6  ;;  %v1558_v60 = vrot.slane %v1552_v48, 2 }
 0x1c6   : > { %v964_v54 = vadd.f32 %v959_v53, %v943_v49  ;;  %v1024_v19 = vpop.permute.xlu2 %1023  ;;  %v1495_v39 = vrot.slane %v1489_v0, 2  ;;  %v1530_v53 = vmul.f32 %v1529_v34, %v3139_v6  ;;  %v1557_v57 = vrot.slane %v1551_v47, 2 }
 0x1c7   : > { %v1571_v0 = vstv %s2383_s26  ;;  %s2396_s26 = sld [smem:[#allocation6 + $0xa1]] }
 0x1c8   : > { %v985_v62 = vadd.f32 %v980_v41, %v964_v54  ;;  %v1496_v21 = vsel %vm504_vm5, %v1494_v11, %v1495_v39  ;;  %v1498_v45 = vsel %vm504_vm5, %v1495_v39, %v1497_v29  ;;  %v1531_v41 = vmul.f32 %v1529_v34, %v3160_v52 }
 0x1c9   : > { %v1573_v5 = vmul.f32 %v1571_v0, %v3160_v52  ;;  %v1553_v11 = vmul.f32 %v1550_v33, %v3200_v36  ;;  %v1082_v39 = vsel %vm1079_vm8, %v1080_v3, %v1081_v23  ;;  %v1632_v29 = vmul.f32 %v1630_v25, %v3160_v52 }
 0x1ca   : > { %v1006_v1 = vadd.f32 %v1001_v28, %v985_v62  ;;  %v1537_v63 = vrot.slane %v1531_v41, 2  ;;  %v1572_v35 = vmul.f32 %v1571_v0, %v3139_v6  ;;  %v1672_v3 = vstv %s2388_s20  ;;  %s2401_s20 = sld [smem:[#allocation6 + $0xa6]] }
 0x1cb   : > { %1442 = vrot.lane.b32.xlu0 %v1439_v56, %s2621_s6  ;;  %1421 = vrot.lane.b32.xlu1 %v1418_v2, %s2619_s30  ;;  %v1536_v56 = vrot.slane %v1530_v53, 2 }
 0x1cc   : > { %1400 = vrot.lane.b32.xlu2 %v1397_v7, %s2620_s27  ;;  %v1574_v7 = vmul.f32 %v1571_v0, %v3200_v36 }
 0x1cd   : > { %v982_v8 = vpop.permute.xlu1 %981  ;;  %v1003_v10 = vpop.permute.xlu0 %1002 }
 0x1ce   : > { %v986_v12 = vadd.f32 %v982_v8, %v965_v50  ;;  %v1064_v13 = vpop.permute.xlu2 %1063  ;;  %v1519_v50 = vsel %vm504_vm5, %v1516_v55, %v1518_v32  ;;  %v1559_v8 = vsel %vm504_vm5, %v1557_v57, %v1558_v60 }
 0x1d0   : > { %v1007_v20 = vadd.f32 %v1003_v10, %v986_v12  ;;  %v1538_v10 = vsel %vm504_vm5, %v1536_v56, %v1537_v63 }
 0x1d2   : > { %v1028_v24 = vadd.f32 %v1024_v19, %v1007_v20  ;;  %v1083_v19 = vrot.slane %v1075_v46, 6  ;;  %v1579_v20 = vrot.slane %v1573_v5, 2 }
 0x1d3   : > { %1499 = vrot.lane.b32.xlu0 %v1496_v21, %s2616_s14  ;;  %1478 = vrot.lane.b32.xlu1 %v1475_v59, %s2617_s16  ;;  %v1581_v21 = vrot.slane %v1574_v7, 2  ;;  %v1560_v59 = vrot.slane %v1553_v11, 2  ;;  %v1673_v11 = vmul.f32 %v1672_v3, %v3139_v6 }
 0x1d4   : > { %1440 = vrot.lane.b32.xlu2 %v1437_v27, %s2621_s6  ;;  %v1084_v44 = vsel %vm1079_vm8, %v1081_v23, %v1083_v19  ;;  %v1609_v27 = vstv %s2385_s3  ;;  %s2397_s3 = sld [smem:[#allocation6 + $0xa2]] }
 0x1d5   : > { %v1022_v28 = vpop.permute.xlu1 %1021  ;;  %v1043_v4 = vpop.permute.xlu0 %1042  ;;  %v1611_v32 = vmul.f32 %v1609_v27, %v3160_v52 }
 0x1d6   : > { %v1027_v30 = vadd.f32 %v1022_v28, %v1006_v1  ;;  %v1105_v31 = vpop.permute.xlu2 %1104  ;;  %v1515_v1 = vrot.slane %v1509_v43, 2  ;;  %v1582_v28 = vsel %vm504_vm5, %v1579_v20, %v1581_v21  ;;  %v1633_v43 = vmul.f32 %v1630_v25, %v3200_v36 }
 0x1d7   : > { %v1617_v48 = vrot.slane %v1611_v32, 3 }
 0x1d8   : > { %v1048_v37 = vadd.f32 %v1043_v4, %v1027_v30  ;;  %v1517_v12 = vsel %vm504_vm5, %v1515_v1, %v1516_v55  ;;  %v1631_v4 = vmul.f32 %v1630_v25, %v3139_v6  ;;  %v1610_v55 = vmul.f32 %v1609_v27, %v3139_v6 }
 0x1d9   : > { %v1640_v56 = vrot.slane %v1633_v43, 3  ;;  %v1693_v1 = vstv %s2389_s8  ;;  %s2399_s8 = sld [smem:[#allocation6 + $0xa4]] }
 0x1da   : > { %v1069_v49 = vadd.f32 %v1064_v13, %v1048_v37  ;;  %v1532_v13 = vmul.f32 %v1529_v34, %v3200_v36  ;;  %v1637_v42 = vrot.slane %v1631_v4, 3  ;;  %v1638_v37 = vrot.slane %v1632_v29, 3 }
 0x1db   : > { %1522 = vrot.lane.b32.xlu0 %v1519_v50, %s2618_s24  ;;  %1501 = vrot.lane.b32.xlu1 %v1498_v45, %s2616_s14  ;;  %v1616_v47 = vrot.slane %v1610_v55, 3  ;;  %v1578_v50 = vrot.slane %v1572_v35, 2  ;;  %v1696_v32 = vmul.f32 %v1693_v1, %v3200_v36  ;;  %v1675_v35 = vmul.f32 %v1672_v3, %v3200_v36 }
 0x1dc   : > { %1480 = vrot.lane.b32.xlu2 %v1477_v51, %s2617_s16  ;;  %v1087_v14 = vadd.f32 %v1082_v39, %v1069_v49  ;;  %v1539_v26 = vrot.slane %v1532_v13, 2  ;;  %v1651_v49 = vstv %s2387_s7  ;;  %v1639_v23 = vsel %vm648_vm6, %v1637_v42, %v1638_v37  ;;  %s2400_s7 = sld [smem:[#allocation6 + $0xa5]] }
 0x1dd   : > { %v1045_v54 = vpop.permute.xlu1 %1044  ;;  %v1066_v58 = vpop.permute.xlu0 %1065  ;;  %v1653_v41 = vmul.f32 %v1651_v49, %v3160_v52  ;;  %v1654_v51 = vmul.f32 %v1651_v49, %v3200_v36  ;;  %v1580_v19 = vsel %vm504_vm5, %v1578_v50, %v1579_v20  ;;  %v1641_v7 = vsel %vm648_vm6, %v1638_v37, %v1640_v56 }
 0x1de   : > { %v1049_v61 = vadd.f32 %v1045_v54, %v1028_v24  ;;  %v1145_v62 = vpop.permute.xlu2 %1144  ;;  %v1540_v33 = vsel %vm504_vm5, %v1537_v63, %v1539_v26  ;;  %v1618_v54 = vsel %vm648_vm6, %v1616_v47, %v1617_v48  ;;  %v1674_v39 = vmul.f32 %v1672_v3, %v3160_v52 }
 0x1df   : > { %v1652_v13 = vmul.f32 %v1651_v49, %v3139_v6  ;;  %v1714_v20 = vstv %s2390_s28  ;;  %v1703_v49 = vrot.slane %v1696_v32, 3  ;;  %v1773_v50 = vstv %s2393_s5  ;;  %s2402_s28 = sld [smem:[#allocation6 + $0xa7]] }
 0x1e0   : > { %v1070_v2 = vadd.f32 %v1066_v58, %v1049_v61  ;;  %v1612_v58 = vmul.f32 %v1609_v27, %v3200_v36  ;;  %v1659_v61 = vrot.slane %v1653_v41, 3  ;;  %v1680_v25 = vrot.slane %v1674_v39, 3  ;;  %s2403_s5 = sld [smem:[#allocation6 + $0xa8]] }
 0x1e1   : > { %v1658_v26 = vrot.slane %v1652_v13, 3  ;;  %v1716_v4 = vmul.f32 %v1714_v20, %v3160_v52  ;;  %v1717_v29 = vmul.f32 %v1714_v20, %v3200_v36  ;;  %v1752_v41 = vstv %s2392_s17  ;;  %s2404_s17 = sld [smem:[#allocation6 + $0xa9]] }
 0x1e2   : > { %v1088_v40 = vadd.f32 %v1084_v44, %v1070_v2  ;;  %v1619_v2 = vrot.slane %v1612_v58, 3  ;;  %v1754_v58 = vmul.f32 %v1752_v41, %v3160_v52 }
 0x1e3   : > { %1562 = vrot.lane.b32.xlu0 %v1559_v8, %s2619_s30  ;;  %1541 = vrot.lane.b32.xlu1 %v1538_v10, %s2620_s27  ;;  %v1695_v10 = vmul.f32 %v1693_v1, %v3160_v52 }
 0x1e4   : > { %v1109_v15 = vadd.f32 %v1105_v31, %v1088_v40  ;;  %1520 = vrot.lane.b32.xlu2 %v1517_v12, %s2618_s24  ;;  %v1561_v31 = vsel %vm504_vm5, %v1558_v60, %v1560_v59  ;;  %v1694_v40 = vmul.f32 %v1693_v1, %v3139_v6  ;;  %v1620_v12 = vsel %vm648_vm6, %v1617_v48, %v1619_v2 }
 0x1e5   : > { %v1103_v16 = vpop.permute.xlu1 %1102  ;;  %v1124_v17 = vpop.permute.xlu0 %1123  ;;  %v1679_v59 = vrot.slane %v1673_v11, 3 }
 0x1e6   : > { %v1108_v22 = vadd.f32 %v1103_v16, %v1087_v14  ;;  %v1168_v24 = vpop.permute.xlu2 %1167 }
 0x1e7   : > { %v1681_v55 = vsel %vm648_vm6, %v1679_v59, %v1680_v25 }
 0x1e8   : > { %v1129_v18 = vadd.f32 %v1124_v17, %v1108_v22  ;;  %v1700_v17 = vrot.slane %v1694_v40, 3 }
 0x1ea   : > { %v1150_v30 = vadd.f32 %v1145_v62, %v1129_v18  ;;  %v1661_v62 = vrot.slane %v1654_v51, 3 }
 0x1eb   : > { %1585 = vrot.lane.b32.xlu0 %v1582_v28, %s2621_s6  ;;  %1564 = vrot.lane.b32.xlu1 %v1561_v31, %s2619_s30 }
 0x1ec   : > { %1543 = vrot.lane.b32.xlu2 %v1540_v33, %s2620_s27  ;;  %v1662_v5 = vsel %vm648_vm6, %v1659_v61, %v1661_v62  ;;  %v1660_v33 = vsel %vm648_vm6, %v1658_v26, %v1659_v61  ;;  %v1715_v61 = vmul.f32 %v1714_v20, %v3139_v6  ;;  %v1836_v26 = vstv %s2396_s26  ;;  %s2408_s26 = sld [smem:[#allocation6 + $0xad]] }
 0x1ed   : > { %v1126_v38 = vpop.permute.xlu1 %1125  ;;  %v1147_v34 = vpop.permute.xlu0 %1146 }
 0x1ee   : > { %v1130_v45 = vadd.f32 %v1126_v38, %v1109_v15  ;;  %v1208_v46 = vpop.permute.xlu2 %1207  ;;  %v1216_v15 = vstv %s3312_s23  ;;  %s2377_s23 = sld [smem:[#allocation6 + $0x8e]] }
 0x1ef   : > { %v1218_v27 = vmul.f32 %v1216_v15, %v3160_v52  ;;  %v1217_v28 = vmul.f32 %v1216_v15, %v3139_v6  ;;  %v1755_v15 = vmul.f32 %v1752_v41, %v3200_v36 }
 0x1f0   : > { %v1151_v53 = vadd.f32 %v1147_v34, %v1130_v45  ;;  %v1722_v45 = vrot.slane %v1716_v4, 3 }
 0x1f2   : > { %v1172_v9 = vadd.f32 %v1168_v24, %v1151_v53  ;;  %v1701_v24 = vrot.slane %v1695_v10, 3  ;;  %v1682_v53 = vrot.slane %v1675_v35, 3 }
 0x1f3   : > { %1642 = vrot.lane.b32.xlu0 %v1639_v23, %s2616_s14  ;;  %1621 = vrot.lane.b32.xlu1 %v1618_v54, %s2617_s16  ;;  %v1775_v23 = vmul.f32 %v1773_v50, %v3160_v52 }
 0x1f4   : > { %1583 = vrot.lane.b32.xlu2 %v1580_v19, %s2621_s6  ;;  %v1702_v31 = vsel %vm648_vm6, %v1700_v17, %v1701_v24  ;;  %v1704_v54 = vsel %vm648_vm6, %v1701_v24, %v1703_v49  ;;  %v1753_v19 = vmul.f32 %v1752_v41, %v3139_v6 }
 0x1f5   : > { %v1166_v57 = vpop.permute.xlu1 %1165  ;;  %v1187_v60 = vpop.permute.xlu0 %1186 }
 0x1f6   : > { %v1171_v63 = vadd.f32 %v1166_v57, %v1150_v30  ;;  %v1230_v0 = vpop.permute.xlu2 %1229  ;;  %v1759_v3 = vrot.slane %v1753_v19, 4 }
 0x1f8   : > { %v1192_v44 = vadd.f32 %v1187_v60, %v1171_v63  ;;  %v1683_v60 = vsel %vm648_vm6, %v1680_v25, %v1682_v53  ;;  %v1306_v25 = vstv %s2370_s25  ;;  %s2407_s25 = sld [smem:[#allocation6 + $0xac]] }
 0x1fa   : > { %v1213_v8 = vadd.f32 %v1208_v46, %v1192_v44  ;;  %v1724_v46 = vrot.slane %v1717_v29, 3  ;;  %v1760_v44 = vrot.slane %v1754_v58, 4  ;;  %v1308_v29 = vmul.f32 %v1306_v25, %v3160_v52 }
 0x1fb   : > { %1665 = vrot.lane.b32.xlu0 %v1662_v5, %s2618_s24  ;;  %1644 = vrot.lane.b32.xlu1 %v1641_v7, %s2616_s14  ;;  %v1794_v5 = vstv %s2394_s19  ;;  %v1721_v7 = vrot.slane %v1715_v61, 3  ;;  %s2406_s19 = sld [smem:[#allocation6 + $0xab]] }
 0x1fc   : > { %1623 = vrot.lane.b32.xlu2 %v1620_v12, %s2617_s16  ;;  %v1219_v38 = vadd.f32 %v1217_v28, %v1213_v8  ;;  %v1725_v43 = vsel %vm648_vm6, %v1722_v45, %v1724_v46  ;;  %v1776_v8 = vmul.f32 %v1773_v50, %v3200_v36  ;;  %v3351_v10 = vmul.f32 %v1794_v5, %v3160_v52 }
 0x1fd   : > { %v1189_v14 = vpop.permute.xlu1 %1188  ;;  %v1210_v16 = vpop.permute.xlu0 %1209  ;;  %v1761_v39 = vsel %vm792_vm7, %v1759_v3, %v1760_v44  ;;  %v1797_v12 = vmul.f32 %v1794_v5, %v3200_v36  ;;  %v1314_v46 = vrot.slane %v1308_v29, 1 }
 0x1fe   : > { %v1193_v21 = vadd.f32 %v1189_v14, %v1172_v9  ;;  %v1256_v22 = vpop.permute.xlu2 %1255  ;;  %v1774_v9 = vmul.f32 %v1773_v50, %v3139_v6  ;;  %v1723_v14 = vsel %vm648_vm6, %v1721_v7, %v1722_v45 }
 0x1ff   : > { %v1804_v59 = vrot.slane %v1797_v12, 4  ;;  %v1916_v12 = vstv %s2400_s7  ;;  %s2410_s7 = sld [smem:[#allocation6 + $0xaf]] }
 0x200   : > { %v1214_v18 = vadd.f32 %v1210_v16, %v1193_v21  ;;  %v1780_v63 = vrot.slane %v1774_v9, 4  ;;  %v1783_v16 = vrot.slane %v1776_v8, 4  ;;  %v1802_v21 = vrot.slane %v3351_v10, 4 }
 0x201   : > { %v1857_v9 = vstv %s2397_s3  ;;  %s2409_s3 = sld [smem:[#allocation6 + $0xae]] }
 0x202   : > { %v1220_v30 = vadd.f32 %v1218_v27, %v1214_v18  ;;  %v1762_v27 = vrot.slane %v1755_v15, 4  ;;  %v1815_v18 = vstv %s2395_s29  ;;  %s2384_s29 = sld [smem:[#allocation6 + $0x95]] }
 0x203   : > { %1705 = vrot.lane.b32.xlu0 %v1702_v31, %s2619_s30  ;;  %1684 = vrot.lane.b32.xlu1 %v1681_v55, %s2620_s27  ;;  %v1837_v31 = vmul.f32 %v1836_v26, %v3139_v6  ;;  %v1838_v55 = vmul.f32 %v1836_v26, %v3160_v52  ;;  %v1816_v35 = vmul.f32 %v1815_v18, %v3139_v6 }
 0x204   : > { %1663 = vrot.lane.b32.xlu2 %v1660_v33, %s2618_s24  ;;  %v1234_v34 = vadd.f32 %v1230_v0, %v1220_v30  ;;  %v1781_v0 = vrot.slane %v1775_v23, 4  ;;  %v1309_v30 = vmul.f32 %v1306_v25, %v3200_v36  ;;  %v1805_v33 = vsel %vm792_vm7, %v1802_v21, %v1804_v59 }
 0x205   : > { %v1228_v42 = vpop.permute.xlu1 %1227  ;;  %v1242_v37 = vpop.permute.xlu0 %1241  ;;  %v1843_v49 = vrot.slane %v1837_v31, 4  ;;  %v1844_v50 = vrot.slane %v1838_v55, 4 }
 0x206   : > { %v1233_v47 = vadd.f32 %v1228_v42, %v1219_v38  ;;  %v1272_v48 = vpop.permute.xlu2 %1271  ;;  %v1782_v11 = vsel %vm792_vm7, %v1780_v63, %v1781_v0  ;;  %v1784_v4 = vsel %vm792_vm7, %v1781_v0, %v1783_v16  ;;  %v1817_v38 = vmul.f32 %v1815_v18, %v3160_v52 }
 0x207   : > { %v1795_v42 = vmul.f32 %v1794_v5, %v3139_v6  ;;  %v1839_v63 = vmul.f32 %v1836_v26, %v3200_v36  ;;  %v1858_v26 = vmul.f32 %v1857_v9, %v3139_v6 }
 0x208   : > { %v1247_v51 = vadd.f32 %v1242_v37, %v1233_v47  ;;  %v1307_v37 = vmul.f32 %v1306_v25, %v3139_v6  ;;  %v1316_v47 = vrot.slane %v1309_v30, 1 }
 0x209   : > { %v1801_v23 = vrot.slane %v1795_v42, 4 }
 0x20a   : > { %v1261_v57 = vadd.f32 %v1256_v22, %v1247_v51  ;;  %v1822_v51 = vrot.slane %v1816_v35, 4  ;;  %v1317_v58 = vsel %vm360_vm4, %v1314_v46, %v1316_v47 }
 0x20b   : > { %1728 = vrot.lane.b32.xlu0 %v1725_v43, %s2621_s6  ;;  %1707 = vrot.lane.b32.xlu1 %v1704_v54, %s2619_s30  ;;  %v1823_v43 = vrot.slane %v1817_v38, 4  ;;  %v1313_v54 = vrot.slane %v1307_v37, 1  ;;  %v1803_v0 = vsel %vm792_vm7, %v1801_v23, %v1802_v21  ;;  %v1919_v38 = vmul.f32 %v1916_v12, %v3200_v36 }
 0x20c   : > { %1686 = vrot.lane.b32.xlu2 %v1683_v60, %s2620_s27  ;;  %v1860_v60 = vmul.f32 %v1857_v9, %v3200_v36 }
 0x20d   : > { %v1244_v62 = vpop.permute.xlu1 %1243  ;;  %v1258_v56 = vpop.permute.xlu0 %1257 }
 0x20e   : > { %v1248_v1 = vadd.f32 %v1244_v62, %v1234_v34  ;;  %v1298_v2 = vpop.permute.xlu2 %1297  ;;  %v1763_v34 = vsel %vm792_vm7, %v1760_v44, %v1762_v27  ;;  %v1845_v62 = vsel %vm792_vm7, %v1843_v49, %v1844_v50  ;;  %v1867_v8 = vrot.slane %v1860_v60, 4 }
 0x20f   : > { %v1926_v49 = vrot.slane %v1919_v38, 5 }
 0x210   : > { %v1262_v40 = vadd.f32 %v1258_v56, %v1248_v1  ;;  %v1824_v56 = vsel %vm792_vm7, %v1822_v51, %v1823_v43  ;;  %v1315_v1 = vsel %vm360_vm4, %v1313_v54, %v1314_v46  ;;  %v1958_v54 = vstv %s2402_s28 }
 0x212   : > { %v1276_v13 = vadd.f32 %v1272_v48, %v1262_v40 }
 0x213   : > { %1785 = vrot.lane.b32.xlu0 %v1782_v11, %s2616_s14  ;;  %1764 = vrot.lane.b32.xlu1 %v1761_v39, %s2617_s16  ;;  %v1846_v39 = vrot.slane %v1839_v63, 4  ;;  %v3414_v63 = vmul.f32 %v1958_v54, %v3160_v52 }
 0x214   : > { %1726 = vrot.lane.b32.xlu2 %v1723_v14, %s2621_s6  ;;  %v1895_v14 = vstv %s2399_s8  ;;  %s2411_s8 = sld [smem:[#allocation6 + $0xb0]] }
 0x215   : > { %v1270_v17 = vpop.permute.xlu1 %1269  ;;  %v1284_v20 = vpop.permute.xlu0 %1283  ;;  %v1847_v21 = vsel %vm792_vm7, %v1844_v50, %v1846_v39 }
 0x216   : > { %v1275_v22 = vadd.f32 %v1270_v17, %v1261_v57  ;;  %v1338_v24 = vpop.permute.xlu2 %1337  ;;  %v1859_v57 = vmul.f32 %v1857_v9, %v3160_v52  ;;  %v1917_v17 = vmul.f32 %v1916_v12, %v3139_v6 }
 0x218   : > { %v1289_v28 = vadd.f32 %v1284_v20, %v1275_v22  ;;  %v1865_v40 = vrot.slane %v1859_v57, 4  ;;  %v1918_v20 = vmul.f32 %v1916_v12, %v3160_v52  ;;  %v1896_v22 = vmul.f32 %v1895_v14, %v3139_v6 }
 0x219   : > { %v1966_v12 = vrot.slane %v3414_v63, 5 }
 0x21a   : > { %v1303_v32 = vadd.f32 %v1298_v2, %v1289_v28  ;;  %v1818_v2 = vmul.f32 %v1815_v18, %v3200_v36  ;;  %v1868_v16 = vsel %vm792_vm7, %v1865_v40, %v1867_v8  ;;  %v1923_v28 = vrot.slane %v1917_v17, 5 }
 0x21b   : > { %1808 = vrot.lane.b32.xlu0 %v1805_v33, %s2618_s24  ;;  %1787 = vrot.lane.b32.xlu1 %v1784_v4, %s2616_s14  ;;  %v1924_v4 = vrot.slane %v1918_v20, 5  ;;  %v1902_v31 = vrot.slane %v1896_v22, 5  ;;  %v1937_v33 = vstv %s2401_s20 }
 0x21c   : > { %1766 = vrot.lane.b32.xlu2 %v1763_v34, %s2617_s16  ;;  %v1320_v3 = vadd.f32 %v1315_v1, %v1303_v32  ;;  %v1864_v32 = vrot.slane %v1858_v26, 4  ;;  %v1939_v37 = vmul.f32 %v1937_v33, %v3160_v52 }
 0x21d   : > { %v1286_v45 = vpop.permute.xlu1 %1285  ;;  %v1300_v48 = vpop.permute.xlu0 %1299  ;;  %v1925_v34 = vsel %vm233_vm3, %v1923_v28, %v1924_v4  ;;  %v1927_v60 = vsel %vm233_vm3, %v1924_v4, %v1926_v49 }
 0x21e   : > { %v1290_v53 = vadd.f32 %v1286_v45, %v1276_v13  ;;  %v1378_v41 = vpop.permute.xlu2 %1377  ;;  %v1825_v13 = vrot.slane %v1818_v2, 4  ;;  %v1940_v45 = vmul.f32 %v1937_v33, %v3200_v36  ;;  %v1866_v47 = vsel %vm792_vm7, %v1864_v32, %v1865_v40 }
 0x21f   : > { %v1945_v9 = vrot.slane %v1939_v37, 5 }
 0x220   : > { %v1304_v19 = vadd.f32 %v1300_v48, %v1290_v53  ;;  %v1826_v25 = vsel %vm792_vm7, %v1823_v43, %v1825_v13  ;;  %v1898_v48 = vmul.f32 %v1895_v14, %v3200_v36  ;;  %v1947_v23 = vrot.slane %v1940_v45, 5 }
 0x221   : > { %v2038_v45 = vstv %s2406_s19 }
 0x222   : > { %v1321_v61 = vadd.f32 %v1317_v58, %v1304_v19  ;;  %v1905_v19 = vrot.slane %v1898_v48, 5  ;;  %v1979_v58 = vstv %s2403_s5  ;;  %v1948_v1 = vsel %vm233_vm3, %v1945_v9, %v1947_v23 }
 0x223   : > { %1848 = vrot.lane.b32.xlu0 %v1845_v62, %s2619_s30  ;;  %1827 = vrot.lane.b32.xlu1 %v1824_v56, %s2620_s27  ;;  %v1959_v56 = vmul.f32 %v1958_v54, %v3139_v6  ;;  %v1980_v2 = vmul.f32 %v1979_v58, %v3139_v6 }
 0x224   : > { %1806 = vrot.lane.b32.xlu2 %v1803_v0, %s2618_s24  ;;  %v1342_v44 = vadd.f32 %v1338_v24, %v1321_v61  ;;  %v1897_v24 = vmul.f32 %v1895_v14, %v3160_v52 }
 0x225   : > { %v1336_v5 = vpop.permute.xlu1 %1335  ;;  %v1357_v7 = vpop.permute.xlu0 %1356  ;;  %v1965_v39 = vrot.slane %v1959_v56, 5 }
 0x226   : > { %v1341_v10 = vadd.f32 %v1336_v5, %v1320_v3  ;;  %v1401_v11 = vpop.permute.xlu2 %1400  ;;  %v1903_v55 = vrot.slane %v1897_v24, 5  ;;  %v1981_v3 = vmul.f32 %v1979_v58, %v3160_v52  ;;  %v1938_v5 = vmul.f32 %v1937_v33, %v3139_v6 }
 0x228   : > { %v1362_v15 = vadd.f32 %v1357_v7, %v1341_v10  ;;  %v1904_v42 = vsel %vm233_vm3, %v1902_v31, %v1903_v55  ;;  %v1944_v17 = vrot.slane %v1938_v5, 5 }
 0x22a   : > { %v1383_v59 = vadd.f32 %v1378_v41, %v1362_v15  ;;  %v1449_v41 = vstv %s2377_s23  ;;  %v1986_v15 = vrot.slane %v1980_v2, 5  ;;  %v1946_v4 = vsel %vm233_vm3, %v1944_v17, %v1945_v9 }
 0x22b   : > { %1871 = vrot.lane.b32.xlu0 %v1868_v16, %s2621_s6  ;;  %1850 = vrot.lane.b32.xlu1 %v1847_v21, %s2619_s30  ;;  %v1451_v61 = vmul.f32 %v1449_v41, %v3160_v52  ;;  %v1452_v62 = vmul.f32 %v1449_v41, %v3200_v36  ;;  %v1450_v7 = vmul.f32 %v1449_v41, %v3139_v6  ;;  %v1987_v16 = vrot.slane %v1981_v3, 5 }
 0x22c   : > { %1829 = vrot.lane.b32.xlu2 %v1826_v25, %s2620_s27  ;;  %v2000_v21 = vstv %s2404_s17  ;;  %v1982_v25 = vmul.f32 %v1979_v58, %v3200_v36  ;;  %s2204_s17 = scalar_lea.sflag [#allocation4], %s2736_s4 }
 0x22d   : > { %v1359_v27 = vpop.permute.xlu1 %1358  ;;  %v1380_v18 = vpop.permute.xlu0 %1379  ;;  %v1457_v8 = vrot.slane %v1451_v61, 2  ;;  %v1459_v10 = vrot.slane %v1452_v62, 2  ;;  %v1456_v20 = vrot.slane %v1450_v7, 2  ;;  %v2003_v28 = vmul.f32 %v2000_v21, %v3200_v36 }
 0x22e   : > { %v1363_v29 = vadd.f32 %v1359_v27, %v1342_v44  ;;  %v1441_v30 = vpop.permute.xlu2 %1440  ;;  %v1906_v44 = vsel %vm233_vm3, %v1903_v55, %v1905_v19  ;;  %v1988_v27 = vsel %vm233_vm3, %v1986_v15, %v1987_v16 }
 0x22f   : > { %v1460_v24 = vsel %vm504_vm5, %v1457_v8, %v1459_v10  ;;  %v2010_v37 = vrot.slane %v2003_v28, 5 }
 0x230   : > { %v1384_v35 = vadd.f32 %v1380_v18, %v1363_v29  ;;  %v2002_v18 = vmul.f32 %v2000_v21, %v3160_v52  ;;  %v1458_v29 = vsel %vm504_vm5, %v1456_v20, %v1457_v8 }
 0x232   : > { %v1405_v46 = vadd.f32 %v1401_v11, %v1384_v35  ;;  %v1989_v35 = vrot.slane %v1982_v25, 5 }
 0x233   : > { %1928 = vrot.lane.b32.xlu0 %v1925_v34, %s2616_s14  ;;  %1907 = vrot.lane.b32.xlu1 %v1904_v42, %s2617_s16  ;;  %v2008_v42 = vrot.slane %v2002_v18, 5 }
 0x234   : > { %1869 = vrot.lane.b32.xlu2 %v1866_v47, %s2621_s6  ;;  %v2059_v47 = vstv %s2407_s25  ;;  %v1990_v49 = vsel %vm233_vm3, %v1987_v16, %v1989_v35 }
 0x235   : > { %v1399_v50 = vpop.permute.xlu1 %1398  ;;  %v1420_v53 = vpop.permute.xlu0 %1419  ;;  %v2011_v41 = vsel %vm233_vm3, %v2008_v42, %v2010_v37  ;;  %v2062_v3 = vmul.f32 %v2059_v47, %v3200_v36 }
 0x236   : > { %v1404_v51 = vadd.f32 %v1399_v50, %v1383_v59  ;;  %v1481_v43 = vpop.permute.xlu2 %1480  ;;  %v1967_v59 = vsel %vm233_vm3, %v1965_v39, %v1966_v12  ;;  %v2039_v50 = vmul.f32 %v2038_v45, %v3139_v6 }
 0x237   : > { %v2069_v39 = vrot.slane %v2062_v3, 6 }
 0x238   : > { %v1425_v57 = vadd.f32 %v1420_v53, %v1404_v51  ;;  %v2040_v53 = vmul.f32 %v2038_v45, %v3160_v52  ;;  %v2060_v51 = vmul.f32 %v2059_v47, %v3139_v6 }
 0x23a   : > { %v1446_v0 = vadd.f32 %v1441_v30, %v1425_v57  ;;  %v1961_v30 = vmul.f32 %v1958_v54, %v3200_v36  ;;  %v2001_v54 = vmul.f32 %v2000_v21, %v3139_v6  ;;  %v2045_v57 = vrot.slane %v2039_v50, 6 }
 0x23b   : > { %1930 = vrot.lane.b32.xlu1 %v1927_v60, %s2616_s14  ;;  %1951 = vrot.lane.b32.xlu0 %v1948_v1, %s2618_s24  ;;  %v2046_v60 = vrot.slane %v2040_v53, 6  ;;  %v2066_v56 = vrot.slane %v2060_v51, 6  ;;  %v2080_v1 = vstv %s2408_s26  ;;  %v2101_v21 = vstv %s2409_s3  ;;  %s2560_s3 = scalar_lea.hbm %s3547_s2, 32 }
 0x23c   : > { %1909 = vrot.lane.b32.xlu2 %v1906_v44, %s2617_s16  ;;  %v1463_v31 = vadd.f32 %v1458_v29, %v1446_v0  ;;  %v2007_v0 = vrot.slane %v2001_v54, 5  ;;  %v2082_v7 = vmul.f32 %v2080_v1, %v3160_v52  ;;  %v2102_v18 = vmul.f32 %v2101_v21, %v3139_v6 }
 0x23d   : > { %v1422_v40 = vpop.permute.xlu1 %1421  ;;  %v1443_v11 = vpop.permute.xlu0 %1442  ;;  %v2047_v44 = vsel %vm1079_vm8, %v2045_v57, %v2046_v60  ;;  %v2103_v28 = vmul.f32 %v2101_v21, %v3160_v52 }
 0x23e   : > { %v1426_v13 = vadd.f32 %v1422_v40, %v1405_v46  ;;  %v1521_v14 = vpop.permute.xlu2 %1520  ;;  %v1968_v46 = vrot.slane %v1961_v30, 5  ;;  %v2083_v40 = vmul.f32 %v2080_v1, %v3200_v36  ;;  %v2009_v10 = vsel %vm233_vm3, %v2007_v0, %v2008_v42 }
 0x23f   : > { %v2088_v17 = vrot.slane %v2082_v7, 6  ;;  %v2108_v37 = vrot.slane %v2102_v18, 6 }
 0x240   : > { %v1447_v22 = vadd.f32 %v1443_v11, %v1426_v13  ;;  %v1969_v23 = vsel %vm233_vm3, %v1966_v12, %v1968_v46  ;;  %v2041_v11 = vmul.f32 %v2038_v45, %v3200_v36  ;;  %v2090_v20 = vrot.slane %v2083_v40, 6 }
 0x241   : > { %v2109_v45 = vrot.slane %v2103_v28, 6 }
 0x242   : > { %v1464_v26 = vadd.f32 %v1460_v24, %v1447_v22  ;;  %v2048_v22 = vrot.slane %v2041_v11, 6  ;;  %v2122_v24 = vstv %s2410_s7  ;;  %v2091_v29 = vsel %vm1079_vm8, %v2088_v17, %v2090_v20 }
 0x243   : > { %1970 = vrot.lane.b32.xlu1 %v1967_v59, %s2620_s27  ;;  %1991 = vrot.lane.b32.xlu0 %v1988_v27, %s2619_s30  ;;  %v2123_v30 = vmul.f32 %v2122_v24, %v3139_v6 }
 0x244   : > { %1949 = vrot.lane.b32.xlu2 %v1946_v4, %s2618_s24  ;;  %v1485_v55 = vadd.f32 %v1481_v43, %v1464_v26  ;;  %v2061_v43 = vmul.f32 %v2059_v47, %v3160_v52 }
 0x245   : > { %v1479_v32 = vpop.permute.xlu1 %1478  ;;  %v1500_v33 = vpop.permute.xlu0 %1499 }
 0x246   : > { %v1484_v38 = vadd.f32 %v1479_v32, %v1463_v31  ;;  %v1544_v34 = vpop.permute.xlu2 %1543  ;;  %v2067_v63 = vrot.slane %v2061_v43, 6  ;;  %v2124_v31 = vmul.f32 %v2122_v24, %v3160_v52  ;;  %v2081_v32 = vmul.f32 %v2080_v1, %v3139_v6 }
 0x248   : > { %v1505_v48 = vadd.f32 %v1500_v33, %v1484_v38  ;;  %v2068_v5 = vsel %vm1079_vm8, %v2066_v56, %v2067_v63  ;;  %v2070_v25 = vsel %vm1079_vm8, %v2067_v63, %v2069_v39  ;;  %v2087_v50 = vrot.slane %v2081_v32, 6 }
 0x24a   : > { %v1526_v9 = vadd.f32 %v1521_v14, %v1505_v48  ;;  %v1592_v14 = vstv %s2384_s29  ;;  %v2129_v48 = vrot.slane %v2123_v30, 6 }
 0x24b   : > { %1993 = vrot.lane.b32.xlu1 %v1990_v49, %s2619_s30  ;;  %2014 = vrot.lane.b32.xlu0 %v2011_v41, %s2621_s6  ;;  %v1594_v26 = vmul.f32 %v1592_v14, %v3160_v52  ;;  %v1595_v27 = vmul.f32 %v1592_v14, %v3200_v36  ;;  %v1593_v33 = vmul.f32 %v1592_v14, %v3139_v6  ;;  %v2130_v49 = vrot.slane %v2124_v31, 6 }
 0x24c   : > { %1972 = vrot.lane.b32.xlu2 %v1969_v23, %s2620_s27  ;;  %v2143_v41 = vstv %s2411_s8  ;;  %v2125_v23 = vmul.f32 %v2122_v24, %v3200_v36 }
 0x24d   : > { %v1502_v19 = vpop.permute.xlu1 %1501  ;;  %v1523_v58 = vpop.permute.xlu0 %1522  ;;  %v1600_v38 = vrot.slane %v1594_v26, 3  ;;  %v1599_v53 = vrot.slane %v1593_v33, 3  ;;  %v2146_v57 = vmul.f32 %v2143_v41, %v3200_v36 }
 0x24e   : > { %v1506_v61 = vadd.f32 %v1502_v19, %v1485_v55  ;;  %v1584_v62 = vpop.permute.xlu2 %1583  ;;  %v2049_v55 = vsel %vm1079_vm8, %v2046_v60, %v2048_v22  ;;  %v2131_v19 = vsel %vm1079_vm8, %v2129_v48, %v2130_v49  ;;  %v2089_v60 = vsel %vm1079_vm8, %v2087_v50, %v2088_v17 }
 0x24f   : > { %v2153_v7 = vrot.slane %v2146_v57, 6 }
 0x250   : > { %v1527_v2 = vadd.f32 %v1523_v58, %v1506_v61  ;;  %v2145_v58 = vmul.f32 %v2143_v41, %v3160_v52  ;;  %v1601_v61 = vsel %vm648_vm6, %v1599_v53, %v1600_v38 }
 0x252   : > { %v1548_v8 = vadd.f32 %v1544_v34, %v1527_v2  ;;  %v1602_v34 = vrot.slane %v1595_v27, 3 }
 0x253   : > { %2050 = vrot.lane.b32.xlu1 %v2047_v44, %s2617_s16  ;;  %2071 = vrot.lane.b32.xlu0 %v2068_v5, %s2616_s14  ;;  %v2132_v44 = vrot.slane %v2125_v23, 6  ;;  %v2151_v5 = vrot.slane %v2145_v58, 6 }
 0x254   : > { %2012 = vrot.lane.b32.xlu2 %v2009_v10, %s2621_s6  ;;  %v1603_v43 = vsel %vm648_vm6, %v1600_v38, %v1602_v34 }
 0x255   : > { %v1542_v12 = vpop.permute.xlu1 %1541  ;;  %v1563_v13 = vpop.permute.xlu0 %1562  ;;  %v2133_v10 = vsel %vm1079_vm8, %v2130_v49, %v2132_v44  ;;  %v2154_v11 = vsel %vm1079_vm8, %v2151_v5, %v2153_v7 }
 0x256   : > { %v1547_v15 = vadd.f32 %v1542_v12, %v1526_v9  ;;  %v1624_v16 = vpop.permute.xlu2 %1623  ;;  %v2110_v9 = vsel %vm1079_vm8, %v2108_v37, %v2109_v45 }
 0x258   : > { %v1568_v59 = vadd.f32 %v1563_v13, %v1547_v15  ;;  %v2144_v13 = vmul.f32 %v2143_v41, %v3139_v6 }
 0x25a   : > { %v1589_v4 = vadd.f32 %v1584_v62, %v1568_v59  ;;  %v2104_v62 = vmul.f32 %v2101_v21, %v3200_v36  ;;  %v2150_v20 = vrot.slane %v2144_v13, 6 }
 0x25b   : > { %2073 = vrot.lane.b32.xlu1 %v2070_v25, %s2616_s14  ;;  %2094 = vrot.lane.b32.xlu0 %v2091_v29, %s2618_s24  ;;  %s2391_s14 = sld [smem:[#allocation6 + $0x9c]] }
 0x25c   : > { %2052 = vrot.lane.b32.xlu2 %v2049_v55, %s2617_s16  ;;  %v1606_v56 = vadd.f32 %v1601_v61, %v1589_v4  ;;  %v2111_v40 = vrot.slane %v2104_v62, 6  ;;  %v2152_v24 = vsel %vm1079_vm8, %v2150_v20, %v2151_v5  ;;  %s2398_s16 = sld [smem:[#allocation6 + $0xa3]] }
 0x25d   : > { %v1565_v35 = vpop.permute.xlu1 %1564  ;;  %v1586_v42 = vpop.permute.xlu0 %1585 }
 0x25e   : > { %v1569_v46 = vadd.f32 %v1565_v35, %v1548_v8  ;;  %v1664_v47 = vpop.permute.xlu2 %1663  ;;  %v2112_v12 = vsel %vm1079_vm8, %v2109_v45, %v2111_v40 }
 0x260   : > { %v1590_v51 = vadd.f32 %v1586_v42, %v1569_v46 }
 0x261   : > { %v1735_v33 = vstv %s2391_s14 }
 0x262   : > { %v1607_v54 = vadd.f32 %v1603_v43, %v1590_v51  ;;  %v1737_v38 = vmul.f32 %v1735_v33, %v3160_v52  ;;  %v1736_v34 = vmul.f32 %v1735_v33, %v3139_v6  ;;  %v1738_v37 = vmul.f32 %v1735_v33, %v3200_v36 }
 0x263   : > { %2113 = vrot.lane.b32.xlu1 %v2110_v9, %s2620_s27  ;;  %2134 = vrot.lane.b32.xlu0 %v2131_v19, %s2619_s30 }
 0x264   : > { %2092 = vrot.lane.b32.xlu2 %v2089_v60, %s2618_s24  ;;  %v1628_v63 = vadd.f32 %v1624_v16, %v1607_v54  ;;  %v1743_v45 = vrot.slane %v1737_v38, 4  ;;  %v1742_v46 = vrot.slane %v1736_v34, 4  ;;  %v1745_v41 = vrot.slane %v1738_v37, 4  ;;  %s2405_s24 = sld [smem:[#allocation6 + $0xaa]] }
 0x265   : > { %v1622_v0 = vpop.permute.xlu1 %1621  ;;  %v1643_v1 = vpop.permute.xlu0 %1642 }
 0x266   : > { %v1627_v2 = vadd.f32 %v1622_v0, %v1606_v56  ;;  %v1687_v3 = vpop.permute.xlu2 %1686  ;;  %v1744_v51 = vsel %vm792_vm7, %v1742_v46, %v1743_v45  ;;  %v1746_v54 = vsel %vm792_vm7, %v1743_v45, %v1745_v41 }
 0x268   : > { %v1648_v8 = vadd.f32 %v1643_v1, %v1627_v2 }
 0x26a   : > { %v1669_v39 = vadd.f32 %v1664_v47, %v1648_v8 }
 0x26b   : > { %2136 = vrot.lane.b32.xlu1 %v2133_v10, %s2619_s30  ;;  %2157 = vrot.lane.b32.xlu0 %v2154_v11, %s2621_s6  ;;  %s2314_s30 = sshll.u32 %s2736_s4, 4 }
 0x26c   : > { %2115 = vrot.lane.b32.xlu2 %v2112_v12, %s2620_s27  ;;  %s2418_s27 = sshll.u32 %s2660_s13, 4  ;;  %s177_s13 = scalar_lea.vmem [#allocation7], %s2314_s30 }
 0x26d   : > { %v1645_v14 = vpop.permute.xlu1 %1644  ;;  %v1666_v15 = vpop.permute.xlu0 %1665  ;;  %s2215_s23 = scalar_lea.hbm %s3547_s2, %s2418_s27  ;;  %s2216_s28 = sshll.u32 %s177_s13, 4  ;;  %s2217_s28 = int_to_ptr.vmem [resolvable:$true] %s2216_s28 }
 0x26e   : > { %v1649_v16 = vadd.f32 %v1645_v14, %v1628_v63  ;;  %v1727_v17 = vpop.permute.xlu2 %1726  ;;  %s2218_s5 = sshll.u32 %s2215_s23, 4  ;;  %s2219_s5 = int_to_ptr.hbm [resolvable:$true] %s2218_s5 }
 0x26f   : > { %s2554_s19 = sshra.s32 %s2219_s5, 4  ;;  %s2555_s19 = int_to_ptr.hbm [resolvable:$true] %s2554_s19 }
 0x270   : > { %v1670_v21 = vadd.f32 %v1666_v15, %v1649_v16  ;;  %s2556_s25 = scalar_lea.hbm %s2555_s19, 16  ;;  %p2561_p0 = scmp.lt.s32.totalorder %s2555_s19, %s3547_s2 }
 0x271   : > { %p2557_p4 = scmp.ne.s32.totalorder %s2555_s19, %s2556_s25  ;;  %p2562_p3 = scmp.lt.s32.totalorder %s2560_s3, %s2556_s25 }
 0x272   : > { %v1691_v22 = vadd.f32 %v1687_v3, %v1670_v21  ;;  %v1878_v3 = vstv %s2398_s16 }
 0x273   : > { %v1880_v7 = vmul.f32 %v1878_v3, %v3160_v52  ;;  %v1879_v40 = vmul.f32 %v1878_v3, %v3139_v6  ;;  %v1881_v11 = vmul.f32 %v1878_v3, %v3200_v36  ;;  %p2558_p6 = pnand %p2557_p4, %p2691_p11  ;;  %p2563_p5 = por %p2562_p3, %p2561_p0 }
 0x274   : > { %2155 = vrot.lane.b32.xlu2 %v2152_v24, %s2621_s6 }
 0x275   : > { %v1685_v59 = vpop.permute.xlu1 %1684  ;;  %v1706_v25 = vpop.permute.xlu0 %1705  ;;  %v1885_v12 = vrot.slane %v1879_v40, 5  ;;  %v1888_v20 = vrot.slane %v1881_v11, 5  ;;  %p2559_p13 = pneg %p2558_p6 }
 0x276   : > { %v1767_v26 = vpop.permute.xlu2 %1766  ;;  %v1690_v32 = vadd.f32 %v1685_v59, %v1669_v39  ;;  %v1886_v39 = vrot.slane %v1880_v7, 5 }
 0x277   : > { %p2564_p8 = pnand %p2563_p5, %p2559_p13 }
 0x278   : > { %v1711_v42 = vadd.f32 %v1706_v25, %v1690_v32  ;;  %v1887_v21 = vsel %vm233_vm3, %v1885_v12, %v1886_v39  ;;  %v1889_v25 = vsel %vm233_vm3, %v1886_v39, %v1888_v20 }
 0x27a   : > { %v1732_v49 = vadd.f32 %v1727_v17, %v1711_v42 }
 0x27c   : > { %v1749_v9 = vadd.f32 %v1744_v51, %v1732_v49 }
 0x27d   : > { %v1708_v27 = vpop.permute.xlu1 %1707  ;;  %v1729_v18 = vpop.permute.xlu0 %1728 }
 0x27e   : > { %v1807_v28 = vpop.permute.xlu2 %1806  ;;  %v1712_v50 = vadd.f32 %v1708_v27, %v1691_v22 }
 0x280   : > { %v1733_v43 = vadd.f32 %v1729_v18, %v1712_v50 }
 0x282   : > { %v1750_v57 = vadd.f32 %v1746_v54, %v1733_v43 }
 0x284   : > { %v1771_v62 = vadd.f32 %v1767_v26, %v1750_v57 }
 0x285   : > { %v1765_v4 = vpop.permute.xlu1 %1764  ;;  %v1786_v29 = vpop.permute.xlu0 %1785 }
 0x286   : > { %v1830_v30 = vpop.permute.xlu2 %1829  ;;  %v1770_v23 = vadd.f32 %v1765_v4, %v1749_v9 }
 0x288   : > { %v1791_v61 = vadd.f32 %v1786_v29, %v1770_v23 }
 0x28a   : > { %v1812_v63 = vadd.f32 %v1807_v28, %v1791_v61 }
 0x28d   : > { %v1788_v31 = vpop.permute.xlu1 %1787  ;;  %v1809_v55 = vpop.permute.xlu0 %1808 }
 0x28e   : > { %v1870_v35 = vpop.permute.xlu2 %1869  ;;  %v1792_v56 = vadd.f32 %v1788_v31, %v1771_v62 }
 0x290   : > { %v1813_v5 = vadd.f32 %v1809_v55, %v1792_v56 }
 0x292   : > { %v1834_v10 = vadd.f32 %v1830_v30, %v1813_v5 }
 0x295   : > { %v1828_v47 = vpop.permute.xlu1 %1827  ;;  %v1849_v48 = vpop.permute.xlu0 %1848 }
 0x296   : > { %v1910_v53 = vpop.permute.xlu2 %1909  ;;  %v1833_v2 = vadd.f32 %v1828_v47, %v1812_v63 }
 0x298   : > { %v1854_v8 = vadd.f32 %v1849_v48, %v1833_v2 }
 0x29a   : > { %v1875_v15 = vadd.f32 %v1870_v35, %v1854_v8  ;;  %v2021_v35 = vstv %s2405_s24 }
 0x29b   : > { %v2023_v34 = vmul.f32 %v2021_v35, %v3160_v52  ;;  %v2022_v42 = vmul.f32 %v2021_v35, %v3139_v6  ;;  %v2024_v47 = vmul.f32 %v2021_v35, %v3200_v36 }
 0x29c   : > { %v1892_v24 = vadd.f32 %v1887_v21, %v1875_v15 }
 0x29d   : > { %v1851_v19 = vpop.permute.xlu1 %1850  ;;  %v1872_v58 = vpop.permute.xlu0 %1871  ;;  %v2029_v48 = vrot.slane %v2023_v34, 6  ;;  %v2028_v49 = vrot.slane %v2022_v42, 6  ;;  %v2031_v43 = vrot.slane %v2024_v47, 6 }
 0x29e   : > { %v1950_v60 = vpop.permute.xlu2 %1949  ;;  %v1855_v16 = vadd.f32 %v1851_v19, %v1834_v10 }
 0x29f   : > { %v2030_v9 = vsel %vm1079_vm8, %v2028_v49, %v2029_v48  ;;  %v2032_v52 = vsel %vm1079_vm8, %v2029_v48, %v2031_v43 }
 0x2a0   : > { %v1876_v22 = vadd.f32 %v1872_v58, %v1855_v16 }
 0x2a2   : > { %v1893_v18 = vadd.f32 %v1889_v25, %v1876_v22 }
 0x2a4   : > { %v1914_v4 = vadd.f32 %v1910_v53, %v1893_v18 }
 0x2a5   : > { %v1908_v0 = vpop.permute.xlu1 %1907  ;;  %v1929_v1 = vpop.permute.xlu0 %1928 }
 0x2a6   : > { %v1973_v44 = vpop.permute.xlu2 %1972  ;;  %v1913_v59 = vadd.f32 %v1908_v0, %v1892_v24 }
 0x2a8   : > { %v1934_v28 = vadd.f32 %v1929_v1, %v1913_v59 }
 0x2aa   : > { %v1955_v31 = vadd.f32 %v1950_v60, %v1934_v28 }
 0x2ad   : > { %v1931_v13 = vpop.permute.xlu1 %1930  ;;  %v1952_v14 = vpop.permute.xlu0 %1951 }
 0x2ae   : > { %v2013_v17 = vpop.permute.xlu2 %2012  ;;  %v1935_v30 = vadd.f32 %v1931_v13, %v1914_v4 }
 0x2b0   : > { %v1956_v38 = vadd.f32 %v1952_v14, %v1935_v30 }
 0x2b2   : > { %v1977_v45 = vadd.f32 %v1973_v44, %v1956_v38 }
 0x2b5   : > { %v1971_v26 = vpop.permute.xlu1 %1970  ;;  %v1992_v27 = vpop.permute.xlu0 %1991 }
 0x2b6   : > { %v2053_v29 = vpop.permute.xlu2 %2052  ;;  %v1976_v33 = vadd.f32 %v1971_v26, %v1955_v31 }
 0x2b8   : > { %v1997_v37 = vadd.f32 %v1992_v27, %v1976_v33 }
 0x2ba   : > { %v2018_v41 = vadd.f32 %v2013_v17, %v1997_v37 }
 0x2bc   : > { %v2035_v54 = vadd.f32 %v2030_v9, %v2018_v41 }
 0x2bd   : > { %v1994_v55 = vpop.permute.xlu1 %1993  ;;  %v2015_v32 = vpop.permute.xlu0 %2014 }
 0x2be   : > { %v2093_v46 = vpop.permute.xlu2 %2092  ;;  %v1998_v51 = vadd.f32 %v1994_v55, %v1977_v45 }
 0x2c0   : > { %v2019_v23 = vadd.f32 %v2015_v32, %v1998_v51 }
 0x2c2   : > { %v2036_v57 = vadd.f32 %v2032_v52, %v2019_v23 }
 0x2c4   : > { %v2057_v36 = vadd.f32 %v2053_v29, %v2036_v57 }
 0x2c5   : > { %v2051_v50 = vpop.permute.xlu1 %2050  ;;  %v2072_v53 = vpop.permute.xlu0 %2071 }
 0x2c6   : > { %v2056_v19 = vadd.f32 %v2051_v50, %v2035_v54  ;;  %v2116_v60 = vpop.permute.xlu2 %2115 }
 0x2c8   : > { %v2077_v61 = vadd.f32 %v2072_v53, %v2056_v19 }
 0x2ca   : > { %v2098_v56 = vadd.f32 %v2093_v46, %v2077_v61 }
 0x2cd   : > { %v2074_v6 = vpop.permute.xlu1 %2073  ;;  %v2095_v58 = vpop.permute.xlu0 %2094 }
 0x2ce   : > { %v2078_v62 = vadd.f32 %v2074_v6, %v2057_v36  ;;  %v2156_v44 = vpop.permute.xlu2 %2155 }
 0x2d0   : > { %v2099_v2 = vadd.f32 %v2095_v58, %v2078_v62 }
 0x2d2   : > { %v2120_v40 = vadd.f32 %v2116_v60, %v2099_v2 }
 0x2d5   : > { %v2114_v63 = vpop.permute.xlu1 %2113  ;;  %v2135_v0 = vpop.permute.xlu0 %2134 }
 0x2d6   : > { %v2119_v1 = vadd.f32 %v2114_v63, %v2098_v56 }
 0x2d8   : > { %v2140_v3 = vadd.f32 %v2135_v0, %v2119_v1 }
 0x2da   : > { %v2161_v5 = vadd.f32 %v2156_v44, %v2140_v3 }
 0x2dc   : > { %v2163_v7 = vsub.f32 0.0, %v2161_v5 }
 0x2dd   : > { %v2137_v8 = vpop.permute.xlu1 %2136  ;;  %v2158_v39 = vpop.permute.xlu0 %2157 }
 0x2de   : > { %v2165_v10 = vmul.f32 1.442695, %v2163_v7  ;;  %v2141_v11 = vadd.f32 %v2137_v8, %v2120_v40 }
 0x2e0   : > { %2487 = vpow2.f32 %v2165_v10  ;;  %v2162_v12 = vadd.f32 %v2158_v39, %v2141_v11 }
 0x2e2   : > { %v2164_v13 = vsub.f32 0.0, %v2162_v12 }
 0x2e4   : > { %v2167_v14 = vmul.f32 1.442695, %v2164_v13 }
 0x2e6   : > { %v2488_v15 = vpop.eup %2487  ;;  %2489 = vpow2.f32 %v2167_v14 }
 0x2e7   : > { %v2169_v16 = vadd.f32 1.0, %v2488_v15 }
 0x2e9   : > { %2491 = vrcp.f32 %v2169_v16  ;;  %v2182_v59 = vand.u32 2147483648, %v2169_v16  ;;  %v2180_v26 = vand.u32 2147483647, %v2169_v16  ;;  %vm2176_vm10 = vweird.f32 %v2169_v16 }
 0x2eb   : > { %v2183_v4 = vor.u32 1.1754944e-38, %v2182_v59  ;;  %vm2181_vm12 = vcmp.eq.f32.partialorder %v2180_v26, 8.507059e+37 }
 0x2ec   : > { %v2490_v17 = vpop.eup %2489 }
 0x2ed   : > { %v2170_v20 = vadd.f32 1.0, %v2490_v17 }
 0x2ef   : > { %v2492_v21 = vpop.eup %2491  ;;  %2493 = vrcp.f32 %v2170_v20  ;;  %v2197_v31 = vand.u32 2147483648, %v2170_v20  ;;  %v2195_v33 = vand.u32 2147483647, %v2170_v20  ;;  %vm2191_vm14 = vweird.f32 %v2170_v20 }
 0x2f0   : > { %v2172_v22 = vmul.f32 %v2492_v21, %v2169_v16  ;;  %vm2177_vm9 = vweird.f32 %v2492_v21 }
 0x2f1   : > { %vm2178_vm11 = vmor %vm2176_vm10, %vm2177_vm9  ;;  %v2198_v38 = vor.u32 1.1754944e-38, %v2197_v31  ;;  %vm2196_vm1 = vcmp.eq.f32.partialorder %v2195_v33, 8.507059e+37 }
 0x2f2   : > { %v2173_v24 = vsub.f32 1.0, %v2172_v22 }
 0x2f4   : > { %v2174_v25 = vmul.f32 %v2492_v21, %v2173_v24 }
 0x2f5   : > { %v2494_v27 = vpop.eup %2493 }
 0x2f6   : > { %v2187_v18 = vmul.f32 %v2494_v27, %v2170_v20  ;;  %v2175_v28 = vadd.f32 %v2492_v21, %v2174_v25  ;;  %vm2192_vm13 = vweird.f32 %v2494_v27 }
 0x2f7   : > { %vm2193_vm15 = vmor %vm2191_vm14, %vm2192_vm13 }
 0x2f8   : > { %v2188_v29 = vsub.f32 1.0, %v2187_v18  ;;  %v2179_v30 = vsel %vm2178_vm11, %v2492_v21, %v2175_v28 }
 0x2f9   : > { %v2184_v55 = vsel %vm2181_vm12, %v2183_v4, %v2179_v30 }
 0x2fa   : > { %v2189_v32 = vmul.f32 %v2494_v27, %v2188_v29  ;;  %2201 = vst.msk [vmem:[%s177_s13] sm:$0xff] %vm186_vm0, %v2184_v55 }
 0x2fc   : > { %v2190_v35 = vadd.f32 %v2494_v27, %v2189_v32 }
 0x2fe   : > { %v2194_v34 = vsel %vm2193_vm15, %v2494_v27, %v2190_v35 }
 0x2ff   : > { %v2199_v42 = vsel %vm2196_vm1, %v2198_v38, %v2194_v34 }
 0x300   : > { %2202 = vst.msk [vmem:[%s177_s13 + $0x8] sm:$0xff] %vm186_vm0, %v2199_v42 }
 0x301   : > { %2567 = shalt.err (!%p2564_p8)
}
 0x302   : > { %s2622_s4 = smov 128   ;;  %s2623_s14 = smov 8  }
 0x303   : > { %2425 = dma.vmem_to_hbm [thread:$0]  (%p2691_p11), %s2217_s28, 256, %s2219_s5, %s2204_s17, %s2622_s4, %s2622_s4, %s2623_s14  }
 0x304 PF: > { %s2233_s16 = sand.u32 1, %s2598_s9   ;;  %p3554_p9 = scmp.ge.s32.totalorder %s2610_s12, 2 }
 0x305   : > { %s2234_s24 = scalar_lea.sflag [#allocation4], %s2233_s16 }
 0x306   : > { %p2436_p10 = pnand %p3554_p9, %p2695_p12 }
 0x308   : > { %p2437_p1 = pneg %p2436_p10 }
 0x30a   : > { %2593 = dma.done.wait (%p2437_p1), %s2234_s24, 256  }
 0x30b   : > { %2595 = vsyncadd (%p2437_p1), %s2234_s24, 4294967040  ;;  %p16_p2 = scmp.ge.s32.totalorder %s2664_s15, 4   ;;  %s3555_s9 = smov %s2602_s10 }
 0x30c   : > { %s3556_s10 = smov %s2606_s11  ;;  %s3557_s11 = smov %s2676_s18 }
 0x30d   : > { %s3558_s12 = smov %s2664_s15  ;;  %18 = sbr.rel (!%p16_p2) target bundleno = 6 (0x6), region = 78 }
 0x312   :  { %2240 = vsyncpa [#allocation3], 1 }
 0x313   :  { %2242 = vsyncpa [#allocation3 + $0x1], 1 }
 0x314   :  { %2243 = vsyncpa [#allocation4], 1 }
 0x315   :  { %2245 = vsyncpa [#allocation4 + $0x1], 1 }
 0x316   :  { %2246 = vsyncpa [#allocation5], 1 }
 0x317   :  { %2248 = vsyncpa [#allocation5 + $0x1], 1 }

</bundles_post_ra>
